<compile_context>
chip_gen: v6e
topology: v6e:2x2x1
jax: 0.10.0
libtpu: 0.0.40
codegen_flags: <defaults>
</compile_context>

<pallas_src>
import functools

import jax
import jax.numpy as jnp
from jax import lax
from jax.experimental import pallas as pl
from jax.experimental.pallas import tpu as pltpu


def _round_up(x, m):
    return (x + m - 1) // m * m


# Tap table: t = kd*9 + kh*3 + kw  ->  (group index, plane shift).
# Groups are ordered (kd parity r, kh, kw): g = r*9 + kh*3 + kw; plane shift sd = kd // 2.
_TAPS = tuple(((kd % 2) * 9 + kh * 3 + kw, kd // 2)
              for kd in range(3) for kh in range(3) for kw in range(3))


# ----------------------------------------------------------------------------
# Fused kernel: depthwise 3x3x3 stride-2 (VPU) -> pointwise 1x1x1 (MXU) -> BN shift
# ----------------------------------------------------------------------------
def _fused_dsconv_kernel(x_ref, w27_ref, wpw_ref, shift_ref, o_ref, *, db, hwp):
    # x_ref:     (18, db+1, HWp, Cp_in)  bf16  tap-group rearranged input (one depth block)
    # w27_ref:   (27, Cp_in)             f32   depthwise weights, row t = (kd, kh, kw)
    # wpw_ref:   (Cp_in, Cp_out)         bf16  pointwise weight with BN scale folded in
    # shift_ref: (1, Cp_out)             f32   folded BN shift
    # o_ref:     (db*HWp, Cp_out)        bf16
    wpw = wpw_ref[...]
    shift = shift_ref[...]
    for od in range(db):                              # one output-depth strip at a time
        acc = None
        for t, (g, sd) in enumerate(_TAPS):           # 27 taps accumulated in f32 vregs
            xt = x_ref[g, od + sd].astype(jnp.float32)            # (HWp, Cp_in)
            term = xt * w27_ref[t:t + 1, :]
            acc = term if acc is None else acc + term
        # Pointwise conv on the MXU (f32 accumulate) + BN epilogue; one dense bf16 store.
        y = jnp.dot(acc.astype(jnp.bfloat16), wpw,
                    preferred_element_type=jnp.float32)           # (HWp, Cp_out)
        o_ref[od * hwp:(od + 1) * hwp, :] = (y + shift).astype(o_ref.dtype)


def _pick_depth_block(do, hwp, cp_in, cp_out, budget=36 * 2 ** 20, max_db=16):
    """Largest output-depth block whose (double-buffered) working set fits the budget."""
    def est(db):
        x_blk = 18 * (db + 1) * hwp * cp_in * 2        # bf16 input block
        o_blk = db * hwp * cp_out * 2                  # bf16 output block
        wts = cp_in * cp_out * 2 + 32 * cp_in * 4 + cp_out * 4
        strip = 2 * hwp * cp_in * 4                    # live f32 strip (vregs / spill)
        return 2 * x_blk + 2 * o_blk + wts + strip
    db = max(1, min(do, max_db))
    while db > 1 and est(db) > budget:
        db -= 1
    return db


def _fused_dsconv(x_g, w27, w_fold, shift, *, db, hwp, cp_out):
    nb, ngrp, dbp1, _, cp_in = x_g.shape
    kernel = functools.partial(_fused_dsconv_kernel, db=db, hwp=hwp)
    return pl.pallas_call(
        kernel,
        out_shape=jax.ShapeDtypeStruct((nb, db * hwp, cp_out), jnp.bfloat16),
        grid=(nb,),
        in_specs=[
            pl.BlockSpec((None, ngrp, dbp1, hwp, cp_in), lambda i: (i, 0, 0, 0, 0)),
            pl.BlockSpec((27, cp_in), lambda i: (0, 0)),
            pl.BlockSpec((cp_in, cp_out), lambda i: (0, 0)),
            pl.BlockSpec((1, cp_out), lambda i: (0, 0)),
        ],
        out_specs=pl.BlockSpec((None, db * hwp, cp_out), lambda i: (i, 0, 0)),
        compiler_params=pltpu.CompilerParams(
            dimension_semantics=("parallel",),
            # <= 48 MiB: keeps headroom on v7x (64 MiB physical VMEM per TensorCore),
            # plenty on v5e/v6e (128 MiB).
            vmem_limit_bytes=48 * 1024 * 1024,
        ),
    )(x_g, w27, w_fold, shift)


# ----------------------------------------------------------------------------
# Forward (wrapper: layout plumbing + weight/BN folding)
# ----------------------------------------------------------------------------
@jax.jit
def dsconv_forward(x, params):
    """x: (N, Cin, D, H, W) float32 (PyTorch NCDHW). Returns (N, Cout, Do, Ho, Wo) f32."""
    w_dw = params["w_dw"]          # (Cin, 3, 3, 3)  == torch depthwise.weight[:, 0]
    w_pw = params["w_pw"]          # (Cout, Cin)     == torch pointwise.weight[:, :, 0, 0, 0]
    eps = 1e-5

    cin = w_dw.shape[0]
    cout = w_pw.shape[0]
    n, xc, d, h, w = x.shape
    assert xc == cin
    # kernel=3, stride=2, padding=1
    do, ho, wo = (d - 1) // 2 + 1, (h - 1) // 2 + 1, (w - 1) // 2 + 1
    cp_in, cp_out = _round_up(cin, 128), _round_up(cout, 128)
    hw = ho * wo
    hwp = _round_up(hw, 16)              # sublane-dense rows (bf16 tile = 16 sublanes)

    db = _pick_depth_block(do, hwp, cp_in, cp_out)
    dbk = -(-do // db)                   # number of depth blocks
    dop = dbk * db

    # channels-last bf16, one combined zero pad (channel pad + spatial conv halo)
    x_cl = jnp.transpose(x, (0, 2, 3, 4, 1)).astype(jnp.bfloat16)
    dp, hp, wp = 2 * dop + 2, 2 * ho + 1, 2 * wo + 1
    xp = jnp.pad(x_cl, ((0, 0), (1, dp - d - 1), (1, hp - h - 1), (1, wp - w - 1),
                        (0, cp_in - cin)))

    # Tap-group gather (single pass): groups = (kd parity) x (kh) x (kw), so every tap in
    # the kernel is a unit-stride leading-dim slice; (Ho, Wo) flattened into one dense
    # sublane axis. Depth blocks carry their 1-plane halo so grid blocks never overlap.
    groups = []
    for b in range(dbk):
        for r in range(2):
            base = 2 * b * db + r
            xr = xp[:, base:base + 2 * db + 1:2]                 # (N, db+1, Hp, Wp, Cp)
            for kh in range(3):
                for kw in range(3):
                    groups.append(xr[:, :, kh:kh + 2 * ho:2, kw:kw + 2 * wo:2, :])
    x_g = jnp.stack(groups, axis=1).reshape(n * dbk, 18, db + 1, hw, cp_in)
    if hwp != hw:
        x_g = jnp.pad(x_g, ((0, 0), (0, 0), (0, 0), (0, hwp - hw), (0, 0)))

    # depthwise weight -> (27, Cp_in) f32, row t = (kd, kh, kw)
    w27 = jnp.pad(w_dw.transpose(1, 2, 3, 0).reshape(27, cin), ((0, 0), (0, cp_in - cin)))
    # pointwise weight with eval-mode BN scale folded into its columns; shift stays f32
    scale = params["gamma"] / jnp.sqrt(params["running_var"] + eps)
    shift = params["beta"] - params["running_mean"] * scale
    w_fold = jnp.pad((w_pw * scale[:, None]).T,
                     ((0, cp_in - cin), (0, cp_out - cout))).astype(jnp.bfloat16)
    shift = jnp.pad(shift, (0, cp_out - cout)).reshape(1, cp_out)

    y = _fused_dsconv(x_g, w27, w_fold, shift, db=db, hwp=hwp, cp_out=cp_out)
    # (N*DB, db*HWp, Cp_out) bf16 -> (N, Cout, Do, Ho, Wo) f32 (one fused XLA epilogue pass)
    y = y.reshape(n, dop, hwp, cp_out)[:, :do, :hw, :cout].reshape(n, do, ho, wo, cout)
    return jnp.transpose(y, (0, 4, 1, 2, 3)).astype(jnp.float32)


# ----------------------------------------------------------------------------
# Deterministic parameters + pure-JAX reference
# ----------------------------------------------------------------------------
def make_params(key, in_channels, out_channels):
    ks = jax.random.split(key, 6)
    w_dw = jax.random.normal(ks[0], (in_channels, 3, 3, 3), jnp.float32) * (1.0 / 27.0) ** 0.5
    w_pw = jax.random.normal(ks[1], (out_channels, in_channels), jnp.float32) * (1.0 / in_channels) ** 0.5
    gamma = jax.random.uniform(ks[2], (out_channels,), jnp.float32, minval=0.5, maxval=1.5)
    beta = 0.1 * jax.random.normal(ks[3], (out_channels,), jnp.float32)
    running_mean = 0.1 * jax.random.normal(ks[4], (out_channels,), jnp.float32)
    running_var = jax.random.uniform(ks[5], (out_channels,), jnp.float32, minval=0.5, maxval=1.5)
    return dict(w_dw=w_dw, w_pw=w_pw, gamma=gamma, beta=beta,
                running_mean=running_mean, running_var=running_var)


def reference_forward(x, params, eps=1e-5):
    cin = params["w_dw"].shape[0]
    dn = ("NCDHW", "OIDHW", "NCDHW")
    y = lax.conv_general_dilated(
        x, params["w_dw"][:, None], window_strides=(2, 2, 2),
        padding=((1, 1), (1, 1), (1, 1)), dimension_numbers=dn,
        feature_group_count=cin)
    y = lax.conv_general_dilated(
        y, params["w_pw"][:, :, None, None, None], window_strides=(1, 1, 1),
        padding="VALID", dimension_numbers=dn)
    g = params["gamma"][None, :, None, None, None]
    b = params["beta"][None, :, None, None, None]
    mu = params["running_mean"][None, :, None, None, None]
    var = params["running_var"][None, :, None, None, None]
    return (y - mu) / jnp.sqrt(var + eps) * g + b


if __name__ == "__main__":
    # Small shapes: batch=2, in_channels=32, out_channels=64, spatial 8^3 (stride 2 -> 4^3).
    n, cin, cout = 2, 32, 64
    d = h = w = 8

    key = jax.random.PRNGKey(0)
    kx, kp = jax.random.split(key)
    x = jax.random.normal(kx, (n, cin, d, h, w), jnp.float32)   # NCDHW (PyTorch layout)
    params = make_params(kp, cin, cout)

    out = jax.block_until_ready(dsconv_forward(x, params))
    ref = jax.block_until_ready(reference_forward(x, params))

    assert out.shape == (n, cout, 4, 4, 4), out.shape
    max_err = float(jnp.max(jnp.abs(out - ref)))
    assert jnp.allclose(out, ref, atol=5e-2, rtol=5e-2), max_err
    print("KERNEL_OK")
</pallas_src>

<mosaic_0001>
module attributes {stable_mosaic.version = 11 : i64} {
  func.func @_fused_dsconv_kernel(%arg0: i32, %arg1: memref<1x18x5x16x128xbf16, #tpu.memory_space<vmem>>, %arg2: memref<27x128xf32, #tpu.memory_space<vmem>>, %arg3: memref<128x128xbf16, #tpu.memory_space<vmem>>, %arg4: memref<1x128xf32, #tpu.memory_space<vmem>>, %arg5: memref<1x64x128xbf16, #tpu.memory_space<vmem>>) attributes {dimension_semantics = [#tpu.dimension_semantics<parallel>], iteration_bounds = array<i64: 2>, scalar_prefetch = 0 : i64, scratch_operands = 0 : i64, tpu.core_type = #tpu.core_type<tc>, window_params = [{transform_indices = @transform_0, window_bounds = array<i64: 1, 18, 5, 16, 128>}, {pipeline_mode = #tpu.pipeline_mode<synchronous>, transform_indices = @transform_1, window_bounds = array<i64: 27, 128>}, {pipeline_mode = #tpu.pipeline_mode<synchronous>, transform_indices = @transform_2, window_bounds = array<i64: 128, 128>}, {pipeline_mode = #tpu.pipeline_mode<synchronous>, transform_indices = @transform_3, window_bounds = array<i64: 1, 128>}, {transform_indices = @transform_4, window_bounds = array<i64: 1, 64, 128>}]} {
    %c0 = arith.constant 0 : index
    %c0_0 = arith.constant 0 : index
    %0 = vector.load %arg3[%c0, %c0_0] : memref<128x128xbf16, #tpu.memory_space<vmem>>, vector<128x128xbf16>
    %c0_1 = arith.constant 0 : index
    %c0_2 = arith.constant 0 : index
    %1 = vector.load %arg4[%c0_1, %c0_2] : memref<1x128xf32, #tpu.memory_space<vmem>>, vector<1x128xf32>
    %c0_3 = arith.constant 0 : index
    %c0_4 = arith.constant 0 : index
    %c0_5 = arith.constant 0 : index
    %c0_6 = arith.constant 0 : index
    %c0_7 = arith.constant 0 : index
    %2 = vector.load %arg1[%c0_3, %c0_4, %c0_5, %c0_6, %c0_7] : memref<1x18x5x16x128xbf16, #tpu.memory_space<vmem>>, vector<1x1x1x16x128xbf16>
    %3 = vector.shape_cast %2 : vector<1x1x1x16x128xbf16> to vector<16x128xbf16>
    %4 = arith.extf %3 : vector<16x128xbf16> to vector<16x128xf32>
    %c0_8 = arith.constant 0 : index
    %c0_9 = arith.constant 0 : index
    %5 = vector.load %arg2[%c0_8, %c0_9] : memref<27x128xf32, #tpu.memory_space<vmem>>, vector<1x128xf32>
    %6 = vector.broadcast %5 : vector<1x128xf32> to vector<16x128xf32>
    %7 = arith.mulf %4, %6 : vector<16x128xf32>
    %c0_10 = arith.constant 0 : index
    %c1 = arith.constant 1 : index
    %c0_11 = arith.constant 0 : index
    %c0_12 = arith.constant 0 : index
    %c0_13 = arith.constant 0 : index
    %8 = vector.load %arg1[%c0_10, %c1, %c0_11, %c0_12, %c0_13] : memref<1x18x5x16x128xbf16, #tpu.memory_space<vmem>>, vector<1x1x1x16x128xbf16>
    %9 = vector.shape_cast %8 : vector<1x1x1x16x128xbf16> to vector<16x128xbf16>
    %10 = arith.extf %9 : vector<16x128xbf16> to vector<16x128xf32>
    %c1_14 = arith.constant 1 : index
    %c0_15 = arith.constant 0 : index
    %11 = vector.load %arg2[%c1_14, %c0_15] : memref<27x128xf32, #tpu.memory_space<vmem>>, vector<1x128xf32>
    %12 = vector.broadcast %11 : vector<1x128xf32> to vector<16x128xf32>
    %13 = arith.mulf %10, %12 : vector<16x128xf32>
    %14 = arith.addf %7, %13 : vector<16x128xf32>
    %c0_16 = arith.constant 0 : index
    %c2 = arith.constant 2 : index
    %c0_17 = arith.constant 0 : index
    %c0_18 = arith.constant 0 : index
    %c0_19 = arith.constant 0 : index
    %15 = vector.load %arg1[%c0_16, %c2, %c0_17, %c0_18, %c0_19] : memref<1x18x5x16x128xbf16, #tpu.memory_space<vmem>>, vector<1x1x1x16x128xbf16>
    %16 = vector.shape_cast %15 : vector<1x1x1x16x128xbf16> to vector<16x128xbf16>
    %17 = arith.extf %16 : vector<16x128xbf16> to vector<16x128xf32>
    %c2_20 = arith.constant 2 : index
    %c0_21 = arith.constant 0 : index
    %18 = vector.load %arg2[%c2_20, %c0_21] : memref<27x128xf32, #tpu.memory_space<vmem>>, vector<1x128xf32>
    %19 = vector.broadcast %18 : vector<1x128xf32> to vector<16x128xf32>
    %20 = arith.mulf %17, %19 : vector<16x128xf32>
    %21 = arith.addf %14, %20 : vector<16x128xf32>
    %c0_22 = arith.constant 0 : index
    %c3 = arith.constant 3 : index
    %c0_23 = arith.constant 0 : index
    %c0_24 = arith.constant 0 : index
    %c0_25 = arith.constant 0 : index
    %22 = vector.load %arg1[%c0_22, %c3, %c0_23, %c0_24, %c0_25] : memref<1x18x5x16x128xbf16, #tpu.memory_space<vmem>>, vector<1x1x1x16x128xbf16>
    %23 = vector.shape_cast %22 : vector<1x1x1x16x128xbf16> to vector<16x128xbf16>
    %24 = arith.extf %23 : vector<16x128xbf16> to vector<16x128xf32>
    %c3_26 = arith.constant 3 : index
    %c0_27 = arith.constant 0 : index
    %25 = vector.load %arg2[%c3_26, %c0_27] : memref<27x128xf32, #tpu.memory_space<vmem>>, vector<1x128xf32>
    %26 = vector.broadcast %25 : vector<1x128xf32> to vector<16x128xf32>
    %27 = arith.mulf %24, %26 : vector<16x128xf32>
    %28 = arith.addf %21, %27 : vector<16x128xf32>
    %c0_28 = arith.constant 0 : index
    %c4 = arith.constant 4 : index
    %c0_29 = arith.constant 0 : index
    %c0_30 = arith.constant 0 : index
    %c0_31 = arith.constant 0 : index
    %29 = vector.load %arg1[%c0_28, %c4, %c0_29, %c0_30, %c0_31] : memref<1x18x5x16x128xbf16, #tpu.memory_space<vmem>>, vector<1x1x1x16x128xbf16>
    %30 = vector.shape_cast %29 : vector<1x1x1x16x128xbf16> to vector<16x128xbf16>
    %31 = arith.extf %30 : vector<16x128xbf16> to vector<16x128xf32>
    %c4_32 = arith.constant 4 : index
    %c0_33 = arith.constant 0 : index
    %32 = vector.load %arg2[%c4_32, %c0_33] : memref<27x128xf32, #tpu.memory_space<vmem>>, vector<1x128xf32>
    %33 = vector.broadcast %32 : vector<1x128xf32> to vector<16x128xf32>
    %34 = arith.mulf %31, %33 : vector<16x128xf32>
    %35 = arith.addf %28, %34 : vector<16x128xf32>
    %c0_34 = arith.constant 0 : index
    %c5 = arith.constant 5 : index
    %c0_35 = arith.constant 0 : index
    %c0_36 = arith.constant 0 : index
    %c0_37 = arith.constant 0 : index
    %36 = vector.load %arg1[%c0_34, %c5, %c0_35, %c0_36, %c0_37] : memref<1x18x5x16x128xbf16, #tpu.memory_space<vmem>>, vector<1x1x1x16x128xbf16>
    %37 = vector.shape_cast %36 : vector<1x1x1x16x128xbf16> to vector<16x128xbf16>
    %38 = arith.extf %37 : vector<16x128xbf16> to vector<16x128xf32>
    %c5_38 = arith.constant 5 : index
    %c0_39 = arith.constant 0 : index
    %39 = vector.load %arg2[%c5_38, %c0_39] : memref<27x128xf32, #tpu.memory_space<vmem>>, vector<1x128xf32>
    %40 = vector.broadcast %39 : vector<1x128xf32> to vector<16x128xf32>
    %41 = arith.mulf %38, %40 : vector<16x128xf32>
    %42 = arith.addf %35, %41 : vector<16x128xf32>
    %c0_40 = arith.constant 0 : index
    %c6 = arith.constant 6 : index
    %c0_41 = arith.constant 0 : index
    %c0_42 = arith.constant 0 : index
    %c0_43 = arith.constant 0 : index
    %43 = vector.load %arg1[%c0_40, %c6, %c0_41, %c0_42, %c0_43] : memref<1x18x5x16x128xbf16, #tpu.memory_space<vmem>>, vector<1x1x1x16x128xbf16>
    %44 = vector.shape_cast %43 : vector<1x1x1x16x128xbf16> to vector<16x128xbf16>
    %45 = arith.extf %44 : vector<16x128xbf16> to vector<16x128xf32>
    %c6_44 = arith.constant 6 : index
    %c0_45 = arith.constant 0 : index
    %46 = vector.load %arg2[%c6_44, %c0_45] : memref<27x128xf32, #tpu.memory_space<vmem>>, vector<1x128xf32>
    %47 = vector.broadcast %46 : vector<1x128xf32> to vector<16x128xf32>
    %48 = arith.mulf %45, %47 : vector<16x128xf32>
    %49 = arith.addf %42, %48 : vector<16x128xf32>
    %c0_46 = arith.constant 0 : index
    %c7 = arith.constant 7 : index
    %c0_47 = arith.constant 0 : index
    %c0_48 = arith.constant 0 : index
    %c0_49 = arith.constant 0 : index
    %50 = vector.load %arg1[%c0_46, %c7, %c0_47, %c0_48, %c0_49] : memref<1x18x5x16x128xbf16, #tpu.memory_space<vmem>>, vector<1x1x1x16x128xbf16>
    %51 = vector.shape_cast %50 : vector<1x1x1x16x128xbf16> to vector<16x128xbf16>
    %52 = arith.extf %51 : vector<16x128xbf16> to vector<16x128xf32>
    %c7_50 = arith.constant 7 : index
    %c0_51 = arith.constant 0 : index
    %53 = vector.load %arg2[%c7_50, %c0_51] : memref<27x128xf32, #tpu.memory_space<vmem>>, vector<1x128xf32>
    %54 = vector.broadcast %53 : vector<1x128xf32> to vector<16x128xf32>
    %55 = arith.mulf %52, %54 : vector<16x128xf32>
    %56 = arith.addf %49, %55 : vector<16x128xf32>
    %c0_52 = arith.constant 0 : index
    %c8 = arith.constant 8 : index
    %c0_53 = arith.constant 0 : index
    %c0_54 = arith.constant 0 : index
    %c0_55 = arith.constant 0 : index
    %57 = vector.load %arg1[%c0_52, %c8, %c0_53, %c0_54, %c0_55] : memref<1x18x5x16x128xbf16, #tpu.memory_space<vmem>>, vector<1x1x1x16x128xbf16>
    %58 = vector.shape_cast %57 : vector<1x1x1x16x128xbf16> to vector<16x128xbf16>
    %59 = arith.extf %58 : vector<16x128xbf16> to vector<16x128xf32>
    %c8_56 = arith.constant 8 : index
    %c0_57 = arith.constant 0 : index
    %60 = vector.load %arg2[%c8_56, %c0_57] : memref<27x128xf32, #tpu.memory_space<vmem>>, vector<1x128xf32>
    %61 = vector.broadcast %60 : vector<1x128xf32> to vector<16x128xf32>
    %62 = arith.mulf %59, %61 : vector<16x128xf32>
    %63 = arith.addf %56, %62 : vector<16x128xf32>
    %c0_58 = arith.constant 0 : index
    %c9 = arith.constant 9 : index
    %c0_59 = arith.constant 0 : index
    %c0_60 = arith.constant 0 : index
    %c0_61 = arith.constant 0 : index
    %64 = vector.load %arg1[%c0_58, %c9, %c0_59, %c0_60, %c0_61] : memref<1x18x5x16x128xbf16, #tpu.memory_space<vmem>>, vector<1x1x1x16x128xbf16>
    %65 = vector.shape_cast %64 : vector<1x1x1x16x128xbf16> to vector<16x128xbf16>
    %66 = arith.extf %65 : vector<16x128xbf16> to vector<16x128xf32>
    %c9_62 = arith.constant 9 : index
    %c0_63 = arith.constant 0 : index
    %67 = vector.load %arg2[%c9_62, %c0_63] : memref<27x128xf32, #tpu.memory_space<vmem>>, vector<1x128xf32>
    %68 = vector.broadcast %67 : vector<1x128xf32> to vector<16x128xf32>
    %69 = arith.mulf %66, %68 : vector<16x128xf32>
    %70 = arith.addf %63, %69 : vector<16x128xf32>
    %c0_64 = arith.constant 0 : index
    %c10 = arith.constant 10 : index
    %c0_65 = arith.constant 0 : index
    %c0_66 = arith.constant 0 : index
    %c0_67 = arith.constant 0 : index
    %71 = vector.load %arg1[%c0_64, %c10, %c0_65, %c0_66, %c0_67] : memref<1x18x5x16x128xbf16, #tpu.memory_space<vmem>>, vector<1x1x1x16x128xbf16>
    %72 = vector.shape_cast %71 : vector<1x1x1x16x128xbf16> to vector<16x128xbf16>
    %73 = arith.extf %72 : vector<16x128xbf16> to vector<16x128xf32>
    %c10_68 = arith.constant 10 : index
    %c0_69 = arith.constant 0 : index
    %74 = vector.load %arg2[%c10_68, %c0_69] : memref<27x128xf32, #tpu.memory_space<vmem>>, vector<1x128xf32>
    %75 = vector.broadcast %74 : vector<1x128xf32> to vector<16x128xf32>
    %76 = arith.mulf %73, %75 : vector<16x128xf32>
    %77 = arith.addf %70, %76 : vector<16x128xf32>
    %c0_70 = arith.constant 0 : index
    %c11 = arith.constant 11 : index
    %c0_71 = arith.constant 0 : index
    %c0_72 = arith.constant 0 : index
    %c0_73 = arith.constant 0 : index
    %78 = vector.load %arg1[%c0_70, %c11, %c0_71, %c0_72, %c0_73] : memref<1x18x5x16x128xbf16, #tpu.memory_space<vmem>>, vector<1x1x1x16x128xbf16>
    %79 = vector.shape_cast %78 : vector<1x1x1x16x128xbf16> to vector<16x128xbf16>
    %80 = arith.extf %79 : vector<16x128xbf16> to vector<16x128xf32>
    %c11_74 = arith.constant 11 : index
    %c0_75 = arith.constant 0 : index
    %81 = vector.load %arg2[%c11_74, %c0_75] : memref<27x128xf32, #tpu.memory_space<vmem>>, vector<1x128xf32>
    %82 = vector.broadcast %81 : vector<1x128xf32> to vector<16x128xf32>
    %83 = arith.mulf %80, %82 : vector<16x128xf32>
    %84 = arith.addf %77, %83 : vector<16x128xf32>
    %c0_76 = arith.constant 0 : index
    %c12 = arith.constant 12 : index
    %c0_77 = arith.constant 0 : index
    %c0_78 = arith.constant 0 : index
    %c0_79 = arith.constant 0 : index
    %85 = vector.load %arg1[%c0_76, %c12, %c0_77, %c0_78, %c0_79] : memref<1x18x5x16x128xbf16, #tpu.memory_space<vmem>>, vector<1x1x1x16x128xbf16>
    %86 = vector.shape_cast %85 : vector<1x1x1x16x128xbf16> to vector<16x128xbf16>
    %87 = arith.extf %86 : vector<16x128xbf16> to vector<16x128xf32>
    %c12_80 = arith.constant 12 : index
    %c0_81 = arith.constant 0 : index
    %88 = vector.load %arg2[%c12_80, %c0_81] : memref<27x128xf32, #tpu.memory_space<vmem>>, vector<1x128xf32>
    %89 = vector.broadcast %88 : vector<1x128xf32> to vector<16x128xf32>
    %90 = arith.mulf %87, %89 : vector<16x128xf32>
    %91 = arith.addf %84, %90 : vector<16x128xf32>
    %c0_82 = arith.constant 0 : index
    %c13 = arith.constant 13 : index
    %c0_83 = arith.constant 0 : index
    %c0_84 = arith.constant 0 : index
    %c0_85 = arith.constant 0 : index
    %92 = vector.load %arg1[%c0_82, %c13, %c0_83, %c0_84, %c0_85] : memref<1x18x5x16x128xbf16, #tpu.memory_space<vmem>>, vector<1x1x1x16x128xbf16>
    %93 = vector.shape_cast %92 : vector<1x1x1x16x128xbf16> to vector<16x128xbf16>
    %94 = arith.extf %93 : vector<16x128xbf16> to vector<16x128xf32>
    %c13_86 = arith.constant 13 : index
    %c0_87 = arith.constant 0 : index
    %95 = vector.load %arg2[%c13_86, %c0_87] : memref<27x128xf32, #tpu.memory_space<vmem>>, vector<1x128xf32>
    %96 = vector.broadcast %95 : vector<1x128xf32> to vector<16x128xf32>
    %97 = arith.mulf %94, %96 : vector<16x128xf32>
    %98 = arith.addf %91, %97 : vector<16x128xf32>
    %c0_88 = arith.constant 0 : index
    %c14 = arith.constant 14 : index
    %c0_89 = arith.constant 0 : index
    %c0_90 = arith.constant 0 : index
    %c0_91 = arith.constant 0 : index
    %99 = vector.load %arg1[%c0_88, %c14, %c0_89, %c0_90, %c0_91] : memref<1x18x5x16x128xbf16, #tpu.memory_space<vmem>>, vector<1x1x1x16x128xbf16>
    %100 = vector.shape_cast %99 : vector<1x1x1x16x128xbf16> to vector<16x128xbf16>
    %101 = arith.extf %100 : vector<16x128xbf16> to vector<16x128xf32>
    %c14_92 = arith.constant 14 : index
    %c0_93 = arith.constant 0 : index
    %102 = vector.load %arg2[%c14_92, %c0_93] : memref<27x128xf32, #tpu.memory_space<vmem>>, vector<1x128xf32>
    %103 = vector.broadcast %102 : vector<1x128xf32> to vector<16x128xf32>
    %104 = arith.mulf %101, %103 : vector<16x128xf32>
    %105 = arith.addf %98, %104 : vector<16x128xf32>
    %c0_94 = arith.constant 0 : index
    %c15 = arith.constant 15 : index
    %c0_95 = arith.constant 0 : index
    %c0_96 = arith.constant 0 : index
    %c0_97 = arith.constant 0 : index
    %106 = vector.load %arg1[%c0_94, %c15, %c0_95, %c0_96, %c0_97] : memref<1x18x5x16x128xbf16, #tpu.memory_space<vmem>>, vector<1x1x1x16x128xbf16>
    %107 = vector.shape_cast %106 : vector<1x1x1x16x128xbf16> to vector<16x128xbf16>
    %108 = arith.extf %107 : vector<16x128xbf16> to vector<16x128xf32>
    %c15_98 = arith.constant 15 : index
    %c0_99 = arith.constant 0 : index
    %109 = vector.load %arg2[%c15_98, %c0_99] : memref<27x128xf32, #tpu.memory_space<vmem>>, vector<1x128xf32>
    %110 = vector.broadcast %109 : vector<1x128xf32> to vector<16x128xf32>
    %111 = arith.mulf %108, %110 : vector<16x128xf32>
    %112 = arith.addf %105, %111 : vector<16x128xf32>
    %c0_100 = arith.constant 0 : index
    %c16 = arith.constant 16 : index
    %c0_101 = arith.constant 0 : index
    %c0_102 = arith.constant 0 : index
    %c0_103 = arith.constant 0 : index
    %113 = vector.load %arg1[%c0_100, %c16, %c0_101, %c0_102, %c0_103] : memref<1x18x5x16x128xbf16, #tpu.memory_space<vmem>>, vector<1x1x1x16x128xbf16>
    %114 = vector.shape_cast %113 : vector<1x1x1x16x128xbf16> to vector<16x128xbf16>
    %115 = arith.extf %114 : vector<16x128xbf16> to vector<16x128xf32>
    %c16_104 = arith.constant 16 : index
    %c0_105 = arith.constant 0 : index
    %116 = vector.load %arg2[%c16_104, %c0_105] : memref<27x128xf32, #tpu.memory_space<vmem>>, vector<1x128xf32>
    %117 = vector.broadcast %116 : vector<1x128xf32> to vector<16x128xf32>
    %118 = arith.mulf %115, %117 : vector<16x128xf32>
    %119 = arith.addf %112, %118 : vector<16x128xf32>
    %c0_106 = arith.constant 0 : index
    %c17 = arith.constant 17 : index
    %c0_107 = arith.constant 0 : index
    %c0_108 = arith.constant 0 : index
    %c0_109 = arith.constant 0 : index
    %120 = vector.load %arg1[%c0_106, %c17, %c0_107, %c0_108, %c0_109] : memref<1x18x5x16x128xbf16, #tpu.memory_space<vmem>>, vector<1x1x1x16x128xbf16>
    %121 = vector.shape_cast %120 : vector<1x1x1x16x128xbf16> to vector<16x128xbf16>
    %122 = arith.extf %121 : vector<16x128xbf16> to vector<16x128xf32>
    %c17_110 = arith.constant 17 : index
    %c0_111 = arith.constant 0 : index
    %123 = vector.load %arg2[%c17_110, %c0_111] : memref<27x128xf32, #tpu.memory_space<vmem>>, vector<1x128xf32>
    %124 = vector.broadcast %123 : vector<1x128xf32> to vector<16x128xf32>
    %125 = arith.mulf %122, %124 : vector<16x128xf32>
    %126 = arith.addf %119, %125 : vector<16x128xf32>
    %c0_112 = arith.constant 0 : index
    %c0_113 = arith.constant 0 : index
    %c1_114 = arith.constant 1 : index
    %c0_115 = arith.constant 0 : index
    %c0_116 = arith.constant 0 : index
    %127 = vector.load %arg1[%c0_112, %c0_113, %c1_114, %c0_115, %c0_116] : memref<1x18x5x16x128xbf16, #tpu.memory_space<vmem>>, vector<1x1x1x16x128xbf16>
    %128 = vector.shape_cast %127 : vector<1x1x1x16x128xbf16> to vector<16x128xbf16>
    %129 = arith.extf %128 : vector<16x128xbf16> to vector<16x128xf32>
    %c18 = arith.constant 18 : index
    %c0_117 = arith.constant 0 : index
    %130 = vector.load %arg2[%c18, %c0_117] : memref<27x128xf32, #tpu.memory_space<vmem>>, vector<1x128xf32>
    %131 = vector.broadcast %130 : vector<1x128xf32> to vector<16x128xf32>
    %132 = arith.mulf %129, %131 : vector<16x128xf32>
    %133 = arith.addf %126, %132 : vector<16x128xf32>
    %c0_118 = arith.constant 0 : index
    %c1_119 = arith.constant 1 : index
    %c1_120 = arith.constant 1 : index
    %c0_121 = arith.constant 0 : index
    %c0_122 = arith.constant 0 : index
    %134 = vector.load %arg1[%c0_118, %c1_119, %c1_120, %c0_121, %c0_122] : memref<1x18x5x16x128xbf16, #tpu.memory_space<vmem>>, vector<1x1x1x16x128xbf16>
    %135 = vector.shape_cast %134 : vector<1x1x1x16x128xbf16> to vector<16x128xbf16>
    %136 = arith.extf %135 : vector<16x128xbf16> to vector<16x128xf32>
    %c19 = arith.constant 19 : index
    %c0_123 = arith.constant 0 : index
    %137 = vector.load %arg2[%c19, %c0_123] : memref<27x128xf32, #tpu.memory_space<vmem>>, vector<1x128xf32>
    %138 = vector.broadcast %137 : vector<1x128xf32> to vector<16x128xf32>
    %139 = arith.mulf %136, %138 : vector<16x128xf32>
    %140 = arith.addf %133, %139 : vector<16x128xf32>
    %c0_124 = arith.constant 0 : index
    %c2_125 = arith.constant 2 : index
    %c1_126 = arith.constant 1 : index
    %c0_127 = arith.constant 0 : index
    %c0_128 = arith.constant 0 : index
    %141 = vector.load %arg1[%c0_124, %c2_125, %c1_126, %c0_127, %c0_128] : memref<1x18x5x16x128xbf16, #tpu.memory_space<vmem>>, vector<1x1x1x16x128xbf16>
    %142 = vector.shape_cast %141 : vector<1x1x1x16x128xbf16> to vector<16x128xbf16>
    %143 = arith.extf %142 : vector<16x128xbf16> to vector<16x128xf32>
    %c20 = arith.constant 20 : index
    %c0_129 = arith.constant 0 : index
    %144 = vector.load %arg2[%c20, %c0_129] : memref<27x128xf32, #tpu.memory_space<vmem>>, vector<1x128xf32>
    %145 = vector.broadcast %144 : vector<1x128xf32> to vector<16x128xf32>
    %146 = arith.mulf %143, %145 : vector<16x128xf32>
    %147 = arith.addf %140, %146 : vector<16x128xf32>
    %c0_130 = arith.constant 0 : index
    %c3_131 = arith.constant 3 : index
    %c1_132 = arith.constant 1 : index
    %c0_133 = arith.constant 0 : index
    %c0_134 = arith.constant 0 : index
    %148 = vector.load %arg1[%c0_130, %c3_131, %c1_132, %c0_133, %c0_134] : memref<1x18x5x16x128xbf16, #tpu.memory_space<vmem>>, vector<1x1x1x16x128xbf16>
    %149 = vector.shape_cast %148 : vector<1x1x1x16x128xbf16> to vector<16x128xbf16>
    %150 = arith.extf %149 : vector<16x128xbf16> to vector<16x128xf32>
    %c21 = arith.constant 21 : index
    %c0_135 = arith.constant 0 : index
    %151 = vector.load %arg2[%c21, %c0_135] : memref<27x128xf32, #tpu.memory_space<vmem>>, vector<1x128xf32>
    %152 = vector.broadcast %151 : vector<1x128xf32> to vector<16x128xf32>
    %153 = arith.mulf %150, %152 : vector<16x128xf32>
    %154 = arith.addf %147, %153 : vector<16x128xf32>
    %c0_136 = arith.constant 0 : index
    %c4_137 = arith.constant 4 : index
    %c1_138 = arith.constant 1 : index
    %c0_139 = arith.constant 0 : index
    %c0_140 = arith.constant 0 : index
    %155 = vector.load %arg1[%c0_136, %c4_137, %c1_138, %c0_139, %c0_140] : memref<1x18x5x16x128xbf16, #tpu.memory_space<vmem>>, vector<1x1x1x16x128xbf16>
    %156 = vector.shape_cast %155 : vector<1x1x1x16x128xbf16> to vector<16x128xbf16>
    %157 = arith.extf %156 : vector<16x128xbf16> to vector<16x128xf32>
    %c22 = arith.constant 22 : index
    %c0_141 = arith.constant 0 : index
    %158 = vector.load %arg2[%c22, %c0_141] : memref<27x128xf32, #tpu.memory_space<vmem>>, vector<1x128xf32>
    %159 = vector.broadcast %158 : vector<1x128xf32> to vector<16x128xf32>
    %160 = arith.mulf %157, %159 : vector<16x128xf32>
    %161 = arith.addf %154, %160 : vector<16x128xf32>
    %c0_142 = arith.constant 0 : index
    %c5_143 = arith.constant 5 : index
    %c1_144 = arith.constant 1 : index
    %c0_145 = arith.constant 0 : index
    %c0_146 = arith.constant 0 : index
    %162 = vector.load %arg1[%c0_142, %c5_143, %c1_144, %c0_145, %c0_146] : memref<1x18x5x16x128xbf16, #tpu.memory_space<vmem>>, vector<1x1x1x16x128xbf16>
    %163 = vector.shape_cast %162 : vector<1x1x1x16x128xbf16> to vector<16x128xbf16>
    %164 = arith.extf %163 : vector<16x128xbf16> to vector<16x128xf32>
    %c23 = arith.constant 23 : index
    %c0_147 = arith.constant 0 : index
    %165 = vector.load %arg2[%c23, %c0_147] : memref<27x128xf32, #tpu.memory_space<vmem>>, vector<1x128xf32>
    %166 = vector.broadcast %165 : vector<1x128xf32> to vector<16x128xf32>
    %167 = arith.mulf %164, %166 : vector<16x128xf32>
    %168 = arith.addf %161, %167 : vector<16x128xf32>
    %c0_148 = arith.constant 0 : index
    %c6_149 = arith.constant 6 : index
    %c1_150 = arith.constant 1 : index
    %c0_151 = arith.constant 0 : index
    %c0_152 = arith.constant 0 : index
    %169 = vector.load %arg1[%c0_148, %c6_149, %c1_150, %c0_151, %c0_152] : memref<1x18x5x16x128xbf16, #tpu.memory_space<vmem>>, vector<1x1x1x16x128xbf16>
    %170 = vector.shape_cast %169 : vector<1x1x1x16x128xbf16> to vector<16x128xbf16>
    %171 = arith.extf %170 : vector<16x128xbf16> to vector<16x128xf32>
    %c24 = arith.constant 24 : index
    %c0_153 = arith.constant 0 : index
    %172 = vector.load %arg2[%c24, %c0_153] : memref<27x128xf32, #tpu.memory_space<vmem>>, vector<1x128xf32>
    %173 = vector.broadcast %172 : vector<1x128xf32> to vector<16x128xf32>
    %174 = arith.mulf %171, %173 : vector<16x128xf32>
    %175 = arith.addf %168, %174 : vector<16x128xf32>
    %c0_154 = arith.constant 0 : index
    %c7_155 = arith.constant 7 : index
    %c1_156 = arith.constant 1 : index
    %c0_157 = arith.constant 0 : index
    %c0_158 = arith.constant 0 : index
    %176 = vector.load %arg1[%c0_154, %c7_155, %c1_156, %c0_157, %c0_158] : memref<1x18x5x16x128xbf16, #tpu.memory_space<vmem>>, vector<1x1x1x16x128xbf16>
    %177 = vector.shape_cast %176 : vector<1x1x1x16x128xbf16> to vector<16x128xbf16>
    %178 = arith.extf %177 : vector<16x128xbf16> to vector<16x128xf32>
    %c25 = arith.constant 25 : index
    %c0_159 = arith.constant 0 : index
    %179 = vector.load %arg2[%c25, %c0_159] : memref<27x128xf32, #tpu.memory_space<vmem>>, vector<1x128xf32>
    %180 = vector.broadcast %179 : vector<1x128xf32> to vector<16x128xf32>
    %181 = arith.mulf %178, %180 : vector<16x128xf32>
    %182 = arith.addf %175, %181 : vector<16x128xf32>
    %c0_160 = arith.constant 0 : index
    %c8_161 = arith.constant 8 : index
    %c1_162 = arith.constant 1 : index
    %c0_163 = arith.constant 0 : index
    %c0_164 = arith.constant 0 : index
    %183 = vector.load %arg1[%c0_160, %c8_161, %c1_162, %c0_163, %c0_164] : memref<1x18x5x16x128xbf16, #tpu.memory_space<vmem>>, vector<1x1x1x16x128xbf16>
    %184 = vector.shape_cast %183 : vector<1x1x1x16x128xbf16> to vector<16x128xbf16>
    %185 = arith.extf %184 : vector<16x128xbf16> to vector<16x128xf32>
    %c26 = arith.constant 26 : index
    %c0_165 = arith.constant 0 : index
    %186 = vector.load %arg2[%c26, %c0_165] : memref<27x128xf32, #tpu.memory_space<vmem>>, vector<1x128xf32>
    %187 = vector.broadcast %186 : vector<1x128xf32> to vector<16x128xf32>
    %188 = arith.mulf %185, %187 : vector<16x128xf32>
    %189 = arith.addf %182, %188 : vector<16x128xf32>
    %190 = arith.truncf %189 : vector<16x128xf32> to vector<16x128xbf16>
    %cst = arith.constant dense<0.000000e+00> : vector<16x128xf32>
    %191 = tpu.matmul %190, %0, %cst {dimension_numbers = #tpu.dot_dimension_numbers<[1], [0], [0], [1], [0, 0, 1, 1], [], []>} : vector<16x128xbf16>, vector<128x128xbf16>, vector<16x128xf32> -> vector<16x128xf32>
    %192 = vector.broadcast %1 : vector<1x128xf32> to vector<16x128xf32>
    %193 = arith.addf %191, %192 : vector<16x128xf32>
    %194 = arith.truncf %193 : vector<16x128xf32> to vector<16x128xbf16>
    %c0_166 = arith.constant 0 : index
    %c0_167 = arith.constant 0 : index
    %c0_168 = arith.constant 0 : index
    %195 = vector.load %arg5[%c0_166, %c0_167, %c0_168] : memref<1x64x128xbf16, #tpu.memory_space<vmem>>, vector<1x16x128xbf16>
    %196 = vector.shape_cast %195 : vector<1x16x128xbf16> to vector<16x128xbf16>
    %197 = vector.shape_cast %194 : vector<16x128xbf16> to vector<1x16x128xbf16>
    tpu.vector_store %arg5[%c0_166, %c0_167, %c0_168], %197 {strides = array<i32>} : memref<1x64x128xbf16, #tpu.memory_space<vmem>>, vector<1x16x128xbf16>,
    %c0_169 = arith.constant 0 : index
    %c0_170 = arith.constant 0 : index
    %c1_171 = arith.constant 1 : index
    %c0_172 = arith.constant 0 : index
    %c0_173 = arith.constant 0 : index
    %198 = vector.load %arg1[%c0_169, %c0_170, %c1_171, %c0_172, %c0_173] : memref<1x18x5x16x128xbf16, #tpu.memory_space<vmem>>, vector<1x1x1x16x128xbf16>
    %199 = vector.shape_cast %198 : vector<1x1x1x16x128xbf16> to vector<16x128xbf16>
    %200 = arith.extf %199 : vector<16x128xbf16> to vector<16x128xf32>
    %c0_174 = arith.constant 0 : index
    %c0_175 = arith.constant 0 : index
    %201 = vector.load %arg2[%c0_174, %c0_175] : memref<27x128xf32, #tpu.memory_space<vmem>>, vector<1x128xf32>
    %202 = vector.broadcast %201 : vector<1x128xf32> to vector<16x128xf32>
    %203 = arith.mulf %200, %202 : vector<16x128xf32>
    %c0_176 = arith.constant 0 : index
    %c1_177 = arith.constant 1 : index
    %c1_178 = arith.constant 1 : index
    %c0_179 = arith.constant 0 : index
    %c0_180 = arith.constant 0 : index
    %204 = vector.load %arg1[%c0_176, %c1_177, %c1_178, %c0_179, %c0_180] : memref<1x18x5x16x128xbf16, #tpu.memory_space<vmem>>, vector<1x1x1x16x128xbf16>
    %205 = vector.shape_cast %204 : vector<1x1x1x16x128xbf16> to vector<16x128xbf16>
    %206 = arith.extf %205 : vector<16x128xbf16> to vector<16x128xf32>
    %c1_181 = arith.constant 1 : index
    %c0_182 = arith.constant 0 : index
    %207 = vector.load %arg2[%c1_181, %c0_182] : memref<27x128xf32, #tpu.memory_space<vmem>>, vector<1x128xf32>
    %208 = vector.broadcast %207 : vector<1x128xf32> to vector<16x128xf32>
    %209 = arith.mulf %206, %208 : vector<16x128xf32>
    %210 = arith.addf %203, %209 : vector<16x128xf32>
    %c0_183 = arith.constant 0 : index
    %c2_184 = arith.constant 2 : index
    %c1_185 = arith.constant 1 : index
    %c0_186 = arith.constant 0 : index
    %c0_187 = arith.constant 0 : index
    %211 = vector.load %arg1[%c0_183, %c2_184, %c1_185, %c0_186, %c0_187] : memref<1x18x5x16x128xbf16, #tpu.memory_space<vmem>>, vector<1x1x1x16x128xbf16>
    %212 = vector.shape_cast %211 : vector<1x1x1x16x128xbf16> to vector<16x128xbf16>
    %213 = arith.extf %212 : vector<16x128xbf16> to vector<16x128xf32>
    %c2_188 = arith.constant 2 : index
    %c0_189 = arith.constant 0 : index
    %214 = vector.load %arg2[%c2_188, %c0_189] : memref<27x128xf32, #tpu.memory_space<vmem>>, vector<1x128xf32>
    %215 = vector.broadcast %214 : vector<1x128xf32> to vector<16x128xf32>
    %216 = arith.mulf %213, %215 : vector<16x128xf32>
    %217 = arith.addf %210, %216 : vector<16x128xf32>
    %c0_190 = arith.constant 0 : index
    %c3_191 = arith.constant 3 : index
    %c1_192 = arith.constant 1 : index
    %c0_193 = arith.constant 0 : index
    %c0_194 = arith.constant 0 : index
    %218 = vector.load %arg1[%c0_190, %c3_191, %c1_192, %c0_193, %c0_194] : memref<1x18x5x16x128xbf16, #tpu.memory_space<vmem>>, vector<1x1x1x16x128xbf16>
    %219 = vector.shape_cast %218 : vector<1x1x1x16x128xbf16> to vector<16x128xbf16>
    %220 = arith.extf %219 : vector<16x128xbf16> to vector<16x128xf32>
    %c3_195 = arith.constant 3 : index
    %c0_196 = arith.constant 0 : index
    %221 = vector.load %arg2[%c3_195, %c0_196] : memref<27x128xf32, #tpu.memory_space<vmem>>, vector<1x128xf32>
    %222 = vector.broadcast %221 : vector<1x128xf32> to vector<16x128xf32>
    %223 = arith.mulf %220, %222 : vector<16x128xf32>
    %224 = arith.addf %217, %223 : vector<16x128xf32>
    %c0_197 = arith.constant 0 : index
    %c4_198 = arith.constant 4 : index
    %c1_199 = arith.constant 1 : index
    %c0_200 = arith.constant 0 : index
    %c0_201 = arith.constant 0 : index
    %225 = vector.load %arg1[%c0_197, %c4_198, %c1_199, %c0_200, %c0_201] : memref<1x18x5x16x128xbf16, #tpu.memory_space<vmem>>, vector<1x1x1x16x128xbf16>
    %226 = vector.shape_cast %225 : vector<1x1x1x16x128xbf16> to vector<16x128xbf16>
    %227 = arith.extf %226 : vector<16x128xbf16> to vector<16x128xf32>
    %c4_202 = arith.constant 4 : index
    %c0_203 = arith.constant 0 : index
    %228 = vector.load %arg2[%c4_202, %c0_203] : memref<27x128xf32, #tpu.memory_space<vmem>>, vector<1x128xf32>
    %229 = vector.broadcast %228 : vector<1x128xf32> to vector<16x128xf32>
    %230 = arith.mulf %227, %229 : vector<16x128xf32>
    %231 = arith.addf %224, %230 : vector<16x128xf32>
    %c0_204 = arith.constant 0 : index
    %c5_205 = arith.constant 5 : index
    %c1_206 = arith.constant 1 : index
    %c0_207 = arith.constant 0 : index
    %c0_208 = arith.constant 0 : index
    %232 = vector.load %arg1[%c0_204, %c5_205, %c1_206, %c0_207, %c0_208] : memref<1x18x5x16x128xbf16, #tpu.memory_space<vmem>>, vector<1x1x1x16x128xbf16>
    %233 = vector.shape_cast %232 : vector<1x1x1x16x128xbf16> to vector<16x128xbf16>
    %234 = arith.extf %233 : vector<16x128xbf16> to vector<16x128xf32>
    %c5_209 = arith.constant 5 : index
    %c0_210 = arith.constant 0 : index
    %235 = vector.load %arg2[%c5_209, %c0_210] : memref<27x128xf32, #tpu.memory_space<vmem>>, vector<1x128xf32>
    %236 = vector.broadcast %235 : vector<1x128xf32> to vector<16x128xf32>
    %237 = arith.mulf %234, %236 : vector<16x128xf32>
    %238 = arith.addf %231, %237 : vector<16x128xf32>
    %c0_211 = arith.constant 0 : index
    %c6_212 = arith.constant 6 : index
    %c1_213 = arith.constant 1 : index
    %c0_214 = arith.constant 0 : index
    %c0_215 = arith.constant 0 : index
    %239 = vector.load %arg1[%c0_211, %c6_212, %c1_213, %c0_214, %c0_215] : memref<1x18x5x16x128xbf16, #tpu.memory_space<vmem>>, vector<1x1x1x16x128xbf16>
    %240 = vector.shape_cast %239 : vector<1x1x1x16x128xbf16> to vector<16x128xbf16>
    %241 = arith.extf %240 : vector<16x128xbf16> to vector<16x128xf32>
    %c6_216 = arith.constant 6 : index
    %c0_217 = arith.constant 0 : index
    %242 = vector.load %arg2[%c6_216, %c0_217] : memref<27x128xf32, #tpu.memory_space<vmem>>, vector<1x128xf32>
    %243 = vector.broadcast %242 : vector<1x128xf32> to vector<16x128xf32>
    %244 = arith.mulf %241, %243 : vector<16x128xf32>
    %245 = arith.addf %238, %244 : vector<16x128xf32>
    %c0_218 = arith.constant 0 : index
    %c7_219 = arith.constant 7 : index
    %c1_220 = arith.constant 1 : index
    %c0_221 = arith.constant 0 : index
    %c0_222 = arith.constant 0 : index
    %246 = vector.load %arg1[%c0_218, %c7_219, %c1_220, %c0_221, %c0_222] : memref<1x18x5x16x128xbf16, #tpu.memory_space<vmem>>, vector<1x1x1x16x128xbf16>
    %247 = vector.shape_cast %246 : vector<1x1x1x16x128xbf16> to vector<16x128xbf16>
    %248 = arith.extf %247 : vector<16x128xbf16> to vector<16x128xf32>
    %c7_223 = arith.constant 7 : index
    %c0_224 = arith.constant 0 : index
    %249 = vector.load %arg2[%c7_223, %c0_224] : memref<27x128xf32, #tpu.memory_space<vmem>>, vector<1x128xf32>
    %250 = vector.broadcast %249 : vector<1x128xf32> to vector<16x128xf32>
    %251 = arith.mulf %248, %250 : vector<16x128xf32>
    %252 = arith.addf %245, %251 : vector<16x128xf32>
    %c0_225 = arith.constant 0 : index
    %c8_226 = arith.constant 8 : index
    %c1_227 = arith.constant 1 : index
    %c0_228 = arith.constant 0 : index
    %c0_229 = arith.constant 0 : index
    %253 = vector.load %arg1[%c0_225, %c8_226, %c1_227, %c0_228, %c0_229] : memref<1x18x5x16x128xbf16, #tpu.memory_space<vmem>>, vector<1x1x1x16x128xbf16>
    %254 = vector.shape_cast %253 : vector<1x1x1x16x128xbf16> to vector<16x128xbf16>
    %255 = arith.extf %254 : vector<16x128xbf16> to vector<16x128xf32>
    %c8_230 = arith.constant 8 : index
    %c0_231 = arith.constant 0 : index
    %256 = vector.load %arg2[%c8_230, %c0_231] : memref<27x128xf32, #tpu.memory_space<vmem>>, vector<1x128xf32>
    %257 = vector.broadcast %256 : vector<1x128xf32> to vector<16x128xf32>
    %258 = arith.mulf %255, %257 : vector<16x128xf32>
    %259 = arith.addf %252, %258 : vector<16x128xf32>
    %c0_232 = arith.constant 0 : index
    %c9_233 = arith.constant 9 : index
    %c1_234 = arith.constant 1 : index
    %c0_235 = arith.constant 0 : index
    %c0_236 = arith.constant 0 : index
    %260 = vector.load %arg1[%c0_232, %c9_233, %c1_234, %c0_235, %c0_236] : memref<1x18x5x16x128xbf16, #tpu.memory_space<vmem>>, vector<1x1x1x16x128xbf16>
    %261 = vector.shape_cast %260 : vector<1x1x1x16x128xbf16> to vector<16x128xbf16>
    %262 = arith.extf %261 : vector<16x128xbf16> to vector<16x128xf32>
    %c9_237 = arith.constant 9 : index
    %c0_238 = arith.constant 0 : index
    %263 = vector.load %arg2[%c9_237, %c0_238] : memref<27x128xf32, #tpu.memory_space<vmem>>, vector<1x128xf32>
    %264 = vector.broadcast %263 : vector<1x128xf32> to vector<16x128xf32>
    %265 = arith.mulf %262, %264 : vector<16x128xf32>
    %266 = arith.addf %259, %265 : vector<16x128xf32>
    %c0_239 = arith.constant 0 : index
    %c10_240 = arith.constant 10 : index
    %c1_241 = arith.constant 1 : index
    %c0_242 = arith.constant 0 : index
    %c0_243 = arith.constant 0 : index
    %267 = vector.load %arg1[%c0_239, %c10_240, %c1_241, %c0_242, %c0_243] : memref<1x18x5x16x128xbf16, #tpu.memory_space<vmem>>, vector<1x1x1x16x128xbf16>
    %268 = vector.shape_cast %267 : vector<1x1x1x16x128xbf16> to vector<16x128xbf16>
    %269 = arith.extf %268 : vector<16x128xbf16> to vector<16x128xf32>
    %c10_244 = arith.constant 10 : index
    %c0_245 = arith.constant 0 : index
    %270 = vector.load %arg2[%c10_244, %c0_245] : memref<27x128xf32, #tpu.memory_space<vmem>>, vector<1x128xf32>
    %271 = vector.broadcast %270 : vector<1x128xf32> to vector<16x128xf32>
    %272 = arith.mulf %269, %271 : vector<16x128xf32>
    %273 = arith.addf %266, %272 : vector<16x128xf32>
    %c0_246 = arith.constant 0 : index
    %c11_247 = arith.constant 11 : index
    %c1_248 = arith.constant 1 : index
    %c0_249 = arith.constant 0 : index
    %c0_250 = arith.constant 0 : index
    %274 = vector.load %arg1[%c0_246, %c11_247, %c1_248, %c0_249, %c0_250] : memref<1x18x5x16x128xbf16, #tpu.memory_space<vmem>>, vector<1x1x1x16x128xbf16>
    %275 = vector.shape_cast %274 : vector<1x1x1x16x128xbf16> to vector<16x128xbf16>
    %276 = arith.extf %275 : vector<16x128xbf16> to vector<16x128xf32>
    %c11_251 = arith.constant 11 : index
    %c0_252 = arith.constant 0 : index
    %277 = vector.load %arg2[%c11_251, %c0_252] : memref<27x128xf32, #tpu.memory_space<vmem>>, vector<1x128xf32>
    %278 = vector.broadcast %277 : vector<1x128xf32> to vector<16x128xf32>
    %279 = arith.mulf %276, %278 : vector<16x128xf32>
    %280 = arith.addf %273, %279 : vector<16x128xf32>
    %c0_253 = arith.constant 0 : index
    %c12_254 = arith.constant 12 : index
    %c1_255 = arith.constant 1 : index
    %c0_256 = arith.constant 0 : index
    %c0_257 = arith.constant 0 : index
    %281 = vector.load %arg1[%c0_253, %c12_254, %c1_255, %c0_256, %c0_257] : memref<1x18x5x16x128xbf16, #tpu.memory_space<vmem>>, vector<1x1x1x16x128xbf16>
    %282 = vector.shape_cast %281 : vector<1x1x1x16x128xbf16> to vector<16x128xbf16>
    %283 = arith.extf %282 : vector<16x128xbf16> to vector<16x128xf32>
    %c12_258 = arith.constant 12 : index
    %c0_259 = arith.constant 0 : index
    %284 = vector.load %arg2[%c12_258, %c0_259] : memref<27x128xf32, #tpu.memory_space<vmem>>, vector<1x128xf32>
    %285 = vector.broadcast %284 : vector<1x128xf32> to vector<16x128xf32>
    %286 = arith.mulf %283, %285 : vector<16x128xf32>
    %287 = arith.addf %280, %286 : vector<16x128xf32>
    %c0_260 = arith.constant 0 : index
    %c13_261 = arith.constant 13 : index
    %c1_262 = arith.constant 1 : index
    %c0_263 = arith.constant 0 : index
    %c0_264 = arith.constant 0 : index
    %288 = vector.load %arg1[%c0_260, %c13_261, %c1_262, %c0_263, %c0_264] : memref<1x18x5x16x128xbf16, #tpu.memory_space<vmem>>, vector<1x1x1x16x128xbf16>
    %289 = vector.shape_cast %288 : vector<1x1x1x16x128xbf16> to vector<16x128xbf16>
    %290 = arith.extf %289 : vector<16x128xbf16> to vector<16x128xf32>
    %c13_265 = arith.constant 13 : index
    %c0_266 = arith.constant 0 : index
    %291 = vector.load %arg2[%c13_265, %c0_266] : memref<27x128xf32, #tpu.memory_space<vmem>>, vector<1x128xf32>
    %292 = vector.broadcast %291 : vector<1x128xf32> to vector<16x128xf32>
    %293 = arith.mulf %290, %292 : vector<16x128xf32>
    %294 = arith.addf %287, %293 : vector<16x128xf32>
    %c0_267 = arith.constant 0 : index
    %c14_268 = arith.constant 14 : index
    %c1_269 = arith.constant 1 : index
    %c0_270 = arith.constant 0 : index
    %c0_271 = arith.constant 0 : index
    %295 = vector.load %arg1[%c0_267, %c14_268, %c1_269, %c0_270, %c0_271] : memref<1x18x5x16x128xbf16, #tpu.memory_space<vmem>>, vector<1x1x1x16x128xbf16>
    %296 = vector.shape_cast %295 : vector<1x1x1x16x128xbf16> to vector<16x128xbf16>
    %297 = arith.extf %296 : vector<16x128xbf16> to vector<16x128xf32>
    %c14_272 = arith.constant 14 : index
    %c0_273 = arith.constant 0 : index
    %298 = vector.load %arg2[%c14_272, %c0_273] : memref<27x128xf32, #tpu.memory_space<vmem>>, vector<1x128xf32>
    %299 = vector.broadcast %298 : vector<1x128xf32> to vector<16x128xf32>
    %300 = arith.mulf %297, %299 : vector<16x128xf32>
    %301 = arith.addf %294, %300 : vector<16x128xf32>
    %c0_274 = arith.constant 0 : index
    %c15_275 = arith.constant 15 : index
    %c1_276 = arith.constant 1 : index
    %c0_277 = arith.constant 0 : index
    %c0_278 = arith.constant 0 : index
    %302 = vector.load %arg1[%c0_274, %c15_275, %c1_276, %c0_277, %c0_278] : memref<1x18x5x16x128xbf16, #tpu.memory_space<vmem>>, vector<1x1x1x16x128xbf16>
    %303 = vector.shape_cast %302 : vector<1x1x1x16x128xbf16> to vector<16x128xbf16>
    %304 = arith.extf %303 : vector<16x128xbf16> to vector<16x128xf32>
    %c15_279 = arith.constant 15 : index
    %c0_280 = arith.constant 0 : index
    %305 = vector.load %arg2[%c15_279, %c0_280] : memref<27x128xf32, #tpu.memory_space<vmem>>, vector<1x128xf32>
    %306 = vector.broadcast %305 : vector<1x128xf32> to vector<16x128xf32>
    %307 = arith.mulf %304, %306 : vector<16x128xf32>
    %308 = arith.addf %301, %307 : vector<16x128xf32>
    %c0_281 = arith.constant 0 : index
    %c16_282 = arith.constant 16 : index
    %c1_283 = arith.constant 1 : index
    %c0_284 = arith.constant 0 : index
    %c0_285 = arith.constant 0 : index
    %309 = vector.load %arg1[%c0_281, %c16_282, %c1_283, %c0_284, %c0_285] : memref<1x18x5x16x128xbf16, #tpu.memory_space<vmem>>, vector<1x1x1x16x128xbf16>
    %310 = vector.shape_cast %309 : vector<1x1x1x16x128xbf16> to vector<16x128xbf16>
    %311 = arith.extf %310 : vector<16x128xbf16> to vector<16x128xf32>
    %c16_286 = arith.constant 16 : index
    %c0_287 = arith.constant 0 : index
    %312 = vector.load %arg2[%c16_286, %c0_287] : memref<27x128xf32, #tpu.memory_space<vmem>>, vector<1x128xf32>
    %313 = vector.broadcast %312 : vector<1x128xf32> to vector<16x128xf32>
    %314 = arith.mulf %311, %313 : vector<16x128xf32>
    %315 = arith.addf %308, %314 : vector<16x128xf32>
    %c0_288 = arith.constant 0 : index
    %c17_289 = arith.constant 17 : index
    %c1_290 = arith.constant 1 : index
    %c0_291 = arith.constant 0 : index
    %c0_292 = arith.constant 0 : index
    %316 = vector.load %arg1[%c0_288, %c17_289, %c1_290, %c0_291, %c0_292] : memref<1x18x5x16x128xbf16, #tpu.memory_space<vmem>>, vector<1x1x1x16x128xbf16>
    %317 = vector.shape_cast %316 : vector<1x1x1x16x128xbf16> to vector<16x128xbf16>
    %318 = arith.extf %317 : vector<16x128xbf16> to vector<16x128xf32>
    %c17_293 = arith.constant 17 : index
    %c0_294 = arith.constant 0 : index
    %319 = vector.load %arg2[%c17_293, %c0_294] : memref<27x128xf32, #tpu.memory_space<vmem>>, vector<1x128xf32>
    %320 = vector.broadcast %319 : vector<1x128xf32> to vector<16x128xf32>
    %321 = arith.mulf %318, %320 : vector<16x128xf32>
    %322 = arith.addf %315, %321 : vector<16x128xf32>
    %c0_295 = arith.constant 0 : index
    %c0_296 = arith.constant 0 : index
    %c2_297 = arith.constant 2 : index
    %c0_298 = arith.constant 0 : index
    %c0_299 = arith.constant 0 : index
    %323 = vector.load %arg1[%c0_295, %c0_296, %c2_297, %c0_298, %c0_299] : memref<1x18x5x16x128xbf16, #tpu.memory_space<vmem>>, vector<1x1x1x16x128xbf16>
    %324 = vector.shape_cast %323 : vector<1x1x1x16x128xbf16> to vector<16x128xbf16>
    %325 = arith.extf %324 : vector<16x128xbf16> to vector<16x128xf32>
    %c18_300 = arith.constant 18 : index
    %c0_301 = arith.constant 0 : index
    %326 = vector.load %arg2[%c18_300, %c0_301] : memref<27x128xf32, #tpu.memory_space<vmem>>, vector<1x128xf32>
    %327 = vector.broadcast %326 : vector<1x128xf32> to vector<16x128xf32>
    %328 = arith.mulf %325, %327 : vector<16x128xf32>
    %329 = arith.addf %322, %328 : vector<16x128xf32>
    %c0_302 = arith.constant 0 : index
    %c1_303 = arith.constant 1 : index
    %c2_304 = arith.constant 2 : index
    %c0_305 = arith.constant 0 : index
    %c0_306 = arith.constant 0 : index
    %330 = vector.load %arg1[%c0_302, %c1_303, %c2_304, %c0_305, %c0_306] : memref<1x18x5x16x128xbf16, #tpu.memory_space<vmem>>, vector<1x1x1x16x128xbf16>
    %331 = vector.shape_cast %330 : vector<1x1x1x16x128xbf16> to vector<16x128xbf16>
    %332 = arith.extf %331 : vector<16x128xbf16> to vector<16x128xf32>
    %c19_307 = arith.constant 19 : index
    %c0_308 = arith.constant 0 : index
    %333 = vector.load %arg2[%c19_307, %c0_308] : memref<27x128xf32, #tpu.memory_space<vmem>>, vector<1x128xf32>
    %334 = vector.broadcast %333 : vector<1x128xf32> to vector<16x128xf32>
    %335 = arith.mulf %332, %334 : vector<16x128xf32>
    %336 = arith.addf %329, %335 : vector<16x128xf32>
    %c0_309 = arith.constant 0 : index
    %c2_310 = arith.constant 2 : index
    %c2_311 = arith.constant 2 : index
    %c0_312 = arith.constant 0 : index
    %c0_313 = arith.constant 0 : index
    %337 = vector.load %arg1[%c0_309, %c2_310, %c2_311, %c0_312, %c0_313] : memref<1x18x5x16x128xbf16, #tpu.memory_space<vmem>>, vector<1x1x1x16x128xbf16>
    %338 = vector.shape_cast %337 : vector<1x1x1x16x128xbf16> to vector<16x128xbf16>
    %339 = arith.extf %338 : vector<16x128xbf16> to vector<16x128xf32>
    %c20_314 = arith.constant 20 : index
    %c0_315 = arith.constant 0 : index
    %340 = vector.load %arg2[%c20_314, %c0_315] : memref<27x128xf32, #tpu.memory_space<vmem>>, vector<1x128xf32>
    %341 = vector.broadcast %340 : vector<1x128xf32> to vector<16x128xf32>
    %342 = arith.mulf %339, %341 : vector<16x128xf32>
    %343 = arith.addf %336, %342 : vector<16x128xf32>
    %c0_316 = arith.constant 0 : index
    %c3_317 = arith.constant 3 : index
    %c2_318 = arith.constant 2 : index
    %c0_319 = arith.constant 0 : index
    %c0_320 = arith.constant 0 : index
    %344 = vector.load %arg1[%c0_316, %c3_317, %c2_318, %c0_319, %c0_320] : memref<1x18x5x16x128xbf16, #tpu.memory_space<vmem>>, vector<1x1x1x16x128xbf16>
    %345 = vector.shape_cast %344 : vector<1x1x1x16x128xbf16> to vector<16x128xbf16>
    %346 = arith.extf %345 : vector<16x128xbf16> to vector<16x128xf32>
    %c21_321 = arith.constant 21 : index
    %c0_322 = arith.constant 0 : index
    %347 = vector.load %arg2[%c21_321, %c0_322] : memref<27x128xf32, #tpu.memory_space<vmem>>, vector<1x128xf32>
    %348 = vector.broadcast %347 : vector<1x128xf32> to vector<16x128xf32>
    %349 = arith.mulf %346, %348 : vector<16x128xf32>
    %350 = arith.addf %343, %349 : vector<16x128xf32>
    %c0_323 = arith.constant 0 : index
    %c4_324 = arith.constant 4 : index
    %c2_325 = arith.constant 2 : index
    %c0_326 = arith.constant 0 : index
    %c0_327 = arith.constant 0 : index
    %351 = vector.load %arg1[%c0_323, %c4_324, %c2_325, %c0_326, %c0_327] : memref<1x18x5x16x128xbf16, #tpu.memory_space<vmem>>, vector<1x1x1x16x128xbf16>
    %352 = vector.shape_cast %351 : vector<1x1x1x16x128xbf16> to vector<16x128xbf16>
    %353 = arith.extf %352 : vector<16x128xbf16> to vector<16x128xf32>
    %c22_328 = arith.constant 22 : index
    %c0_329 = arith.constant 0 : index
    %354 = vector.load %arg2[%c22_328, %c0_329] : memref<27x128xf32, #tpu.memory_space<vmem>>, vector<1x128xf32>
    %355 = vector.broadcast %354 : vector<1x128xf32> to vector<16x128xf32>
    %356 = arith.mulf %353, %355 : vector<16x128xf32>
    %357 = arith.addf %350, %356 : vector<16x128xf32>
    %c0_330 = arith.constant 0 : index
    %c5_331 = arith.constant 5 : index
    %c2_332 = arith.constant 2 : index
    %c0_333 = arith.constant 0 : index
    %c0_334 = arith.constant 0 : index
    %358 = vector.load %arg1[%c0_330, %c5_331, %c2_332, %c0_333, %c0_334] : memref<1x18x5x16x128xbf16, #tpu.memory_space<vmem>>, vector<1x1x1x16x128xbf16>
    %359 = vector.shape_cast %358 : vector<1x1x1x16x128xbf16> to vector<16x128xbf16>
    %360 = arith.extf %359 : vector<16x128xbf16> to vector<16x128xf32>
    %c23_335 = arith.constant 23 : index
    %c0_336 = arith.constant 0 : index
    %361 = vector.load %arg2[%c23_335, %c0_336] : memref<27x128xf32, #tpu.memory_space<vmem>>, vector<1x128xf32>
    %362 = vector.broadcast %361 : vector<1x128xf32> to vector<16x128xf32>
    %363 = arith.mulf %360, %362 : vector<16x128xf32>
    %364 = arith.addf %357, %363 : vector<16x128xf32>
    %c0_337 = arith.constant 0 : index
    %c6_338 = arith.constant 6 : index
    %c2_339 = arith.constant 2 : index
    %c0_340 = arith.constant 0 : index
    %c0_341 = arith.constant 0 : index
    %365 = vector.load %arg1[%c0_337, %c6_338, %c2_339, %c0_340, %c0_341] : memref<1x18x5x16x128xbf16, #tpu.memory_space<vmem>>, vector<1x1x1x16x128xbf16>
    %366 = vector.shape_cast %365 : vector<1x1x1x16x128xbf16> to vector<16x128xbf16>
    %367 = arith.extf %366 : vector<16x128xbf16> to vector<16x128xf32>
    %c24_342 = arith.constant 24 : index
    %c0_343 = arith.constant 0 : index
    %368 = vector.load %arg2[%c24_342, %c0_343] : memref<27x128xf32, #tpu.memory_space<vmem>>, vector<1x128xf32>
    %369 = vector.broadcast %368 : vector<1x128xf32> to vector<16x128xf32>
    %370 = arith.mulf %367, %369 : vector<16x128xf32>
    %371 = arith.addf %364, %370 : vector<16x128xf32>
    %c0_344 = arith.constant 0 : index
    %c7_345 = arith.constant 7 : index
    %c2_346 = arith.constant 2 : index
    %c0_347 = arith.constant 0 : index
    %c0_348 = arith.constant 0 : index
    %372 = vector.load %arg1[%c0_344, %c7_345, %c2_346, %c0_347, %c0_348] : memref<1x18x5x16x128xbf16, #tpu.memory_space<vmem>>, vector<1x1x1x16x128xbf16>
    %373 = vector.shape_cast %372 : vector<1x1x1x16x128xbf16> to vector<16x128xbf16>
    %374 = arith.extf %373 : vector<16x128xbf16> to vector<16x128xf32>
    %c25_349 = arith.constant 25 : index
    %c0_350 = arith.constant 0 : index
    %375 = vector.load %arg2[%c25_349, %c0_350] : memref<27x128xf32, #tpu.memory_space<vmem>>, vector<1x128xf32>
    %376 = vector.broadcast %375 : vector<1x128xf32> to vector<16x128xf32>
    %377 = arith.mulf %374, %376 : vector<16x128xf32>
    %378 = arith.addf %371, %377 : vector<16x128xf32>
    %c0_351 = arith.constant 0 : index
    %c8_352 = arith.constant 8 : index
    %c2_353 = arith.constant 2 : index
    %c0_354 = arith.constant 0 : index
    %c0_355 = arith.constant 0 : index
    %379 = vector.load %arg1[%c0_351, %c8_352, %c2_353, %c0_354, %c0_355] : memref<1x18x5x16x128xbf16, #tpu.memory_space<vmem>>, vector<1x1x1x16x128xbf16>
    %380 = vector.shape_cast %379 : vector<1x1x1x16x128xbf16> to vector<16x128xbf16>
    %381 = arith.extf %380 : vector<16x128xbf16> to vector<16x128xf32>
    %c26_356 = arith.constant 26 : index
    %c0_357 = arith.constant 0 : index
    %382 = vector.load %arg2[%c26_356, %c0_357] : memref<27x128xf32, #tpu.memory_space<vmem>>, vector<1x128xf32>
    %383 = vector.broadcast %382 : vector<1x128xf32> to vector<16x128xf32>
    %384 = arith.mulf %381, %383 : vector<16x128xf32>
    %385 = arith.addf %378, %384 : vector<16x128xf32>
    %386 = arith.truncf %385 : vector<16x128xf32> to vector<16x128xbf16>
    %cst_358 = arith.constant dense<0.000000e+00> : vector<16x128xf32>
    %387 = tpu.matmul %386, %0, %cst_358 {dimension_numbers = #tpu.dot_dimension_numbers<[1], [0], [0], [1], [0, 0, 1, 1], [], []>} : vector<16x128xbf16>, vector<128x128xbf16>, vector<16x128xf32> -> vector<16x128xf32>
    %388 = vector.broadcast %1 : vector<1x128xf32> to vector<16x128xf32>
    %389 = arith.addf %387, %388 : vector<16x128xf32>
    %390 = arith.truncf %389 : vector<16x128xf32> to vector<16x128xbf16>
    %c0_359 = arith.constant 0 : index
    %c16_360 = arith.constant 16 : index
    %c0_361 = arith.constant 0 : index
    %391 = vector.load %arg5[%c0_359, %c16_360, %c0_361] : memref<1x64x128xbf16, #tpu.memory_space<vmem>>, vector<1x16x128xbf16>
    %392 = vector.shape_cast %391 : vector<1x16x128xbf16> to vector<16x128xbf16>
    %393 = vector.shape_cast %390 : vector<16x128xbf16> to vector<1x16x128xbf16>
    tpu.vector_store %arg5[%c0_359, %c16_360, %c0_361], %393 {strides = array<i32>} : memref<1x64x128xbf16, #tpu.memory_space<vmem>>, vector<1x16x128xbf16>,
    %c0_362 = arith.constant 0 : index
    %c0_363 = arith.constant 0 : index
    %c2_364 = arith.constant 2 : index
    %c0_365 = arith.constant 0 : index
    %c0_366 = arith.constant 0 : index
    %394 = vector.load %arg1[%c0_362, %c0_363, %c2_364, %c0_365, %c0_366] : memref<1x18x5x16x128xbf16, #tpu.memory_space<vmem>>, vector<1x1x1x16x128xbf16>
    %395 = vector.shape_cast %394 : vector<1x1x1x16x128xbf16> to vector<16x128xbf16>
    %396 = arith.extf %395 : vector<16x128xbf16> to vector<16x128xf32>
    %c0_367 = arith.constant 0 : index
    %c0_368 = arith.constant 0 : index
    %397 = vector.load %arg2[%c0_367, %c0_368] : memref<27x128xf32, #tpu.memory_space<vmem>>, vector<1x128xf32>
    %398 = vector.broadcast %397 : vector<1x128xf32> to vector<16x128xf32>
    %399 = arith.mulf %396, %398 : vector<16x128xf32>
    %c0_369 = arith.constant 0 : index
    %c1_370 = arith.constant 1 : index
    %c2_371 = arith.constant 2 : index
    %c0_372 = arith.constant 0 : index
    %c0_373 = arith.constant 0 : index
    %400 = vector.load %arg1[%c0_369, %c1_370, %c2_371, %c0_372, %c0_373] : memref<1x18x5x16x128xbf16, #tpu.memory_space<vmem>>, vector<1x1x1x16x128xbf16>
    %401 = vector.shape_cast %400 : vector<1x1x1x16x128xbf16> to vector<16x128xbf16>
    %402 = arith.extf %401 : vector<16x128xbf16> to vector<16x128xf32>
    %c1_374 = arith.constant 1 : index
    %c0_375 = arith.constant 0 : index
    %403 = vector.load %arg2[%c1_374, %c0_375] : memref<27x128xf32, #tpu.memory_space<vmem>>, vector<1x128xf32>
    %404 = vector.broadcast %403 : vector<1x128xf32> to vector<16x128xf32>
    %405 = arith.mulf %402, %404 : vector<16x128xf32>
    %406 = arith.addf %399, %405 : vector<16x128xf32>
    %c0_376 = arith.constant 0 : index
    %c2_377 = arith.constant 2 : index
    %c2_378 = arith.constant 2 : index
    %c0_379 = arith.constant 0 : index
    %c0_380 = arith.constant 0 : index
    %407 = vector.load %arg1[%c0_376, %c2_377, %c2_378, %c0_379, %c0_380] : memref<1x18x5x16x128xbf16, #tpu.memory_space<vmem>>, vector<1x1x1x16x128xbf16>
    %408 = vector.shape_cast %407 : vector<1x1x1x16x128xbf16> to vector<16x128xbf16>
    %409 = arith.extf %408 : vector<16x128xbf16> to vector<16x128xf32>
    %c2_381 = arith.constant 2 : index
    %c0_382 = arith.constant 0 : index
    %410 = vector.load %arg2[%c2_381, %c0_382] : memref<27x128xf32, #tpu.memory_space<vmem>>, vector<1x128xf32>
    %411 = vector.broadcast %410 : vector<1x128xf32> to vector<16x128xf32>
    %412 = arith.mulf %409, %411 : vector<16x128xf32>
    %413 = arith.addf %406, %412 : vector<16x128xf32>
    %c0_383 = arith.constant 0 : index
    %c3_384 = arith.constant 3 : index
    %c2_385 = arith.constant 2 : index
    %c0_386 = arith.constant 0 : index
    %c0_387 = arith.constant 0 : index
    %414 = vector.load %arg1[%c0_383, %c3_384, %c2_385, %c0_386, %c0_387] : memref<1x18x5x16x128xbf16, #tpu.memory_space<vmem>>, vector<1x1x1x16x128xbf16>
    %415 = vector.shape_cast %414 : vector<1x1x1x16x128xbf16> to vector<16x128xbf16>
    %416 = arith.extf %415 : vector<16x128xbf16> to vector<16x128xf32>
    %c3_388 = arith.constant 3 : index
    %c0_389 = arith.constant 0 : index
    %417 = vector.load %arg2[%c3_388, %c0_389] : memref<27x128xf32, #tpu.memory_space<vmem>>, vector<1x128xf32>
    %418 = vector.broadcast %417 : vector<1x128xf32> to vector<16x128xf32>
    %419 = arith.mulf %416, %418 : vector<16x128xf32>
    %420 = arith.addf %413, %419 : vector<16x128xf32>
    %c0_390 = arith.constant 0 : index
    %c4_391 = arith.constant 4 : index
    %c2_392 = arith.constant 2 : index
    %c0_393 = arith.constant 0 : index
    %c0_394 = arith.constant 0 : index
    %421 = vector.load %arg1[%c0_390, %c4_391, %c2_392, %c0_393, %c0_394] : memref<1x18x5x16x128xbf16, #tpu.memory_space<vmem>>, vector<1x1x1x16x128xbf16>
    %422 = vector.shape_cast %421 : vector<1x1x1x16x128xbf16> to vector<16x128xbf16>
    %423 = arith.extf %422 : vector<16x128xbf16> to vector<16x128xf32>
    %c4_395 = arith.constant 4 : index
    %c0_396 = arith.constant 0 : index
    %424 = vector.load %arg2[%c4_395, %c0_396] : memref<27x128xf32, #tpu.memory_space<vmem>>, vector<1x128xf32>
    %425 = vector.broadcast %424 : vector<1x128xf32> to vector<16x128xf32>
    %426 = arith.mulf %423, %425 : vector<16x128xf32>
    %427 = arith.addf %420, %426 : vector<16x128xf32>
    %c0_397 = arith.constant 0 : index
    %c5_398 = arith.constant 5 : index
    %c2_399 = arith.constant 2 : index
    %c0_400 = arith.constant 0 : index
    %c0_401 = arith.constant 0 : index
    %428 = vector.load %arg1[%c0_397, %c5_398, %c2_399, %c0_400, %c0_401] : memref<1x18x5x16x128xbf16, #tpu.memory_space<vmem>>, vector<1x1x1x16x128xbf16>
    %429 = vector.shape_cast %428 : vector<1x1x1x16x128xbf16> to vector<16x128xbf16>
    %430 = arith.extf %429 : vector<16x128xbf16> to vector<16x128xf32>
    %c5_402 = arith.constant 5 : index
    %c0_403 = arith.constant 0 : index
    %431 = vector.load %arg2[%c5_402, %c0_403] : memref<27x128xf32, #tpu.memory_space<vmem>>, vector<1x128xf32>
    %432 = vector.broadcast %431 : vector<1x128xf32> to vector<16x128xf32>
    %433 = arith.mulf %430, %432 : vector<16x128xf32>
    %434 = arith.addf %427, %433 : vector<16x128xf32>
    %c0_404 = arith.constant 0 : index
    %c6_405 = arith.constant 6 : index
    %c2_406 = arith.constant 2 : index
    %c0_407 = arith.constant 0 : index
    %c0_408 = arith.constant 0 : index
    %435 = vector.load %arg1[%c0_404, %c6_405, %c2_406, %c0_407, %c0_408] : memref<1x18x5x16x128xbf16, #tpu.memory_space<vmem>>, vector<1x1x1x16x128xbf16>
    %436 = vector.shape_cast %435 : vector<1x1x1x16x128xbf16> to vector<16x128xbf16>
    %437 = arith.extf %436 : vector<16x128xbf16> to vector<16x128xf32>
    %c6_409 = arith.constant 6 : index
    %c0_410 = arith.constant 0 : index
    %438 = vector.load %arg2[%c6_409, %c0_410] : memref<27x128xf32, #tpu.memory_space<vmem>>, vector<1x128xf32>
    %439 = vector.broadcast %438 : vector<1x128xf32> to vector<16x128xf32>
    %440 = arith.mulf %437, %439 : vector<16x128xf32>
    %441 = arith.addf %434, %440 : vector<16x128xf32>
    %c0_411 = arith.constant 0 : index
    %c7_412 = arith.constant 7 : index
    %c2_413 = arith.constant 2 : index
    %c0_414 = arith.constant 0 : index
    %c0_415 = arith.constant 0 : index
    %442 = vector.load %arg1[%c0_411, %c7_412, %c2_413, %c0_414, %c0_415] : memref<1x18x5x16x128xbf16, #tpu.memory_space<vmem>>, vector<1x1x1x16x128xbf16>
    %443 = vector.shape_cast %442 : vector<1x1x1x16x128xbf16> to vector<16x128xbf16>
    %444 = arith.extf %443 : vector<16x128xbf16> to vector<16x128xf32>
    %c7_416 = arith.constant 7 : index
    %c0_417 = arith.constant 0 : index
    %445 = vector.load %arg2[%c7_416, %c0_417] : memref<27x128xf32, #tpu.memory_space<vmem>>, vector<1x128xf32>
    %446 = vector.broadcast %445 : vector<1x128xf32> to vector<16x128xf32>
    %447 = arith.mulf %444, %446 : vector<16x128xf32>
    %448 = arith.addf %441, %447 : vector<16x128xf32>
    %c0_418 = arith.constant 0 : index
    %c8_419 = arith.constant 8 : index
    %c2_420 = arith.constant 2 : index
    %c0_421 = arith.constant 0 : index
    %c0_422 = arith.constant 0 : index
    %449 = vector.load %arg1[%c0_418, %c8_419, %c2_420, %c0_421, %c0_422] : memref<1x18x5x16x128xbf16, #tpu.memory_space<vmem>>, vector<1x1x1x16x128xbf16>
    %450 = vector.shape_cast %449 : vector<1x1x1x16x128xbf16> to vector<16x128xbf16>
    %451 = arith.extf %450 : vector<16x128xbf16> to vector<16x128xf32>
    %c8_423 = arith.constant 8 : index
    %c0_424 = arith.constant 0 : index
    %452 = vector.load %arg2[%c8_423, %c0_424] : memref<27x128xf32, #tpu.memory_space<vmem>>, vector<1x128xf32>
    %453 = vector.broadcast %452 : vector<1x128xf32> to vector<16x128xf32>
    %454 = arith.mulf %451, %453 : vector<16x128xf32>
    %455 = arith.addf %448, %454 : vector<16x128xf32>
    %c0_425 = arith.constant 0 : index
    %c9_426 = arith.constant 9 : index
    %c2_427 = arith.constant 2 : index
    %c0_428 = arith.constant 0 : index
    %c0_429 = arith.constant 0 : index
    %456 = vector.load %arg1[%c0_425, %c9_426, %c2_427, %c0_428, %c0_429] : memref<1x18x5x16x128xbf16, #tpu.memory_space<vmem>>, vector<1x1x1x16x128xbf16>
    %457 = vector.shape_cast %456 : vector<1x1x1x16x128xbf16> to vector<16x128xbf16>
    %458 = arith.extf %457 : vector<16x128xbf16> to vector<16x128xf32>
    %c9_430 = arith.constant 9 : index
    %c0_431 = arith.constant 0 : index
    %459 = vector.load %arg2[%c9_430, %c0_431] : memref<27x128xf32, #tpu.memory_space<vmem>>, vector<1x128xf32>
    %460 = vector.broadcast %459 : vector<1x128xf32> to vector<16x128xf32>
    %461 = arith.mulf %458, %460 : vector<16x128xf32>
    %462 = arith.addf %455, %461 : vector<16x128xf32>
    %c0_432 = arith.constant 0 : index
    %c10_433 = arith.constant 10 : index
    %c2_434 = arith.constant 2 : index
    %c0_435 = arith.constant 0 : index
    %c0_436 = arith.constant 0 : index
    %463 = vector.load %arg1[%c0_432, %c10_433, %c2_434, %c0_435, %c0_436] : memref<1x18x5x16x128xbf16, #tpu.memory_space<vmem>>, vector<1x1x1x16x128xbf16>
    %464 = vector.shape_cast %463 : vector<1x1x1x16x128xbf16> to vector<16x128xbf16>
    %465 = arith.extf %464 : vector<16x128xbf16> to vector<16x128xf32>
    %c10_437 = arith.constant 10 : index
    %c0_438 = arith.constant 0 : index
    %466 = vector.load %arg2[%c10_437, %c0_438] : memref<27x128xf32, #tpu.memory_space<vmem>>, vector<1x128xf32>
    %467 = vector.broadcast %466 : vector<1x128xf32> to vector<16x128xf32>
    %468 = arith.mulf %465, %467 : vector<16x128xf32>
    %469 = arith.addf %462, %468 : vector<16x128xf32>
    %c0_439 = arith.constant 0 : index
    %c11_440 = arith.constant 11 : index
    %c2_441 = arith.constant 2 : index
    %c0_442 = arith.constant 0 : index
    %c0_443 = arith.constant 0 : index
    %470 = vector.load %arg1[%c0_439, %c11_440, %c2_441, %c0_442, %c0_443] : memref<1x18x5x16x128xbf16, #tpu.memory_space<vmem>>, vector<1x1x1x16x128xbf16>
    %471 = vector.shape_cast %470 : vector<1x1x1x16x128xbf16> to vector<16x128xbf16>
    %472 = arith.extf %471 : vector<16x128xbf16> to vector<16x128xf32>
    %c11_444 = arith.constant 11 : index
    %c0_445 = arith.constant 0 : index
    %473 = vector.load %arg2[%c11_444, %c0_445] : memref<27x128xf32, #tpu.memory_space<vmem>>, vector<1x128xf32>
    %474 = vector.broadcast %473 : vector<1x128xf32> to vector<16x128xf32>
    %475 = arith.mulf %472, %474 : vector<16x128xf32>
    %476 = arith.addf %469, %475 : vector<16x128xf32>
    %c0_446 = arith.constant 0 : index
    %c12_447 = arith.constant 12 : index
    %c2_448 = arith.constant 2 : index
    %c0_449 = arith.constant 0 : index
    %c0_450 = arith.constant 0 : index
    %477 = vector.load %arg1[%c0_446, %c12_447, %c2_448, %c0_449, %c0_450] : memref<1x18x5x16x128xbf16, #tpu.memory_space<vmem>>, vector<1x1x1x16x128xbf16>
    %478 = vector.shape_cast %477 : vector<1x1x1x16x128xbf16> to vector<16x128xbf16>
    %479 = arith.extf %478 : vector<16x128xbf16> to vector<16x128xf32>
    %c12_451 = arith.constant 12 : index
    %c0_452 = arith.constant 0 : index
    %480 = vector.load %arg2[%c12_451, %c0_452] : memref<27x128xf32, #tpu.memory_space<vmem>>, vector<1x128xf32>
    %481 = vector.broadcast %480 : vector<1x128xf32> to vector<16x128xf32>
    %482 = arith.mulf %479, %481 : vector<16x128xf32>
    %483 = arith.addf %476, %482 : vector<16x128xf32>
    %c0_453 = arith.constant 0 : index
    %c13_454 = arith.constant 13 : index
    %c2_455 = arith.constant 2 : index
    %c0_456 = arith.constant 0 : index
    %c0_457 = arith.constant 0 : index
    %484 = vector.load %arg1[%c0_453, %c13_454, %c2_455, %c0_456, %c0_457] : memref<1x18x5x16x128xbf16, #tpu.memory_space<vmem>>, vector<1x1x1x16x128xbf16>
    %485 = vector.shape_cast %484 : vector<1x1x1x16x128xbf16> to vector<16x128xbf16>
    %486 = arith.extf %485 : vector<16x128xbf16> to vector<16x128xf32>
    %c13_458 = arith.constant 13 : index
    %c0_459 = arith.constant 0 : index
    %487 = vector.load %arg2[%c13_458, %c0_459] : memref<27x128xf32, #tpu.memory_space<vmem>>, vector<1x128xf32>
    %488 = vector.broadcast %487 : vector<1x128xf32> to vector<16x128xf32>
    %489 = arith.mulf %486, %488 : vector<16x128xf32>
    %490 = arith.addf %483, %489 : vector<16x128xf32>
    %c0_460 = arith.constant 0 : index
    %c14_461 = arith.constant 14 : index
    %c2_462 = arith.constant 2 : index
    %c0_463 = arith.constant 0 : index
    %c0_464 = arith.constant 0 : index
    %491 = vector.load %arg1[%c0_460, %c14_461, %c2_462, %c0_463, %c0_464] : memref<1x18x5x16x128xbf16, #tpu.memory_space<vmem>>, vector<1x1x1x16x128xbf16>
    %492 = vector.shape_cast %491 : vector<1x1x1x16x128xbf16> to vector<16x128xbf16>
    %493 = arith.extf %492 : vector<16x128xbf16> to vector<16x128xf32>
    %c14_465 = arith.constant 14 : index
    %c0_466 = arith.constant 0 : index
    %494 = vector.load %arg2[%c14_465, %c0_466] : memref<27x128xf32, #tpu.memory_space<vmem>>, vector<1x128xf32>
    %495 = vector.broadcast %494 : vector<1x128xf32> to vector<16x128xf32>
    %496 = arith.mulf %493, %495 : vector<16x128xf32>
    %497 = arith.addf %490, %496 : vector<16x128xf32>
    %c0_467 = arith.constant 0 : index
    %c15_468 = arith.constant 15 : index
    %c2_469 = arith.constant 2 : index
    %c0_470 = arith.constant 0 : index
    %c0_471 = arith.constant 0 : index
    %498 = vector.load %arg1[%c0_467, %c15_468, %c2_469, %c0_470, %c0_471] : memref<1x18x5x16x128xbf16, #tpu.memory_space<vmem>>, vector<1x1x1x16x128xbf16>
    %499 = vector.shape_cast %498 : vector<1x1x1x16x128xbf16> to vector<16x128xbf16>
    %500 = arith.extf %499 : vector<16x128xbf16> to vector<16x128xf32>
    %c15_472 = arith.constant 15 : index
    %c0_473 = arith.constant 0 : index
    %501 = vector.load %arg2[%c15_472, %c0_473] : memref<27x128xf32, #tpu.memory_space<vmem>>, vector<1x128xf32>
    %502 = vector.broadcast %501 : vector<1x128xf32> to vector<16x128xf32>
    %503 = arith.mulf %500, %502 : vector<16x128xf32>
    %504 = arith.addf %497, %503 : vector<16x128xf32>
    %c0_474 = arith.constant 0 : index
    %c16_475 = arith.constant 16 : index
    %c2_476 = arith.constant 2 : index
    %c0_477 = arith.constant 0 : index
    %c0_478 = arith.constant 0 : index
    %505 = vector.load %arg1[%c0_474, %c16_475, %c2_476, %c0_477, %c0_478] : memref<1x18x5x16x128xbf16, #tpu.memory_space<vmem>>, vector<1x1x1x16x128xbf16>
    %506 = vector.shape_cast %505 : vector<1x1x1x16x128xbf16> to vector<16x128xbf16>
    %507 = arith.extf %506 : vector<16x128xbf16> to vector<16x128xf32>
    %c16_479 = arith.constant 16 : index
    %c0_480 = arith.constant 0 : index
    %508 = vector.load %arg2[%c16_479, %c0_480] : memref<27x128xf32, #tpu.memory_space<vmem>>, vector<1x128xf32>
    %509 = vector.broadcast %508 : vector<1x128xf32> to vector<16x128xf32>
    %510 = arith.mulf %507, %509 : vector<16x128xf32>
    %511 = arith.addf %504, %510 : vector<16x128xf32>
    %c0_481 = arith.constant 0 : index
    %c17_482 = arith.constant 17 : index
    %c2_483 = arith.constant 2 : index
    %c0_484 = arith.constant 0 : index
    %c0_485 = arith.constant 0 : index
    %512 = vector.load %arg1[%c0_481, %c17_482, %c2_483, %c0_484, %c0_485] : memref<1x18x5x16x128xbf16, #tpu.memory_space<vmem>>, vector<1x1x1x16x128xbf16>
    %513 = vector.shape_cast %512 : vector<1x1x1x16x128xbf16> to vector<16x128xbf16>
    %514 = arith.extf %513 : vector<16x128xbf16> to vector<16x128xf32>
    %c17_486 = arith.constant 17 : index
    %c0_487 = arith.constant 0 : index
    %515 = vector.load %arg2[%c17_486, %c0_487] : memref<27x128xf32, #tpu.memory_space<vmem>>, vector<1x128xf32>
    %516 = vector.broadcast %515 : vector<1x128xf32> to vector<16x128xf32>
    %517 = arith.mulf %514, %516 : vector<16x128xf32>
    %518 = arith.addf %511, %517 : vector<16x128xf32>
    %c0_488 = arith.constant 0 : index
    %c0_489 = arith.constant 0 : index
    %c3_490 = arith.constant 3 : index
    %c0_491 = arith.constant 0 : index
    %c0_492 = arith.constant 0 : index
    %519 = vector.load %arg1[%c0_488, %c0_489, %c3_490, %c0_491, %c0_492] : memref<1x18x5x16x128xbf16, #tpu.memory_space<vmem>>, vector<1x1x1x16x128xbf16>
    %520 = vector.shape_cast %519 : vector<1x1x1x16x128xbf16> to vector<16x128xbf16>
    %521 = arith.extf %520 : vector<16x128xbf16> to vector<16x128xf32>
    %c18_493 = arith.constant 18 : index
    %c0_494 = arith.constant 0 : index
    %522 = vector.load %arg2[%c18_493, %c0_494] : memref<27x128xf32, #tpu.memory_space<vmem>>, vector<1x128xf32>
    %523 = vector.broadcast %522 : vector<1x128xf32> to vector<16x128xf32>
    %524 = arith.mulf %521, %523 : vector<16x128xf32>
    %525 = arith.addf %518, %524 : vector<16x128xf32>
    %c0_495 = arith.constant 0 : index
    %c1_496 = arith.constant 1 : index
    %c3_497 = arith.constant 3 : index
    %c0_498 = arith.constant 0 : index
    %c0_499 = arith.constant 0 : index
    %526 = vector.load %arg1[%c0_495, %c1_496, %c3_497, %c0_498, %c0_499] : memref<1x18x5x16x128xbf16, #tpu.memory_space<vmem>>, vector<1x1x1x16x128xbf16>
    %527 = vector.shape_cast %526 : vector<1x1x1x16x128xbf16> to vector<16x128xbf16>
    %528 = arith.extf %527 : vector<16x128xbf16> to vector<16x128xf32>
    %c19_500 = arith.constant 19 : index
    %c0_501 = arith.constant 0 : index
    %529 = vector.load %arg2[%c19_500, %c0_501] : memref<27x128xf32, #tpu.memory_space<vmem>>, vector<1x128xf32>
    %530 = vector.broadcast %529 : vector<1x128xf32> to vector<16x128xf32>
    %531 = arith.mulf %528, %530 : vector<16x128xf32>
    %532 = arith.addf %525, %531 : vector<16x128xf32>
    %c0_502 = arith.constant 0 : index
    %c2_503 = arith.constant 2 : index
    %c3_504 = arith.constant 3 : index
    %c0_505 = arith.constant 0 : index
    %c0_506 = arith.constant 0 : index
    %533 = vector.load %arg1[%c0_502, %c2_503, %c3_504, %c0_505, %c0_506] : memref<1x18x5x16x128xbf16, #tpu.memory_space<vmem>>, vector<1x1x1x16x128xbf16>
    %534 = vector.shape_cast %533 : vector<1x1x1x16x128xbf16> to vector<16x128xbf16>
    %535 = arith.extf %534 : vector<16x128xbf16> to vector<16x128xf32>
    %c20_507 = arith.constant 20 : index
    %c0_508 = arith.constant 0 : index
    %536 = vector.load %arg2[%c20_507, %c0_508] : memref<27x128xf32, #tpu.memory_space<vmem>>, vector<1x128xf32>
    %537 = vector.broadcast %536 : vector<1x128xf32> to vector<16x128xf32>
    %538 = arith.mulf %535, %537 : vector<16x128xf32>
    %539 = arith.addf %532, %538 : vector<16x128xf32>
    %c0_509 = arith.constant 0 : index
    %c3_510 = arith.constant 3 : index
    %c3_511 = arith.constant 3 : index
    %c0_512 = arith.constant 0 : index
    %c0_513 = arith.constant 0 : index
    %540 = vector.load %arg1[%c0_509, %c3_510, %c3_511, %c0_512, %c0_513] : memref<1x18x5x16x128xbf16, #tpu.memory_space<vmem>>, vector<1x1x1x16x128xbf16>
    %541 = vector.shape_cast %540 : vector<1x1x1x16x128xbf16> to vector<16x128xbf16>
    %542 = arith.extf %541 : vector<16x128xbf16> to vector<16x128xf32>
    %c21_514 = arith.constant 21 : index
    %c0_515 = arith.constant 0 : index
    %543 = vector.load %arg2[%c21_514, %c0_515] : memref<27x128xf32, #tpu.memory_space<vmem>>, vector<1x128xf32>
    %544 = vector.broadcast %543 : vector<1x128xf32> to vector<16x128xf32>
    %545 = arith.mulf %542, %544 : vector<16x128xf32>
    %546 = arith.addf %539, %545 : vector<16x128xf32>
    %c0_516 = arith.constant 0 : index
    %c4_517 = arith.constant 4 : index
    %c3_518 = arith.constant 3 : index
    %c0_519 = arith.constant 0 : index
    %c0_520 = arith.constant 0 : index
    %547 = vector.load %arg1[%c0_516, %c4_517, %c3_518, %c0_519, %c0_520] : memref<1x18x5x16x128xbf16, #tpu.memory_space<vmem>>, vector<1x1x1x16x128xbf16>
    %548 = vector.shape_cast %547 : vector<1x1x1x16x128xbf16> to vector<16x128xbf16>
    %549 = arith.extf %548 : vector<16x128xbf16> to vector<16x128xf32>
    %c22_521 = arith.constant 22 : index
    %c0_522 = arith.constant 0 : index
    %550 = vector.load %arg2[%c22_521, %c0_522] : memref<27x128xf32, #tpu.memory_space<vmem>>, vector<1x128xf32>
    %551 = vector.broadcast %550 : vector<1x128xf32> to vector<16x128xf32>
    %552 = arith.mulf %549, %551 : vector<16x128xf32>
    %553 = arith.addf %546, %552 : vector<16x128xf32>
    %c0_523 = arith.constant 0 : index
    %c5_524 = arith.constant 5 : index
    %c3_525 = arith.constant 3 : index
    %c0_526 = arith.constant 0 : index
    %c0_527 = arith.constant 0 : index
    %554 = vector.load %arg1[%c0_523, %c5_524, %c3_525, %c0_526, %c0_527] : memref<1x18x5x16x128xbf16, #tpu.memory_space<vmem>>, vector<1x1x1x16x128xbf16>
    %555 = vector.shape_cast %554 : vector<1x1x1x16x128xbf16> to vector<16x128xbf16>
    %556 = arith.extf %555 : vector<16x128xbf16> to vector<16x128xf32>
    %c23_528 = arith.constant 23 : index
    %c0_529 = arith.constant 0 : index
    %557 = vector.load %arg2[%c23_528, %c0_529] : memref<27x128xf32, #tpu.memory_space<vmem>>, vector<1x128xf32>
    %558 = vector.broadcast %557 : vector<1x128xf32> to vector<16x128xf32>
    %559 = arith.mulf %556, %558 : vector<16x128xf32>
    %560 = arith.addf %553, %559 : vector<16x128xf32>
    %c0_530 = arith.constant 0 : index
    %c6_531 = arith.constant 6 : index
    %c3_532 = arith.constant 3 : index
    %c0_533 = arith.constant 0 : index
    %c0_534 = arith.constant 0 : index
    %561 = vector.load %arg1[%c0_530, %c6_531, %c3_532, %c0_533, %c0_534] : memref<1x18x5x16x128xbf16, #tpu.memory_space<vmem>>, vector<1x1x1x16x128xbf16>
    %562 = vector.shape_cast %561 : vector<1x1x1x16x128xbf16> to vector<16x128xbf16>
    %563 = arith.extf %562 : vector<16x128xbf16> to vector<16x128xf32>
    %c24_535 = arith.constant 24 : index
    %c0_536 = arith.constant 0 : index
    %564 = vector.load %arg2[%c24_535, %c0_536] : memref<27x128xf32, #tpu.memory_space<vmem>>, vector<1x128xf32>
    %565 = vector.broadcast %564 : vector<1x128xf32> to vector<16x128xf32>
    %566 = arith.mulf %563, %565 : vector<16x128xf32>
    %567 = arith.addf %560, %566 : vector<16x128xf32>
    %c0_537 = arith.constant 0 : index
    %c7_538 = arith.constant 7 : index
    %c3_539 = arith.constant 3 : index
    %c0_540 = arith.constant 0 : index
    %c0_541 = arith.constant 0 : index
    %568 = vector.load %arg1[%c0_537, %c7_538, %c3_539, %c0_540, %c0_541] : memref<1x18x5x16x128xbf16, #tpu.memory_space<vmem>>, vector<1x1x1x16x128xbf16>
    %569 = vector.shape_cast %568 : vector<1x1x1x16x128xbf16> to vector<16x128xbf16>
    %570 = arith.extf %569 : vector<16x128xbf16> to vector<16x128xf32>
    %c25_542 = arith.constant 25 : index
    %c0_543 = arith.constant 0 : index
    %571 = vector.load %arg2[%c25_542, %c0_543] : memref<27x128xf32, #tpu.memory_space<vmem>>, vector<1x128xf32>
    %572 = vector.broadcast %571 : vector<1x128xf32> to vector<16x128xf32>
    %573 = arith.mulf %570, %572 : vector<16x128xf32>
    %574 = arith.addf %567, %573 : vector<16x128xf32>
    %c0_544 = arith.constant 0 : index
    %c8_545 = arith.constant 8 : index
    %c3_546 = arith.constant 3 : index
    %c0_547 = arith.constant 0 : index
    %c0_548 = arith.constant 0 : index
    %575 = vector.load %arg1[%c0_544, %c8_545, %c3_546, %c0_547, %c0_548] : memref<1x18x5x16x128xbf16, #tpu.memory_space<vmem>>, vector<1x1x1x16x128xbf16>
    %576 = vector.shape_cast %575 : vector<1x1x1x16x128xbf16> to vector<16x128xbf16>
    %577 = arith.extf %576 : vector<16x128xbf16> to vector<16x128xf32>
    %c26_549 = arith.constant 26 : index
    %c0_550 = arith.constant 0 : index
    %578 = vector.load %arg2[%c26_549, %c0_550] : memref<27x128xf32, #tpu.memory_space<vmem>>, vector<1x128xf32>
    %579 = vector.broadcast %578 : vector<1x128xf32> to vector<16x128xf32>
    %580 = arith.mulf %577, %579 : vector<16x128xf32>
    %581 = arith.addf %574, %580 : vector<16x128xf32>
    %582 = arith.truncf %581 : vector<16x128xf32> to vector<16x128xbf16>
    %cst_551 = arith.constant dense<0.000000e+00> : vector<16x128xf32>
    %583 = tpu.matmul %582, %0, %cst_551 {dimension_numbers = #tpu.dot_dimension_numbers<[1], [0], [0], [1], [0, 0, 1, 1], [], []>} : vector<16x128xbf16>, vector<128x128xbf16>, vector<16x128xf32> -> vector<16x128xf32>
    %584 = vector.broadcast %1 : vector<1x128xf32> to vector<16x128xf32>
    %585 = arith.addf %583, %584 : vector<16x128xf32>
    %586 = arith.truncf %585 : vector<16x128xf32> to vector<16x128xbf16>
    %c0_552 = arith.constant 0 : index
    %c32 = arith.constant 32 : index
    %c0_553 = arith.constant 0 : index
    %587 = vector.load %arg5[%c0_552, %c32, %c0_553] : memref<1x64x128xbf16, #tpu.memory_space<vmem>>, vector<1x16x128xbf16>
    %588 = vector.shape_cast %587 : vector<1x16x128xbf16> to vector<16x128xbf16>
    %589 = vector.shape_cast %586 : vector<16x128xbf16> to vector<1x16x128xbf16>
    tpu.vector_store %arg5[%c0_552, %c32, %c0_553], %589 {strides = array<i32>} : memref<1x64x128xbf16, #tpu.memory_space<vmem>>, vector<1x16x128xbf16>,
    %c0_554 = arith.constant 0 : index
    %c0_555 = arith.constant 0 : index
    %c3_556 = arith.constant 3 : index
    %c0_557 = arith.constant 0 : index
    %c0_558 = arith.constant 0 : index
    %590 = vector.load %arg1[%c0_554, %c0_555, %c3_556, %c0_557, %c0_558] : memref<1x18x5x16x128xbf16, #tpu.memory_space<vmem>>, vector<1x1x1x16x128xbf16>
    %591 = vector.shape_cast %590 : vector<1x1x1x16x128xbf16> to vector<16x128xbf16>
    %592 = arith.extf %591 : vector<16x128xbf16> to vector<16x128xf32>
    %c0_559 = arith.constant 0 : index
    %c0_560 = arith.constant 0 : index
    %593 = vector.load %arg2[%c0_559, %c0_560] : memref<27x128xf32, #tpu.memory_space<vmem>>, vector<1x128xf32>
    %594 = vector.broadcast %593 : vector<1x128xf32> to vector<16x128xf32>
    %595 = arith.mulf %592, %594 : vector<16x128xf32>
    %c0_561 = arith.constant 0 : index
    %c1_562 = arith.constant 1 : index
    %c3_563 = arith.constant 3 : index
    %c0_564 = arith.constant 0 : index
    %c0_565 = arith.constant 0 : index
    %596 = vector.load %arg1[%c0_561, %c1_562, %c3_563, %c0_564, %c0_565] : memref<1x18x5x16x128xbf16, #tpu.memory_space<vmem>>, vector<1x1x1x16x128xbf16>
    %597 = vector.shape_cast %596 : vector<1x1x1x16x128xbf16> to vector<16x128xbf16>
    %598 = arith.extf %597 : vector<16x128xbf16> to vector<16x128xf32>
    %c1_566 = arith.constant 1 : index
    %c0_567 = arith.constant 0 : index
    %599 = vector.load %arg2[%c1_566, %c0_567] : memref<27x128xf32, #tpu.memory_space<vmem>>, vector<1x128xf32>
    %600 = vector.broadcast %599 : vector<1x128xf32> to vector<16x128xf32>
    %601 = arith.mulf %598, %600 : vector<16x128xf32>
    %602 = arith.addf %595, %601 : vector<16x128xf32>
    %c0_568 = arith.constant 0 : index
    %c2_569 = arith.constant 2 : index
    %c3_570 = arith.constant 3 : index
    %c0_571 = arith.constant 0 : index
    %c0_572 = arith.constant 0 : index
    %603 = vector.load %arg1[%c0_568, %c2_569, %c3_570, %c0_571, %c0_572] : memref<1x18x5x16x128xbf16, #tpu.memory_space<vmem>>, vector<1x1x1x16x128xbf16>
    %604 = vector.shape_cast %603 : vector<1x1x1x16x128xbf16> to vector<16x128xbf16>
    %605 = arith.extf %604 : vector<16x128xbf16> to vector<16x128xf32>
    %c2_573 = arith.constant 2 : index
    %c0_574 = arith.constant 0 : index
    %606 = vector.load %arg2[%c2_573, %c0_574] : memref<27x128xf32, #tpu.memory_space<vmem>>, vector<1x128xf32>
    %607 = vector.broadcast %606 : vector<1x128xf32> to vector<16x128xf32>
    %608 = arith.mulf %605, %607 : vector<16x128xf32>
    %609 = arith.addf %602, %608 : vector<16x128xf32>
    %c0_575 = arith.constant 0 : index
    %c3_576 = arith.constant 3 : index
    %c3_577 = arith.constant 3 : index
    %c0_578 = arith.constant 0 : index
    %c0_579 = arith.constant 0 : index
    %610 = vector.load %arg1[%c0_575, %c3_576, %c3_577, %c0_578, %c0_579] : memref<1x18x5x16x128xbf16, #tpu.memory_space<vmem>>, vector<1x1x1x16x128xbf16>
    %611 = vector.shape_cast %610 : vector<1x1x1x16x128xbf16> to vector<16x128xbf16>
    %612 = arith.extf %611 : vector<16x128xbf16> to vector<16x128xf32>
    %c3_580 = arith.constant 3 : index
    %c0_581 = arith.constant 0 : index
    %613 = vector.load %arg2[%c3_580, %c0_581] : memref<27x128xf32, #tpu.memory_space<vmem>>, vector<1x128xf32>
    %614 = vector.broadcast %613 : vector<1x128xf32> to vector<16x128xf32>
    %615 = arith.mulf %612, %614 : vector<16x128xf32>
    %616 = arith.addf %609, %615 : vector<16x128xf32>
    %c0_582 = arith.constant 0 : index
    %c4_583 = arith.constant 4 : index
    %c3_584 = arith.constant 3 : index
    %c0_585 = arith.constant 0 : index
    %c0_586 = arith.constant 0 : index
    %617 = vector.load %arg1[%c0_582, %c4_583, %c3_584, %c0_585, %c0_586] : memref<1x18x5x16x128xbf16, #tpu.memory_space<vmem>>, vector<1x1x1x16x128xbf16>
    %618 = vector.shape_cast %617 : vector<1x1x1x16x128xbf16> to vector<16x128xbf16>
    %619 = arith.extf %618 : vector<16x128xbf16> to vector<16x128xf32>
    %c4_587 = arith.constant 4 : index
    %c0_588 = arith.constant 0 : index
    %620 = vector.load %arg2[%c4_587, %c0_588] : memref<27x128xf32, #tpu.memory_space<vmem>>, vector<1x128xf32>
    %621 = vector.broadcast %620 : vector<1x128xf32> to vector<16x128xf32>
    %622 = arith.mulf %619, %621 : vector<16x128xf32>
    %623 = arith.addf %616, %622 : vector<16x128xf32>
    %c0_589 = arith.constant 0 : index
    %c5_590 = arith.constant 5 : index
    %c3_591 = arith.constant 3 : index
    %c0_592 = arith.constant 0 : index
    %c0_593 = arith.constant 0 : index
    %624 = vector.load %arg1[%c0_589, %c5_590, %c3_591, %c0_592, %c0_593] : memref<1x18x5x16x128xbf16, #tpu.memory_space<vmem>>, vector<1x1x1x16x128xbf16>
    %625 = vector.shape_cast %624 : vector<1x1x1x16x128xbf16> to vector<16x128xbf16>
    %626 = arith.extf %625 : vector<16x128xbf16> to vector<16x128xf32>
    %c5_594 = arith.constant 5 : index
    %c0_595 = arith.constant 0 : index
    %627 = vector.load %arg2[%c5_594, %c0_595] : memref<27x128xf32, #tpu.memory_space<vmem>>, vector<1x128xf32>
    %628 = vector.broadcast %627 : vector<1x128xf32> to vector<16x128xf32>
    %629 = arith.mulf %626, %628 : vector<16x128xf32>
    %630 = arith.addf %623, %629 : vector<16x128xf32>
    %c0_596 = arith.constant 0 : index
    %c6_597 = arith.constant 6 : index
    %c3_598 = arith.constant 3 : index
    %c0_599 = arith.constant 0 : index
    %c0_600 = arith.constant 0 : index
    %631 = vector.load %arg1[%c0_596, %c6_597, %c3_598, %c0_599, %c0_600] : memref<1x18x5x16x128xbf16, #tpu.memory_space<vmem>>, vector<1x1x1x16x128xbf16>
    %632 = vector.shape_cast %631 : vector<1x1x1x16x128xbf16> to vector<16x128xbf16>
    %633 = arith.extf %632 : vector<16x128xbf16> to vector<16x128xf32>
    %c6_601 = arith.constant 6 : index
    %c0_602 = arith.constant 0 : index
    %634 = vector.load %arg2[%c6_601, %c0_602] : memref<27x128xf32, #tpu.memory_space<vmem>>, vector<1x128xf32>
    %635 = vector.broadcast %634 : vector<1x128xf32> to vector<16x128xf32>
    %636 = arith.mulf %633, %635 : vector<16x128xf32>
    %637 = arith.addf %630, %636 : vector<16x128xf32>
    %c0_603 = arith.constant 0 : index
    %c7_604 = arith.constant 7 : index
    %c3_605 = arith.constant 3 : index
    %c0_606 = arith.constant 0 : index
    %c0_607 = arith.constant 0 : index
    %638 = vector.load %arg1[%c0_603, %c7_604, %c3_605, %c0_606, %c0_607] : memref<1x18x5x16x128xbf16, #tpu.memory_space<vmem>>, vector<1x1x1x16x128xbf16>
    %639 = vector.shape_cast %638 : vector<1x1x1x16x128xbf16> to vector<16x128xbf16>
    %640 = arith.extf %639 : vector<16x128xbf16> to vector<16x128xf32>
    %c7_608 = arith.constant 7 : index
    %c0_609 = arith.constant 0 : index
    %641 = vector.load %arg2[%c7_608, %c0_609] : memref<27x128xf32, #tpu.memory_space<vmem>>, vector<1x128xf32>
    %642 = vector.broadcast %641 : vector<1x128xf32> to vector<16x128xf32>
    %643 = arith.mulf %640, %642 : vector<16x128xf32>
    %644 = arith.addf %637, %643 : vector<16x128xf32>
    %c0_610 = arith.constant 0 : index
    %c8_611 = arith.constant 8 : index
    %c3_612 = arith.constant 3 : index
    %c0_613 = arith.constant 0 : index
    %c0_614 = arith.constant 0 : index
    %645 = vector.load %arg1[%c0_610, %c8_611, %c3_612, %c0_613, %c0_614] : memref<1x18x5x16x128xbf16, #tpu.memory_space<vmem>>, vector<1x1x1x16x128xbf16>
    %646 = vector.shape_cast %645 : vector<1x1x1x16x128xbf16> to vector<16x128xbf16>
    %647 = arith.extf %646 : vector<16x128xbf16> to vector<16x128xf32>
    %c8_615 = arith.constant 8 : index
    %c0_616 = arith.constant 0 : index
    %648 = vector.load %arg2[%c8_615, %c0_616] : memref<27x128xf32, #tpu.memory_space<vmem>>, vector<1x128xf32>
    %649 = vector.broadcast %648 : vector<1x128xf32> to vector<16x128xf32>
    %650 = arith.mulf %647, %649 : vector<16x128xf32>
    %651 = arith.addf %644, %650 : vector<16x128xf32>
    %c0_617 = arith.constant 0 : index
    %c9_618 = arith.constant 9 : index
    %c3_619 = arith.constant 3 : index
    %c0_620 = arith.constant 0 : index
    %c0_621 = arith.constant 0 : index
    %652 = vector.load %arg1[%c0_617, %c9_618, %c3_619, %c0_620, %c0_621] : memref<1x18x5x16x128xbf16, #tpu.memory_space<vmem>>, vector<1x1x1x16x128xbf16>
    %653 = vector.shape_cast %652 : vector<1x1x1x16x128xbf16> to vector<16x128xbf16>
    %654 = arith.extf %653 : vector<16x128xbf16> to vector<16x128xf32>
    %c9_622 = arith.constant 9 : index
    %c0_623 = arith.constant 0 : index
    %655 = vector.load %arg2[%c9_622, %c0_623] : memref<27x128xf32, #tpu.memory_space<vmem>>, vector<1x128xf32>
    %656 = vector.broadcast %655 : vector<1x128xf32> to vector<16x128xf32>
    %657 = arith.mulf %654, %656 : vector<16x128xf32>
    %658 = arith.addf %651, %657 : vector<16x128xf32>
    %c0_624 = arith.constant 0 : index
    %c10_625 = arith.constant 10 : index
    %c3_626 = arith.constant 3 : index
    %c0_627 = arith.constant 0 : index
    %c0_628 = arith.constant 0 : index
    %659 = vector.load %arg1[%c0_624, %c10_625, %c3_626, %c0_627, %c0_628] : memref<1x18x5x16x128xbf16, #tpu.memory_space<vmem>>, vector<1x1x1x16x128xbf16>
    %660 = vector.shape_cast %659 : vector<1x1x1x16x128xbf16> to vector<16x128xbf16>
    %661 = arith.extf %660 : vector<16x128xbf16> to vector<16x128xf32>
    %c10_629 = arith.constant 10 : index
    %c0_630 = arith.constant 0 : index
    %662 = vector.load %arg2[%c10_629, %c0_630] : memref<27x128xf32, #tpu.memory_space<vmem>>, vector<1x128xf32>
    %663 = vector.broadcast %662 : vector<1x128xf32> to vector<16x128xf32>
    %664 = arith.mulf %661, %663 : vector<16x128xf32>
    %665 = arith.addf %658, %664 : vector<16x128xf32>
    %c0_631 = arith.constant 0 : index
    %c11_632 = arith.constant 11 : index
    %c3_633 = arith.constant 3 : index
    %c0_634 = arith.constant 0 : index
    %c0_635 = arith.constant 0 : index
    %666 = vector.load %arg1[%c0_631, %c11_632, %c3_633, %c0_634, %c0_635] : memref<1x18x5x16x128xbf16, #tpu.memory_space<vmem>>, vector<1x1x1x16x128xbf16>
    %667 = vector.shape_cast %666 : vector<1x1x1x16x128xbf16> to vector<16x128xbf16>
    %668 = arith.extf %667 : vector<16x128xbf16> to vector<16x128xf32>
    %c11_636 = arith.constant 11 : index
    %c0_637 = arith.constant 0 : index
    %669 = vector.load %arg2[%c11_636, %c0_637] : memref<27x128xf32, #tpu.memory_space<vmem>>, vector<1x128xf32>
    %670 = vector.broadcast %669 : vector<1x128xf32> to vector<16x128xf32>
    %671 = arith.mulf %668, %670 : vector<16x128xf32>
    %672 = arith.addf %665, %671 : vector<16x128xf32>
    %c0_638 = arith.constant 0 : index
    %c12_639 = arith.constant 12 : index
    %c3_640 = arith.constant 3 : index
    %c0_641 = arith.constant 0 : index
    %c0_642 = arith.constant 0 : index
    %673 = vector.load %arg1[%c0_638, %c12_639, %c3_640, %c0_641, %c0_642] : memref<1x18x5x16x128xbf16, #tpu.memory_space<vmem>>, vector<1x1x1x16x128xbf16>
    %674 = vector.shape_cast %673 : vector<1x1x1x16x128xbf16> to vector<16x128xbf16>
    %675 = arith.extf %674 : vector<16x128xbf16> to vector<16x128xf32>
    %c12_643 = arith.constant 12 : index
    %c0_644 = arith.constant 0 : index
    %676 = vector.load %arg2[%c12_643, %c0_644] : memref<27x128xf32, #tpu.memory_space<vmem>>, vector<1x128xf32>
    %677 = vector.broadcast %676 : vector<1x128xf32> to vector<16x128xf32>
    %678 = arith.mulf %675, %677 : vector<16x128xf32>
    %679 = arith.addf %672, %678 : vector<16x128xf32>
    %c0_645 = arith.constant 0 : index
    %c13_646 = arith.constant 13 : index
    %c3_647 = arith.constant 3 : index
    %c0_648 = arith.constant 0 : index
    %c0_649 = arith.constant 0 : index
    %680 = vector.load %arg1[%c0_645, %c13_646, %c3_647, %c0_648, %c0_649] : memref<1x18x5x16x128xbf16, #tpu.memory_space<vmem>>, vector<1x1x1x16x128xbf16>
    %681 = vector.shape_cast %680 : vector<1x1x1x16x128xbf16> to vector<16x128xbf16>
    %682 = arith.extf %681 : vector<16x128xbf16> to vector<16x128xf32>
    %c13_650 = arith.constant 13 : index
    %c0_651 = arith.constant 0 : index
    %683 = vector.load %arg2[%c13_650, %c0_651] : memref<27x128xf32, #tpu.memory_space<vmem>>, vector<1x128xf32>
    %684 = vector.broadcast %683 : vector<1x128xf32> to vector<16x128xf32>
    %685 = arith.mulf %682, %684 : vector<16x128xf32>
    %686 = arith.addf %679, %685 : vector<16x128xf32>
    %c0_652 = arith.constant 0 : index
    %c14_653 = arith.constant 14 : index
    %c3_654 = arith.constant 3 : index
    %c0_655 = arith.constant 0 : index
    %c0_656 = arith.constant 0 : index
    %687 = vector.load %arg1[%c0_652, %c14_653, %c3_654, %c0_655, %c0_656] : memref<1x18x5x16x128xbf16, #tpu.memory_space<vmem>>, vector<1x1x1x16x128xbf16>
    %688 = vector.shape_cast %687 : vector<1x1x1x16x128xbf16> to vector<16x128xbf16>
    %689 = arith.extf %688 : vector<16x128xbf16> to vector<16x128xf32>
    %c14_657 = arith.constant 14 : index
    %c0_658 = arith.constant 0 : index
    %690 = vector.load %arg2[%c14_657, %c0_658] : memref<27x128xf32, #tpu.memory_space<vmem>>, vector<1x128xf32>
    %691 = vector.broadcast %690 : vector<1x128xf32> to vector<16x128xf32>
    %692 = arith.mulf %689, %691 : vector<16x128xf32>
    %693 = arith.addf %686, %692 : vector<16x128xf32>
    %c0_659 = arith.constant 0 : index
    %c15_660 = arith.constant 15 : index
    %c3_661 = arith.constant 3 : index
    %c0_662 = arith.constant 0 : index
    %c0_663 = arith.constant 0 : index
    %694 = vector.load %arg1[%c0_659, %c15_660, %c3_661, %c0_662, %c0_663] : memref<1x18x5x16x128xbf16, #tpu.memory_space<vmem>>, vector<1x1x1x16x128xbf16>
    %695 = vector.shape_cast %694 : vector<1x1x1x16x128xbf16> to vector<16x128xbf16>
    %696 = arith.extf %695 : vector<16x128xbf16> to vector<16x128xf32>
    %c15_664 = arith.constant 15 : index
    %c0_665 = arith.constant 0 : index
    %697 = vector.load %arg2[%c15_664, %c0_665] : memref<27x128xf32, #tpu.memory_space<vmem>>, vector<1x128xf32>
    %698 = vector.broadcast %697 : vector<1x128xf32> to vector<16x128xf32>
    %699 = arith.mulf %696, %698 : vector<16x128xf32>
    %700 = arith.addf %693, %699 : vector<16x128xf32>
    %c0_666 = arith.constant 0 : index
    %c16_667 = arith.constant 16 : index
    %c3_668 = arith.constant 3 : index
    %c0_669 = arith.constant 0 : index
    %c0_670 = arith.constant 0 : index
    %701 = vector.load %arg1[%c0_666, %c16_667, %c3_668, %c0_669, %c0_670] : memref<1x18x5x16x128xbf16, #tpu.memory_space<vmem>>, vector<1x1x1x16x128xbf16>
    %702 = vector.shape_cast %701 : vector<1x1x1x16x128xbf16> to vector<16x128xbf16>
    %703 = arith.extf %702 : vector<16x128xbf16> to vector<16x128xf32>
    %c16_671 = arith.constant 16 : index
    %c0_672 = arith.constant 0 : index
    %704 = vector.load %arg2[%c16_671, %c0_672] : memref<27x128xf32, #tpu.memory_space<vmem>>, vector<1x128xf32>
    %705 = vector.broadcast %704 : vector<1x128xf32> to vector<16x128xf32>
    %706 = arith.mulf %703, %705 : vector<16x128xf32>
    %707 = arith.addf %700, %706 : vector<16x128xf32>
    %c0_673 = arith.constant 0 : index
    %c17_674 = arith.constant 17 : index
    %c3_675 = arith.constant 3 : index
    %c0_676 = arith.constant 0 : index
    %c0_677 = arith.constant 0 : index
    %708 = vector.load %arg1[%c0_673, %c17_674, %c3_675, %c0_676, %c0_677] : memref<1x18x5x16x128xbf16, #tpu.memory_space<vmem>>, vector<1x1x1x16x128xbf16>
    %709 = vector.shape_cast %708 : vector<1x1x1x16x128xbf16> to vector<16x128xbf16>
    %710 = arith.extf %709 : vector<16x128xbf16> to vector<16x128xf32>
    %c17_678 = arith.constant 17 : index
    %c0_679 = arith.constant 0 : index
    %711 = vector.load %arg2[%c17_678, %c0_679] : memref<27x128xf32, #tpu.memory_space<vmem>>, vector<1x128xf32>
    %712 = vector.broadcast %711 : vector<1x128xf32> to vector<16x128xf32>
    %713 = arith.mulf %710, %712 : vector<16x128xf32>
    %714 = arith.addf %707, %713 : vector<16x128xf32>
    %c0_680 = arith.constant 0 : index
    %c0_681 = arith.constant 0 : index
    %c4_682 = arith.constant 4 : index
    %c0_683 = arith.constant 0 : index
    %c0_684 = arith.constant 0 : index
    %715 = vector.load %arg1[%c0_680, %c0_681, %c4_682, %c0_683, %c0_684] : memref<1x18x5x16x128xbf16, #tpu.memory_space<vmem>>, vector<1x1x1x16x128xbf16>
    %716 = vector.shape_cast %715 : vector<1x1x1x16x128xbf16> to vector<16x128xbf16>
    %717 = arith.extf %716 : vector<16x128xbf16> to vector<16x128xf32>
    %c18_685 = arith.constant 18 : index
    %c0_686 = arith.constant 0 : index
    %718 = vector.load %arg2[%c18_685, %c0_686] : memref<27x128xf32, #tpu.memory_space<vmem>>, vector<1x128xf32>
    %719 = vector.broadcast %718 : vector<1x128xf32> to vector<16x128xf32>
    %720 = arith.mulf %717, %719 : vector<16x128xf32>
    %721 = arith.addf %714, %720 : vector<16x128xf32>
    %c0_687 = arith.constant 0 : index
    %c1_688 = arith.constant 1 : index
    %c4_689 = arith.constant 4 : index
    %c0_690 = arith.constant 0 : index
    %c0_691 = arith.constant 0 : index
    %722 = vector.load %arg1[%c0_687, %c1_688, %c4_689, %c0_690, %c0_691] : memref<1x18x5x16x128xbf16, #tpu.memory_space<vmem>>, vector<1x1x1x16x128xbf16>
    %723 = vector.shape_cast %722 : vector<1x1x1x16x128xbf16> to vector<16x128xbf16>
    %724 = arith.extf %723 : vector<16x128xbf16> to vector<16x128xf32>
    %c19_692 = arith.constant 19 : index
    %c0_693 = arith.constant 0 : index
    %725 = vector.load %arg2[%c19_692, %c0_693] : memref<27x128xf32, #tpu.memory_space<vmem>>, vector<1x128xf32>
    %726 = vector.broadcast %725 : vector<1x128xf32> to vector<16x128xf32>
    %727 = arith.mulf %724, %726 : vector<16x128xf32>
    %728 = arith.addf %721, %727 : vector<16x128xf32>
    %c0_694 = arith.constant 0 : index
    %c2_695 = arith.constant 2 : index
    %c4_696 = arith.constant 4 : index
    %c0_697 = arith.constant 0 : index
    %c0_698 = arith.constant 0 : index
    %729 = vector.load %arg1[%c0_694, %c2_695, %c4_696, %c0_697, %c0_698] : memref<1x18x5x16x128xbf16, #tpu.memory_space<vmem>>, vector<1x1x1x16x128xbf16>
    %730 = vector.shape_cast %729 : vector<1x1x1x16x128xbf16> to vector<16x128xbf16>
    %731 = arith.extf %730 : vector<16x128xbf16> to vector<16x128xf32>
    %c20_699 = arith.constant 20 : index
    %c0_700 = arith.constant 0 : index
    %732 = vector.load %arg2[%c20_699, %c0_700] : memref<27x128xf32, #tpu.memory_space<vmem>>, vector<1x128xf32>
    %733 = vector.broadcast %732 : vector<1x128xf32> to vector<16x128xf32>
    %734 = arith.mulf %731, %733 : vector<16x128xf32>
    %735 = arith.addf %728, %734 : vector<16x128xf32>
    %c0_701 = arith.constant 0 : index
    %c3_702 = arith.constant 3 : index
    %c4_703 = arith.constant 4 : index
    %c0_704 = arith.constant 0 : index
    %c0_705 = arith.constant 0 : index
    %736 = vector.load %arg1[%c0_701, %c3_702, %c4_703, %c0_704, %c0_705] : memref<1x18x5x16x128xbf16, #tpu.memory_space<vmem>>, vector<1x1x1x16x128xbf16>
    %737 = vector.shape_cast %736 : vector<1x1x1x16x128xbf16> to vector<16x128xbf16>
    %738 = arith.extf %737 : vector<16x128xbf16> to vector<16x128xf32>
    %c21_706 = arith.constant 21 : index
    %c0_707 = arith.constant 0 : index
    %739 = vector.load %arg2[%c21_706, %c0_707] : memref<27x128xf32, #tpu.memory_space<vmem>>, vector<1x128xf32>
    %740 = vector.broadcast %739 : vector<1x128xf32> to vector<16x128xf32>
    %741 = arith.mulf %738, %740 : vector<16x128xf32>
    %742 = arith.addf %735, %741 : vector<16x128xf32>
    %c0_708 = arith.constant 0 : index
    %c4_709 = arith.constant 4 : index
    %c4_710 = arith.constant 4 : index
    %c0_711 = arith.constant 0 : index
    %c0_712 = arith.constant 0 : index
    %743 = vector.load %arg1[%c0_708, %c4_709, %c4_710, %c0_711, %c0_712] : memref<1x18x5x16x128xbf16, #tpu.memory_space<vmem>>, vector<1x1x1x16x128xbf16>
    %744 = vector.shape_cast %743 : vector<1x1x1x16x128xbf16> to vector<16x128xbf16>
    %745 = arith.extf %744 : vector<16x128xbf16> to vector<16x128xf32>
    %c22_713 = arith.constant 22 : index
    %c0_714 = arith.constant 0 : index
    %746 = vector.load %arg2[%c22_713, %c0_714] : memref<27x128xf32, #tpu.memory_space<vmem>>, vector<1x128xf32>
    %747 = vector.broadcast %746 : vector<1x128xf32> to vector<16x128xf32>
    %748 = arith.mulf %745, %747 : vector<16x128xf32>
    %749 = arith.addf %742, %748 : vector<16x128xf32>
    %c0_715 = arith.constant 0 : index
    %c5_716 = arith.constant 5 : index
    %c4_717 = arith.constant 4 : index
    %c0_718 = arith.constant 0 : index
    %c0_719 = arith.constant 0 : index
    %750 = vector.load %arg1[%c0_715, %c5_716, %c4_717, %c0_718, %c0_719] : memref<1x18x5x16x128xbf16, #tpu.memory_space<vmem>>, vector<1x1x1x16x128xbf16>
    %751 = vector.shape_cast %750 : vector<1x1x1x16x128xbf16> to vector<16x128xbf16>
    %752 = arith.extf %751 : vector<16x128xbf16> to vector<16x128xf32>
    %c23_720 = arith.constant 23 : index
    %c0_721 = arith.constant 0 : index
    %753 = vector.load %arg2[%c23_720, %c0_721] : memref<27x128xf32, #tpu.memory_space<vmem>>, vector<1x128xf32>
    %754 = vector.broadcast %753 : vector<1x128xf32> to vector<16x128xf32>
    %755 = arith.mulf %752, %754 : vector<16x128xf32>
    %756 = arith.addf %749, %755 : vector<16x128xf32>
    %c0_722 = arith.constant 0 : index
    %c6_723 = arith.constant 6 : index
    %c4_724 = arith.constant 4 : index
    %c0_725 = arith.constant 0 : index
    %c0_726 = arith.constant 0 : index
    %757 = vector.load %arg1[%c0_722, %c6_723, %c4_724, %c0_725, %c0_726] : memref<1x18x5x16x128xbf16, #tpu.memory_space<vmem>>, vector<1x1x1x16x128xbf16>
    %758 = vector.shape_cast %757 : vector<1x1x1x16x128xbf16> to vector<16x128xbf16>
    %759 = arith.extf %758 : vector<16x128xbf16> to vector<16x128xf32>
    %c24_727 = arith.constant 24 : index
    %c0_728 = arith.constant 0 : index
    %760 = vector.load %arg2[%c24_727, %c0_728] : memref<27x128xf32, #tpu.memory_space<vmem>>, vector<1x128xf32>
    %761 = vector.broadcast %760 : vector<1x128xf32> to vector<16x128xf32>
    %762 = arith.mulf %759, %761 : vector<16x128xf32>
    %763 = arith.addf %756, %762 : vector<16x128xf32>
    %c0_729 = arith.constant 0 : index
    %c7_730 = arith.constant 7 : index
    %c4_731 = arith.constant 4 : index
    %c0_732 = arith.constant 0 : index
    %c0_733 = arith.constant 0 : index
    %764 = vector.load %arg1[%c0_729, %c7_730, %c4_731, %c0_732, %c0_733] : memref<1x18x5x16x128xbf16, #tpu.memory_space<vmem>>, vector<1x1x1x16x128xbf16>
    %765 = vector.shape_cast %764 : vector<1x1x1x16x128xbf16> to vector<16x128xbf16>
    %766 = arith.extf %765 : vector<16x128xbf16> to vector<16x128xf32>
    %c25_734 = arith.constant 25 : index
    %c0_735 = arith.constant 0 : index
    %767 = vector.load %arg2[%c25_734, %c0_735] : memref<27x128xf32, #tpu.memory_space<vmem>>, vector<1x128xf32>
    %768 = vector.broadcast %767 : vector<1x128xf32> to vector<16x128xf32>
    %769 = arith.mulf %766, %768 : vector<16x128xf32>
    %770 = arith.addf %763, %769 : vector<16x128xf32>
    %c0_736 = arith.constant 0 : index
    %c8_737 = arith.constant 8 : index
    %c4_738 = arith.constant 4 : index
    %c0_739 = arith.constant 0 : index
    %c0_740 = arith.constant 0 : index
    %771 = vector.load %arg1[%c0_736, %c8_737, %c4_738, %c0_739, %c0_740] : memref<1x18x5x16x128xbf16, #tpu.memory_space<vmem>>, vector<1x1x1x16x128xbf16>
    %772 = vector.shape_cast %771 : vector<1x1x1x16x128xbf16> to vector<16x128xbf16>
    %773 = arith.extf %772 : vector<16x128xbf16> to vector<16x128xf32>
    %c26_741 = arith.constant 26 : index
    %c0_742 = arith.constant 0 : index
    %774 = vector.load %arg2[%c26_741, %c0_742] : memref<27x128xf32, #tpu.memory_space<vmem>>, vector<1x128xf32>
    %775 = vector.broadcast %774 : vector<1x128xf32> to vector<16x128xf32>
    %776 = arith.mulf %773, %775 : vector<16x128xf32>
    %777 = arith.addf %770, %776 : vector<16x128xf32>
    %778 = arith.truncf %777 : vector<16x128xf32> to vector<16x128xbf16>
    %cst_743 = arith.constant dense<0.000000e+00> : vector<16x128xf32>
    %779 = tpu.matmul %778, %0, %cst_743 {dimension_numbers = #tpu.dot_dimension_numbers<[1], [0], [0], [1], [0, 0, 1, 1], [], []>} : vector<16x128xbf16>, vector<128x128xbf16>, vector<16x128xf32> -> vector<16x128xf32>
    %780 = vector.broadcast %1 : vector<1x128xf32> to vector<16x128xf32>
    %781 = arith.addf %779, %780 : vector<16x128xf32>
    %782 = arith.truncf %781 : vector<16x128xf32> to vector<16x128xbf16>
    %c0_744 = arith.constant 0 : index
    %c48 = arith.constant 48 : index
    %c0_745 = arith.constant 0 : index
    %783 = vector.load %arg5[%c0_744, %c48, %c0_745] : memref<1x64x128xbf16, #tpu.memory_space<vmem>>, vector<1x16x128xbf16>
    %784 = vector.shape_cast %783 : vector<1x16x128xbf16> to vector<16x128xbf16>
    %785 = vector.shape_cast %782 : vector<16x128xbf16> to vector<1x16x128xbf16>
    tpu.vector_store %arg5[%c0_744, %c48, %c0_745], %785 {strides = array<i32>} : memref<1x64x128xbf16, #tpu.memory_space<vmem>>, vector<1x16x128xbf16>,
    return
  }
  func.func @transform_0(%arg0: i32) -> (i32, i32, i32, i32, i32) {
    %c0_i32 = arith.constant 0 : i32
    %c0_i32_0 = arith.constant 0 : i32
    %c0_i32_1 = arith.constant 0 : i32
    %c0_i32_2 = arith.constant 0 : i32
    %c0_i32_3 = arith.constant 0 : i32
    return %arg0, %c0_i32, %c0_i32_0, %c0_i32_1, %c0_i32_2 : i32, i32, i32, i32, i32
  }
  func.func @transform_1(%arg0: i32) -> (i32, i32) {
    %c0_i32 = arith.constant 0 : i32
    %c0_i32_0 = arith.constant 0 : i32
    %c0_i32_1 = arith.constant 0 : i32
    return %c0_i32, %c0_i32_0 : i32, i32
  }
  func.func @transform_2(%arg0: i32) -> (i32, i32) {
    %c0_i32 = arith.constant 0 : i32
    %c0_i32_0 = arith.constant 0 : i32
    %c0_i32_1 = arith.constant 0 : i32
    return %c0_i32, %c0_i32_0 : i32, i32
  }
  func.func @transform_3(%arg0: i32) -> (i32, i32) {
    %c0_i32 = arith.constant 0 : i32
    %c0_i32_0 = arith.constant 0 : i32
    %c0_i32_1 = arith.constant 0 : i32
    return %c0_i32, %c0_i32_0 : i32, i32
  }
  func.func @transform_4(%arg0: i32) -> (i32, i32, i32) {
    %c0_i32 = arith.constant 0 : i32
    %c0_i32_0 = arith.constant 0 : i32
    %c0_i32_1 = arith.constant 0 : i32
    return %arg0, %c0_i32, %c0_i32_0 : i32, i32, i32
  }
}

</mosaic_0001>

<bundles_post_ra>
// kernel: dsconv_forward.1
= control target key start
LH: loop header
LB: loop body
LE: loop exit
PB: predicated region body
PF: predicated region fallthrough
CT: control target
= control target key end

     0   :  { %s3107_s15 = smov 0   ;;  %s3887_s0 = inlined_call_operand.vmem [shape: bf16[2,18,5,16,128], index: 0, kind: input, shape index: {}]   ;;  %s3888_s1 = inlined_call_operand.vmem [shape: f32[27,128], index: 1, kind: input, shape index: {}]   ;;  %s3889_s2 = inlined_call_operand.vmem [shape: bf16[128,128], index: 2, kind: input, shape index: {}]   ;;  %s3890_s3 = inlined_call_operand.vmem [shape: f32[1,128], index: 3, kind: input, shape index: {}]   ;;  %s3891_s4 = inlined_call_operand.vmem [shape: bf16[2,64,128], index: 4, kind: output, shape index: {}]  }
   0x1 LB: > { %s2009_s16 = sadd.s32 4294967295, %s3078_s15   ;;  %p2013_p0 = scmp.ge.s32.totalorder %s3078_s15, 1  ;;  %s3078_s15 = sphi %s3107_s15, %s14_s15  }
   0x2   : > { %p162_p1 = scmp.lt.s32.totalorder %s3078_s15, 3 }
   0x4   : > { %p163_p2 = pnand %p2013_p0, %p162_p1 }
   0x6   : > { %166 = sbr.rel (%p163_p2) target bundleno = 382 (0x17e), region = 36 }
   0xb   : > { %v3118_v0 = vld [vmem:[%s3889_s2 + $0x38] sm:$0xff]   ;;  %v3892_v1 = vmov 0.0   ;;  %v3127_v2 = vld [vmem:[%s3889_s2 + $0x30] sm:$0xff]   ;;  %p188_p3 = scmp.lt.s32.totalorder %s2009_s16, 1  ;;  %vm3081_vm0 = vmmov 0   ;;  %v3142_v3 = vld [vmem:[%s3889_s2 + $0x28] sm:$0xff]  }
   0xc   : > { %3930 = vst [vmem:[#allocation2_spill] sm:$0xff] %v3118_v0  ;;  %2965 = vmatprep.subr.bf16.mxu0 %v3892_v1  ;;  %2985 = vmatprep.subr.bf16.mxu1 %v3892_v1  ;;  %3931 = vst [vmem:[#allocation3_spill] sm:$0xff] %v3127_v2  ;;  %v3150_v4 = vld [vmem:[%s3889_s2 + $0x20] sm:$0xff]   ;;  %v3206_v33 = vld [vmem:[%s3889_s2 + $0x18] sm:$0xff]  }
   0xd   : > { %2966 = vmatpush3.bf16.msra.mxu0 %v3118_v0  ;;  %2986 = vmatpush3.bf16.msra.mxu1 %v3118_v0  ;;  %s3976_s16 = smov (!%p188_p3, %s2009_s16), 1  ;;  %3932 = vst [vmem:[#allocation4_spill] sm:$0xff] %v3142_v3  ;;  %3933 = vst [vmem:[#allocation5_spill] sm:$0xff] %v3150_v4  ;;  %v3160_v5 = vld [vmem:[%s3888_s1] ss:$0 sm:$0xff]  ;;  %v3232_v53 = vld [vmem:[%s3889_s2 + $0x10] sm:$0xff]  }
   0xe   : > { %2967 = vmatprep.subr.bf16.mxu0 %v3892_v1  ;;  %2987 = vmatprep.subr.bf16.mxu1 %v3892_v1  ;;  %s3045_s23 = smul.u32 720, %s3976_s16  ;;  %v3165_v6 = vld [vmem:[%s3888_s1 + $0x1] ss:$0 sm:$0xff]  ;;  %v3175_v14 = vld [vmem:[%s3888_s1 + $0x2] ss:$0 sm:$0xff]  ;;  %3934 = vst [vmem:[#allocation6_spill] sm:$0xff] %v3206_v33 }
   0xf   : > { %2981 = vmatprep.mubr.msk.bf16.mxu0 %vm3081_vm0, %v3892_v1  ;;  %3001 = vmatprep.mubr.msk.bf16.mxu1 %vm3081_vm0, %v3892_v1  ;;  %v3181_v16 = vld [vmem:[%s3888_s1 + $0x3] ss:$0 sm:$0xff]  ;;  %v3199_v32 = vld [vmem:[%s3888_s1 + $0x4] ss:$0 sm:$0xff]  ;;  %v3211_v38 = vld [vmem:[%s3888_s1 + $0x5] ss:$0 sm:$0xff] }
  0x10   : > { %s3155_s28 = scalar_lea.vmem %s3887_s0, %s3045_s23  ;;  %v3221_v48 = vld [vmem:[%s3888_s1 + $0x6] ss:$0 sm:$0xff]  ;;  %3935 = vst [vmem:[#allocation7_spill] sm:$0xff] %v3232_v53  ;;  %v3237_v58 = vld [vmem:[%s3888_s1 + $0x7] ss:$0 sm:$0xff]  ;;  %s2358_s23 = sshll.u32 %s3976_s16, 5 }
  0x11   : > { %2968 = vmatpush3.bf16.msra.mxu0 %v3127_v2  ;;  %2988 = vmatpush3.bf16.msra.mxu1 %v3127_v2  ;;  %v2368_v7 = vld [vmem:[%s3155_s28] sm:$0xff]   ;;  %v2819_v8 = vld [vmem:[%s3155_s28 + $0x28] sm:$0xff]   ;;  %v2820_v9 = vld [vmem:[%s3155_s28 + $0x50] sm:$0xff]   ;;  %s197_s26 = scalar_lea.vmem %s3891_s4, %s2358_s23 }
  0x12   : > { %2969 = vmatprep.subr.bf16.mxu0 %v3892_v1  ;;  %2989 = vmatprep.subr.bf16.mxu1 %v3892_v1  ;;  %v2369_v10 = vunpack.c.l.bf16 %v2368_v7  ;;  %v2370_v11 = vunpack.c.h.bf16 %v2368_v7  ;;  %v2373_v12 = vunpack.c.l.bf16 %v2819_v8  ;;  %v2374_v13 = vunpack.c.h.bf16 %v2819_v8  ;;  %v2821_v15 = vld [vmem:[%s3155_s28 + $0x78] sm:$0xff]   ;;  %v2822_v21 = vld [vmem:[%s3155_s28 + $0xa0] sm:$0xff]   ;;  %v2823_v26 = vld [vmem:[%s3155_s28 + $0xc8] sm:$0xff]  }
  0x13   : > { %v2377_v17 = vunpack.c.l.bf16 %v2820_v9  ;;  %v2378_v18 = vunpack.c.h.bf16 %v2820_v9  ;;  %v2381_v19 = vunpack.c.l.bf16 %v2821_v15  ;;  %v2382_v20 = vunpack.c.h.bf16 %v2821_v15  ;;  %v2824_v27 = vld [vmem:[%s3155_s28 + $0xf0] sm:$0xff]   ;;  %v2825_v43 = vld [vmem:[%s3155_s28 + $0x118] sm:$0xff]   ;;  %v2826_v49 = vld [vmem:[%s3155_s28 + $0x140] sm:$0xff]  }
  0x14   : > { %v225_v22 = vmul.f32 %v2369_v10, %v3160_v5  ;;  %v226_v23 = vmul.f32 %v2370_v11, %v3160_v5  ;;  %v237_v24 = vmul.f32 %v2373_v12, %v3165_v6  ;;  %v238_v25 = vmul.f32 %v2374_v13, %v3165_v6  ;;  %v2827_v52 = vld [vmem:[%s3155_s28 + $0x168] sm:$0xff]   ;;  %v2828_v63 = vld [vmem:[%s3155_s28 + $0x190] sm:$0xff]   ;;  %v2829_v12 = vld [vmem:[%s3155_s28 + $0x1b8] sm:$0xff]  }
  0x15   : > { %2970 = vmatpush3.bf16.msra.mxu0 %v3142_v3  ;;  %2990 = vmatpush3.bf16.msra.mxu1 %v3142_v3  ;;  %v251_v28 = vmul.f32 %v2377_v17, %v3175_v14  ;;  %v252_v29 = vmul.f32 %v2378_v18, %v3175_v14  ;;  %v265_v30 = vmul.f32 %v2381_v19, %v3181_v16  ;;  %v2385_v36 = vunpack.c.l.bf16 %v2822_v21  ;;  %v3247_v9 = vld [vmem:[%s3888_s1 + $0x8] ss:$0 sm:$0xff]  ;;  %v3255_v17 = vld [vmem:[%s3888_s1 + $0x9] ss:$0 sm:$0xff] }
  0x16   : > { %2971 = vmatprep.subr.bf16.mxu0 %v3892_v1  ;;  %2991 = vmatprep.subr.bf16.mxu1 %v3892_v1  ;;  %v266_v31 = vmul.f32 %v2382_v20, %v3181_v16  ;;  %v239_v34 = vadd.f32 %v237_v24, %v225_v22  ;;  %v240_v35 = vadd.f32 %v238_v25, %v226_v23  ;;  %v2386_v37 = vunpack.c.h.bf16 %v2822_v21  ;;  %v3262_v18 = vld [vmem:[%s3889_s2 + $0x8] sm:$0xff]   ;;  %v2830_v24 = vld [vmem:[%s3155_s28 + $0x1e0] sm:$0xff]  }
  0x17   : > { %v2389_v39 = vunpack.c.l.bf16 %v2823_v26  ;;  %v2390_v40 = vunpack.c.h.bf16 %v2823_v26  ;;  %v2393_v41 = vunpack.c.l.bf16 %v2824_v27  ;;  %v2394_v42 = vunpack.c.h.bf16 %v2824_v27  ;;  %3936 = vst [vmem:[#allocation8_spill] sm:$0xff] %v3262_v18  ;;  %v3267_v23 = vld [vmem:[%s3888_s1 + $0xa] ss:$0 sm:$0xff] }
  0x18   : > { %v253_v44 = vadd.f32 %v251_v28, %v239_v34  ;;  %v254_v45 = vadd.f32 %v252_v29, %v240_v35  ;;  %v279_v46 = vmul.f32 %v2385_v36, %v3199_v32  ;;  %v280_v47 = vmul.f32 %v2386_v37, %v3199_v32  ;;  %v2831_v29 = vld [vmem:[%s3155_s28 + $0x208] sm:$0xff]   ;;  %v2832_v37 = vld [vmem:[%s3155_s28 + $0x230] sm:$0xff]  }
  0x19   : > { %2972 = vmatpush3.bf16.msra.mxu0 %v3150_v4  ;;  %2992 = vmatpush3.bf16.msra.mxu1 %v3150_v4  ;;  %v293_v50 = vmul.f32 %v2389_v39, %v3211_v38  ;;  %v294_v51 = vmul.f32 %v2390_v40, %v3211_v38  ;;  %v2397_v56 = vunpack.c.l.bf16 %v2825_v43  ;;  %v2398_v57 = vunpack.c.h.bf16 %v2825_v43  ;;  %v3280_v36 = vld [vmem:[%s3888_s1 + $0xb] ss:$0 sm:$0xff]  ;;  %v2833_v43 = vld [vmem:[%s3155_s28 + $0x258] sm:$0xff]  }
  0x1a   : > { %2973 = vmatprep.subr.bf16.mxu0 %v3892_v1  ;;  %2993 = vmatprep.subr.bf16.mxu1 %v3892_v1  ;;  %v267_v54 = vadd.f32 %v265_v30, %v253_v44  ;;  %v268_v55 = vadd.f32 %v266_v31, %v254_v45  ;;  %v307_v59 = vmul.f32 %v2393_v41, %v3221_v48  ;;  %v2401_v61 = vunpack.c.l.bf16 %v2826_v49  ;;  %v3291_v44 = vld [vmem:[%s3889_s2] sm:$0xff]  }
  0x1b   : > { %v308_v60 = vmul.f32 %v2394_v42, %v3221_v48  ;;  %v2402_v62 = vunpack.c.h.bf16 %v2826_v49  ;;  %v2405_v10 = vunpack.c.l.bf16 %v2827_v52  ;;  %v2406_v11 = vunpack.c.h.bf16 %v2827_v52  ;;  %3937 = vst [vmem:[#allocation9_spill] sm:$0xff] %v3291_v44 }
  0x1c   : > { %v281_v7 = vadd.f32 %v279_v46, %v267_v54  ;;  %v282_v8 = vadd.f32 %v280_v47, %v268_v55  ;;  %v321_v13 = vmul.f32 %v2397_v56, %v3237_v58  ;;  %v322_v15 = vmul.f32 %v2398_v57, %v3237_v58  ;;  %v3296_v47 = vld [vmem:[%s3888_s1 + $0xc] ss:$0 sm:$0xff]  ;;  %v2834_v57 = vld [vmem:[%s3155_s28 + $0x280] sm:$0xff]  }
  0x1d   : > { %2974 = vmatpush3.bf16.msra.mxu0 %v3206_v33  ;;  %2994 = vmatpush3.bf16.msra.mxu1 %v3206_v33  ;;  %v2409_v21 = vunpack.c.l.bf16 %v2828_v63  ;;  %v2410_v22 = vunpack.c.h.bf16 %v2828_v63  ;;  %v335_v25 = vmul.f32 %v2401_v61, %v3247_v9  ;;  %v336_v26 = vmul.f32 %v2402_v62, %v3247_v9  ;;  %v3311_v61 = vld [vmem:[%s3888_s1 + $0xe] ss:$0 sm:$0xff]  ;;  %v3423_v33 = vld [vmem:[%s3888_s1 + $0x18] ss:$0 sm:$0xff] }
  0x1e   : > { %2975 = vmatprep.subr.bf16.mxu0 %v3892_v1  ;;  %2995 = vmatprep.subr.bf16.mxu1 %v3892_v1  ;;  %v295_v19 = vadd.f32 %v293_v50, %v281_v7  ;;  %v296_v20 = vadd.f32 %v294_v51, %v282_v8  ;;  %v2413_v27 = vunpack.c.l.bf16 %v2829_v12  ;;  %v2414_v28 = vunpack.c.h.bf16 %v2829_v12  ;;  %v3301_v51 = vld [vmem:[%s3888_s1 + $0xd] ss:$0 sm:$0xff]  ;;  %3947 = vst [vmem:[#allocation19_spill] sm:$0xff] %v3423_v33 }
  0x1f   : > { %v349_v34 = vmul.f32 %v2405_v10, %v3255_v17  ;;  %v350_v35 = vmul.f32 %v2406_v11, %v3255_v17  ;;  %v363_v39 = vmul.f32 %v2409_v21, %v3267_v23  ;;  %v364_v40 = vmul.f32 %v2410_v22, %v3267_v23  ;;  %v2835_v7 = vld [vmem:[%s3155_s28 + $0x2a8] sm:$0xff]   ;;  %v3328_v22 = vld [vmem:[%s3888_s1 + $0x10] ss:$0 sm:$0xff] }
  0x20   : > { %v309_v30 = vadd.f32 %v307_v59, %v295_v19  ;;  %v310_v31 = vadd.f32 %v308_v60, %v296_v20  ;;  %v2417_v41 = vunpack.c.l.bf16 %v2830_v24  ;;  %v2418_v42 = vunpack.c.h.bf16 %v2830_v24  ;;  %3939 = vst [vmem:[#allocation11_spill] sm:$0xff] %v3328_v22  ;;  %v3331_v24 = vld [vmem:[%s3155_s28 + $0x8] sm:$0xff]  }
  0x21   : > { %2976 = vmatpush3.bf16.msra.mxu0 %v3232_v53  ;;  %2996 = vmatpush3.bf16.msra.mxu1 %v3232_v53  ;;  %v2421_v49 = vunpack.c.l.bf16 %v2831_v29  ;;  %v2422_v50 = vunpack.c.h.bf16 %v2831_v29  ;;  %v377_v52 = vmul.f32 %v2413_v27, %v3280_v36  ;;  %v378_v54 = vmul.f32 %v2414_v28, %v3280_v36  ;;  %v3340_v29 = vld [vmem:[%s3888_s1 + $0x11] ss:$0 sm:$0xff] }
  0x22   : > { %2977 = vmatprep.subr.bf16.mxu0 %v3892_v1  ;;  %2997 = vmatprep.subr.bf16.mxu1 %v3892_v1  ;;  %v323_v45 = vadd.f32 %v321_v13, %v309_v30  ;;  %v324_v46 = vadd.f32 %v322_v15, %v310_v31  ;;  %v2425_v55 = vunpack.c.l.bf16 %v2832_v37  ;;  %v2426_v56 = vunpack.c.h.bf16 %v2832_v37  ;;  %v3321_v13 = vld [vmem:[%s3888_s1 + $0xf] ss:$0 sm:$0xff]  ;;  %3940 = vst [vmem:[#allocation12_spill] sm:$0xff] %v3340_v29  ;;  %v3347_v37 = vld [vmem:[%s3888_s1 + $0x12] ss:$0 sm:$0xff] }
  0x23   : > { %v2429_v62 = vunpack.c.l.bf16 %v2833_v43  ;;  %v2430_v63 = vunpack.c.h.bf16 %v2833_v43  ;;  %v391_v8 = vmul.f32 %v2417_v41, %v3296_v47  ;;  %v392_v10 = vmul.f32 %v2418_v42, %v3296_v47  ;;  %3938 = vst [vmem:[#allocation10_spill] sm:$0xff] %v3321_v13  ;;  %3941 = vst [vmem:[#allocation13_spill] sm:$0xff] %v3347_v37  ;;  %v3350_v41 = vld [vmem:[%s3155_s28 + $0x30] sm:$0xff]  }
  0x24   : > { %v337_v59 = vadd.f32 %v335_v25, %v323_v45  ;;  %v338_v60 = vadd.f32 %v336_v26, %v324_v46  ;;  %v405_v11 = vmul.f32 %v2421_v49, %v3301_v51  ;;  %v406_v12 = vmul.f32 %v2422_v50, %v3301_v51 }
  0x25   : > { %2978 = vmatpush3.bf16.msra.mxu0 %v3262_v18  ;;  %2998 = vmatpush3.bf16.msra.mxu1 %v3262_v18  ;;  %v2433_v20 = vunpack.c.l.bf16 %v2834_v57  ;;  %v2434_v21 = vunpack.c.h.bf16 %v2834_v57  ;;  %v419_v25 = vmul.f32 %v2425_v55, %v3311_v61  ;;  %v420_v26 = vmul.f32 %v2426_v56, %v3311_v61  ;;  %v3364_v56 = vld [vmem:[%s3888_s1 + $0x13] ss:$0 sm:$0xff]  ;;  %v3367_v57 = vld [vmem:[%s3155_s28 + $0x80] sm:$0xff]  }
  0x26   : > { %2979 = vmatprep.subr.bf16.mxu0 %v3892_v1  ;;  %2999 = vmatprep.subr.bf16.mxu1 %v3892_v1  ;;  %v351_v15 = vadd.f32 %v349_v34, %v337_v59  ;;  %v352_v19 = vadd.f32 %v350_v35, %v338_v60  ;;  %v2437_v27 = vunpack.c.l.bf16 %v2835_v7  ;;  %v2438_v28 = vunpack.c.h.bf16 %v2835_v7  ;;  %3942 = vst [vmem:[#allocation14_spill] sm:$0xff] %v3364_v56 }
  0x27   : > { %v433_v34 = vmul.f32 %v2429_v62, %v3321_v13  ;;  %v434_v35 = vmul.f32 %v2430_v63, %v3321_v13  ;;  %v447_v42 = vmul.f32 %v2433_v20, %v3328_v22  ;;  %v448_v43 = vmul.f32 %v2434_v21, %v3328_v22  ;;  %v3380_v62 = vld [vmem:[%s3888_s1 + $0x14] ss:$0 sm:$0xff]  ;;  %v3387_v20 = vld [vmem:[%s3888_s1 + $0x15] ss:$0 sm:$0xff]  ;;  %v2840_v21 = vld [vmem:[%s3155_s28 + $0xa8] sm:$0xff]  }
  0x28   : > { %v365_v30 = vadd.f32 %v363_v39, %v351_v15  ;;  %v366_v31 = vadd.f32 %v364_v40, %v352_v19  ;;  %v2441_v45 = vunpack.c.l.bf16 %v3331_v24  ;;  %v2442_v39 = vunpack.c.h.bf16 %v3331_v24  ;;  %v3357_v40 = vld [vmem:[%s3155_s28 + $0x58] sm:$0xff]   ;;  %3943 = vst [vmem:[#allocation15_spill] sm:$0xff] %v3380_v62  ;;  %3944 = vst [vmem:[#allocation16_spill] sm:$0xff] %v3387_v20 }
  0x29   : > { %2980 = vmatpush3.bf16.msra.mxu0 %v3291_v44  ;;  %3000 = vmatpush3.bf16.msra.mxu1 %v3291_v44  ;;  %v461_v50 = vmul.f32 %v2437_v27, %v3340_v29  ;;  %v462_v55 = vmul.f32 %v2438_v28, %v3340_v29  ;;  %v2449_v15 = vunpack.c.l.bf16 %v3357_v40  ;;  %v2450_v19 = vunpack.c.h.bf16 %v3357_v40 }
  0x2a   : > { %3005 = vmatprep.subr.bf16.mxu0 %v3892_v1  ;;  %3025 = vmatprep.subr.bf16.mxu1 %v3892_v1  ;;  %v379_v46 = vadd.f32 %v377_v52, %v365_v30  ;;  %v380_v49 = vadd.f32 %v378_v54, %v366_v31  ;;  %v3370_v59 = vmul.f32 %v2441_v45, %v3347_v37  ;;  %v2445_v52 = vunpack.c.l.bf16 %v3350_v41  ;;  %v3395_v30 = vld [vmem:[%s3155_s28 + $0xd0] sm:$0xff]  }
  0x2b   : > { %v3373_v60 = vmul.f32 %v2442_v39, %v3347_v37  ;;  %v2446_v54 = vunpack.c.h.bf16 %v3350_v41  ;;  %v2453_v28 = vunpack.c.l.bf16 %v3367_v57  ;;  %v503_v41 = vmul.f32 %v2449_v15, %v3380_v62 }
  0x2c   : > { %v393_v63 = vadd.f32 %v391_v8, %v379_v46  ;;  %v394_v7 = vadd.f32 %v392_v10, %v380_v49  ;;  %v489_v24 = vmul.f32 %v2445_v52, %v3364_v56  ;;  %v2454_v8 = vunpack.c.h.bf16 %v3367_v57  ;;  %v3402_v46 = vld [vmem:[%s3888_s1 + $0x16] ss:$0 sm:$0xff]  ;;  %v3405_v49 = vld [vmem:[%s3155_s28 + $0xf8] sm:$0xff]  }
  0x2d   : > { %v490_v27 = vmul.f32 %v2446_v54, %v3364_v56  ;;  %v504_v40 = vmul.f32 %v2450_v19, %v3380_v62  ;;  %3945 = vst [vmem:[#allocation17_spill] sm:$0xff] %v3402_v46  ;;  %v3408_v1 = vmul.f32 %v2453_v28, %v3387_v20  ;;  %v2461_v18 = vunpack.c.l.bf16 %v3395_v30  ;;  %v2844_v62 = vld [vmem:[%s3155_s28 + $0x148] sm:$0xff]  }
  0x2e   : > { %v407_v10 = vadd.f32 %v405_v11, %v393_v63  ;;  %v408_v31 = vadd.f32 %v406_v12, %v394_v7  ;;  %v3411_v57 = vmul.f32 %v2454_v8, %v3387_v20  ;;  %v2457_v11 = vunpack.c.l.bf16 %v2840_v21  ;;  %v3416_v63 = vld [vmem:[%s3888_s1 + $0x17] ss:$0 sm:$0xff] }
  0x2f   : > { %v2458_v12 = vunpack.c.h.bf16 %v2840_v21  ;;  %3946 = vst [vmem:[#allocation18_spill] sm:$0xff] %v3416_v63  ;;  %v2462_v53 = vunpack.c.h.bf16 %v3395_v30  ;;  %v2465_v3 = vunpack.c.l.bf16 %v3405_v49  ;;  %v3435_v30 = vmul.f32 %v2461_v18, %v3416_v63 }
  0x30   : > { %v421_v7 = vadd.f32 %v419_v25, %v407_v10  ;;  %v422_v44 = vadd.f32 %v420_v26, %v408_v31  ;;  %v3426_v4 = vmul.f32 %v2457_v11, %v3402_v46  ;;  %v2466_v25 = vunpack.c.h.bf16 %v3405_v49  ;;  %v2843_v26 = vld [vmem:[%s3155_s28 + $0x120] sm:$0xff]  }
  0x31   : > { %v3429_v21 = vmul.f32 %v2458_v12, %v3402_v46  ;;  %v3438_v20 = vmul.f32 %v2462_v53, %v3416_v63  ;;  %v3442_v56 = vmul.f32 %v2465_v3, %v3423_v33  ;;  %v706_v2 = vmul.f32 %v2441_v45, %v3160_v5 }
  0x32   : > { %v435_v10 = vadd.f32 %v433_v34, %v421_v7  ;;  %v436_v31 = vadd.f32 %v434_v35, %v422_v44  ;;  %v3445_v46 = vmul.f32 %v2466_v25, %v3423_v33  ;;  %v707_v49 = vmul.f32 %v2442_v39, %v3160_v5  ;;  %v3452_v7 = vld [vmem:[%s3888_s1 + $0x19] ss:$0 sm:$0xff] }
  0x33   : > { %v2469_v44 = vunpack.c.l.bf16 %v2843_v26  ;;  %v2470_v35 = vunpack.c.h.bf16 %v2843_v26  ;;  %v2473_v63 = vunpack.c.l.bf16 %v2844_v62  ;;  %v2474_v29 = vunpack.c.h.bf16 %v2844_v62 }
  0x34   : > { %v449_v37 = vadd.f32 %v447_v42, %v435_v10  ;;  %v450_v34 = vadd.f32 %v448_v43, %v436_v31  ;;  %v717_v22 = vmul.f32 %v2445_v52, %v3165_v6  ;;  %v718_v33 = vmul.f32 %v2446_v54, %v3165_v6  ;;  %v3461_v43 = vld [vmem:[%s3888_s1 + $0x1a] ss:$0 sm:$0xff] }
  0x35   : > { %v730_v45 = vmul.f32 %v2449_v15, %v3175_v14  ;;  %v731_v42 = vmul.f32 %v2450_v19, %v3175_v14  ;;  %v743_v10 = vmul.f32 %v2453_v28, %v3181_v16  ;;  %v744_v62 = vmul.f32 %v2454_v8, %v3181_v16 }
  0x36   : > { %v463_v0 = vadd.f32 %v461_v50, %v449_v37  ;;  %v464_v13 = vadd.f32 %v462_v55, %v450_v34  ;;  %v719_v39 = vadd.f32 %v717_v22, %v706_v2  ;;  %v720_v26 = vadd.f32 %v718_v33, %v707_v49 }
  0x37   : > { %v573_v50 = vmul.f32 %v2469_v44, %v3452_v7  ;;  %v574_v55 = vmul.f32 %v2470_v35, %v3452_v7  ;;  %v756_v19 = vmul.f32 %v2457_v11, %v3199_v32  ;;  %v757_v2 = vmul.f32 %v2458_v12, %v3199_v32 }
  0x38   : > { %v477_v52 = vadd.f32 %v3370_v59, %v463_v0  ;;  %v478_v37 = vadd.f32 %v3373_v60, %v464_v13  ;;  %v732_v54 = vadd.f32 %v730_v45, %v719_v39  ;;  %v733_v15 = vadd.f32 %v731_v42, %v720_v26  ;;  %v2855_v39 = vld [vmem:[%s3155_s28 + $0x198] sm:$0xff]  }
  0x39   : > { %v3472_v28 = vmul.f32 %v2473_v63, %v3461_v43  ;;  %v3475_v0 = vmul.f32 %v2474_v29, %v3461_v43  ;;  %v769_v60 = vmul.f32 %v2461_v18, %v3211_v38  ;;  %v770_v8 = vmul.f32 %v2462_v53, %v3211_v38 }
  0x3a   : > { %v491_v33 = vadd.f32 %v489_v24, %v477_v52  ;;  %v492_v22 = vadd.f32 %v490_v27, %v478_v37  ;;  %v745_v13 = vadd.f32 %v743_v10, %v732_v54  ;;  %v746_v59 = vadd.f32 %v744_v62, %v733_v15  ;;  %v2854_v27 = vld [vmem:[%s3155_s28 + $0x170] sm:$0xff]   ;;  %v2857_v52 = vld [vmem:[%s3155_s28 + $0x1e8] sm:$0xff]  }
  0x3b   : > { %v782_v12 = vmul.f32 %v2465_v3, %v3221_v48  ;;  %v783_v24 = vmul.f32 %v2466_v25, %v3221_v48  ;;  %v795_v45 = vmul.f32 %v2469_v44, %v3237_v58  ;;  %v796_v42 = vmul.f32 %v2470_v35, %v3237_v58  ;;  %v2856_v3 = vld [vmem:[%s3155_s28 + $0x1c0] sm:$0xff]  }
  0x3c   : > { %v505_v31 = vadd.f32 %v503_v41, %v491_v33  ;;  %v506_v11 = vadd.f32 %v504_v40, %v492_v22  ;;  %v758_v49 = vadd.f32 %v756_v19, %v745_v13  ;;  %v759_v34 = vadd.f32 %v757_v2, %v746_v59 }
  0x3d   : > { %v808_v53 = vmul.f32 %v2473_v63, %v3247_v9  ;;  %v809_v41 = vmul.f32 %v2474_v29, %v3247_v9  ;;  %v2518_v10 = vunpack.c.l.bf16 %v2854_v27  ;;  %v2519_v62 = vunpack.c.h.bf16 %v2854_v27  ;;  %v2859_v27 = vld [vmem:[%s3155_s28 + $0x238] sm:$0xff]  }
  0x3e   : > { %v519_v18 = vadd.f32 %v3408_v1, %v505_v31  ;;  %v520_v26 = vadd.f32 %v3411_v57, %v506_v11  ;;  %v771_v40 = vadd.f32 %v769_v60, %v758_v49  ;;  %v772_v25 = vadd.f32 %v770_v8, %v759_v34 }
  0x3f   : > { %v2522_v35 = vunpack.c.l.bf16 %v2855_v39  ;;  %v2523_v54 = vunpack.c.h.bf16 %v2855_v39  ;;  %v2526_v57 = vunpack.c.l.bf16 %v2856_v3  ;;  %v2527_v19 = vunpack.c.h.bf16 %v2856_v3  ;;  %v2861_v3 = vld [vmem:[%s3155_s28 + $0x288] sm:$0xff]  }
  0x40   : > { %v533_v37 = vadd.f32 %v3426_v4, %v519_v18  ;;  %v534_v44 = vadd.f32 %v3429_v21, %v520_v26  ;;  %v784_v15 = vadd.f32 %v782_v12, %v771_v40  ;;  %v785_v1 = vadd.f32 %v783_v24, %v772_v25  ;;  %v2862_v40 = vld [vmem:[%s3155_s28 + $0x2b0] sm:$0xff]  }
  0x41   : > { %v2530_v2 = vunpack.c.l.bf16 %v2857_v52  ;;  %v2531_v33 = vunpack.c.h.bf16 %v2857_v52  ;;  %v822_v4 = vmul.f32 %v2518_v10, %v3255_v17  ;;  %v823_v21 = vmul.f32 %v2519_v62, %v3255_v17 }
  0x42   : > { %v547_v63 = vadd.f32 %v3435_v30, %v533_v37  ;;  %v548_v29 = vadd.f32 %v3438_v20, %v534_v44  ;;  %v797_v22 = vadd.f32 %v795_v45, %v784_v15  ;;  %v798_v13 = vadd.f32 %v796_v42, %v785_v1  ;;  %v2858_v20 = vld [vmem:[%s3155_s28 + $0x210] sm:$0xff]   ;;  %v2860_v45 = vld [vmem:[%s3155_s28 + $0x260] sm:$0xff]  }
  0x43   : > { %v836_v8 = vmul.f32 %v2522_v35, %v3267_v23  ;;  %v837_v30 = vmul.f32 %v2523_v54, %v3267_v23  ;;  %v850_v12 = vmul.f32 %v2526_v57, %v3280_v36  ;;  %v851_v24 = vmul.f32 %v2527_v19, %v3280_v36  ;;  %v3515_v19 = vld [vmem:[%s3155_s28 + $0x10] sm:$0xff]  }
  0x44   : > { %v561_v59 = vadd.f32 %v3442_v56, %v547_v63  ;;  %v562_v60 = vadd.f32 %v3445_v46, %v548_v29  ;;  %v810_v31 = vadd.f32 %v808_v53, %v797_v22  ;;  %v811_v11 = vadd.f32 %v809_v41, %v798_v13  ;;  %v3948_v29 = vld [vmem:[#allocation10_spill] sm:$0xff] }
  0x45   : > { %v864_v56 = vmul.f32 %v2530_v2, %v3296_v47  ;;  %v865_v46 = vmul.f32 %v2531_v33, %v3296_v47  ;;  %v2534_v18 = vunpack.c.l.bf16 %v2858_v20  ;;  %v2535_v26 = vunpack.c.h.bf16 %v2858_v20 }
  0x46   : > { %v575_v49 = vadd.f32 %v573_v50, %v561_v59  ;;  %v576_v34 = vadd.f32 %v574_v55, %v562_v60  ;;  %v824_v42 = vadd.f32 %v822_v4, %v810_v31  ;;  %v825_v39 = vadd.f32 %v823_v21, %v811_v11  ;;  %v3522_v21 = vld [vmem:[%s3155_s28 + $0x38] sm:$0xff]   ;;  %v3525_v59 = vld [vmem:[%s3155_s28 + $0x60] sm:$0xff]   ;;  %v3952_v11 = vld [vmem:[#allocation12_spill] sm:$0xff] }
  0x47   : > { %v2538_v25 = vunpack.c.l.bf16 %v2859_v27  ;;  %v2539_v10 = vunpack.c.h.bf16 %v2859_v27  ;;  %v2542_v62 = vunpack.c.l.bf16 %v2860_v45  ;;  %v2543_v52 = vunpack.c.h.bf16 %v2860_v45  ;;  %v3949_v60 = vld [vmem:[#allocation2_spill] sm:$0xff]  ;;  %v3953_v45 = vld [vmem:[#allocation13_spill] sm:$0xff] }
  0x48   : > { %v589_v53 = vadd.f32 %v3472_v28, %v575_v49  ;;  %v590_v41 = vadd.f32 %v3475_v0, %v576_v34  ;;  %v838_v50 = vadd.f32 %v836_v8, %v824_v42  ;;  %v839_v55 = vadd.f32 %v837_v30, %v825_v39  ;;  %v3951_v30 = vld [vmem:[#allocation11_spill] sm:$0xff] }
  0x49   : > { %v2546_v44 = vunpack.c.l.bf16 %v2861_v3  ;;  %v2547_v35 = vunpack.c.h.bf16 %v2861_v3  ;;  %v2550_v54 = vunpack.c.l.bf16 %v2862_v40  ;;  %v878_v57 = vmul.f32 %v2534_v18, %v3301_v51 }
  0x4a   : > { %v591_v37 = vpack.c.bf16 %v590_v41, %v589_v53  ;;  %v852_v15 = vadd.f32 %v850_v12, %v838_v50  ;;  %v853_v1 = vadd.f32 %v851_v24, %v839_v55  ;;  %v879_v28 = vmul.f32 %v2535_v26, %v3301_v51  ;;  %v3954_v50 = vld [vmem:[#allocation3_spill] sm:$0xff]  ;;  %v3955_v55 = vld [vmem:[#allocation14_spill] sm:$0xff] }
  0x4b   : > { %v892_v0 = vmul.f32 %v2538_v25, %v3311_v61  ;;  %v893_v63 = vmul.f32 %v2539_v10, %v3311_v61  ;;  %v906_v2 = vmul.f32 %v2542_v62, %v3948_v29  ;;  %v2551_v33 = vunpack.c.h.bf16 %v2862_v40  ;;  %v3547_v25 = vld [vmem:[%s3155_s28 + $0xb0] sm:$0xff]   ;;  %v3550_v10 = vld [vmem:[%s3155_s28 + $0xd8] sm:$0xff]  }
  0x4c   : > { %2982 = vmatmul.mubr.bf16.vlgmr.msra.gmra.mxu0 %v591_v37  ;;  %v866_v22 = vadd.f32 %v864_v56, %v852_v15  ;;  %v867_v13 = vadd.f32 %v865_v46, %v853_v1  ;;  %v907_v4 = vmul.f32 %v2543_v52, %v3948_v29  ;;  %v3950_v8 = vmov 0.0   ;;  %v3538_v46 = vld [vmem:[%s3155_s28 + $0x88] sm:$0xff]  }
  0x4d   : > { %3006 = vmatpush3.bf16.msra.mxu0 %v3949_v60  ;;  %3021 = vmatprep.mubr.msk.bf16.mxu0 %vm3081_vm0, %v3950_v8  ;;  %v920_v20 = vmul.f32 %v2546_v44, %v3951_v30  ;;  %v921_v31 = vmul.f32 %v2547_v35, %v3951_v30  ;;  %v934_v12 = vmul.f32 %v2550_v54, %v3952_v11  ;;  %v2554_v24 = vunpack.c.l.bf16 %v3515_v19  ;;  %v3956_v37 = vld [vmem:[#allocation15_spill] sm:$0xff]  ;;  %v3573_v60 = vld [vmem:[%s3155_s28 + $0x150] sm:$0xff]  }
  0x4e   : > { %3007 = vmatprep.subr.bf16.mxu0 %v3950_v8  ;;  %v880_v27 = vadd.f32 %v878_v57, %v866_v22  ;;  %v881_v49 = vadd.f32 %v879_v28, %v867_v13  ;;  %v935_v34 = vmul.f32 %v2551_v33, %v3952_v11  ;;  %v2555_v56 = vunpack.c.h.bf16 %v3515_v19  ;;  %v3561_v28 = vld [vmem:[%s3155_s28 + $0x100] sm:$0xff]   ;;  %v3957_v19 = vld [vmem:[#allocation16_spill] sm:$0xff]  ;;  %v3962_v11 = vld [vmem:[#allocation5_spill] sm:$0xff] }
  0x4f   : > { %v948_v42 = vmul.f32 %v2554_v24, %v3953_v45  ;;  %v2558_v39 = vunpack.c.l.bf16 %v3522_v21  ;;  %v2559_v18 = vunpack.c.h.bf16 %v3522_v21  ;;  %v2562_v26 = vunpack.c.l.bf16 %v3525_v59 }
  0x50   : > { %v894_v3 = vadd.f32 %v892_v0, %v880_v27  ;;  %v895_v40 = vadd.f32 %v893_v63, %v881_v49  ;;  %v949_v53 = vmul.f32 %v2555_v56, %v3953_v45  ;;  %v2563_v41 = vunpack.c.h.bf16 %v3525_v59  ;;  %v3958_v27 = vld [vmem:[#allocation4_spill] sm:$0xff]  ;;  %v3959_v49 = vld [vmem:[#allocation17_spill] sm:$0xff] }
  0x51   : > { %3008 = vmatpush3.bf16.msra.mxu0 %v3954_v50  ;;  %v962_v62 = vmul.f32 %v2558_v39, %v3955_v55  ;;  %v963_v52 = vmul.f32 %v2559_v18, %v3955_v55  ;;  %v976_v44 = vmul.f32 %v2562_v26, %v3956_v37  ;;  %v2566_v35 = vunpack.c.l.bf16 %v3538_v46 }
  0x52   : > { %3009 = vmatprep.subr.bf16.mxu0 %v3950_v8  ;;  %v908_v54 = vadd.f32 %v906_v2, %v894_v3  ;;  %v909_v15 = vadd.f32 %v907_v4, %v895_v40  ;;  %v977_v1 = vmul.f32 %v2563_v41, %v3956_v37  ;;  %v2567_v57 = vunpack.c.h.bf16 %v3538_v46  ;;  %v3570_v4 = vld [vmem:[%s3155_s28 + $0x128] sm:$0xff]   ;;  %v3960_v40 = vld [vmem:[#allocation18_spill] sm:$0xff] }
  0x53   : > { %v990_v0 = vmul.f32 %v2566_v35, %v3957_v19  ;;  %v2570_v63 = vunpack.c.l.bf16 %v3547_v25  ;;  %v2571_v33 = vunpack.c.h.bf16 %v3547_v25  ;;  %v2574_v22 = vunpack.c.l.bf16 %v3550_v10 }
  0x54   : > { %v922_v13 = vadd.f32 %v920_v20, %v908_v54  ;;  %v923_v21 = vadd.f32 %v921_v31, %v909_v15  ;;  %v991_v59 = vmul.f32 %v2567_v57, %v3957_v19  ;;  %v2575_v2 = vunpack.c.h.bf16 %v3550_v10  ;;  %v3961_v15 = vld [vmem:[#allocation19_spill] sm:$0xff] }
  0x55   : > { %3010 = vmatpush3.bf16.msra.mxu0 %v3958_v27  ;;  %v1004_v46 = vmul.f32 %v2570_v63, %v3959_v49  ;;  %v1005_v3 = vmul.f32 %v2571_v33, %v3959_v49  ;;  %v1018_v25 = vmul.f32 %v2574_v22, %v3960_v40  ;;  %v2578_v50 = vunpack.c.l.bf16 %v3561_v28 }
  0x56   : > { %3011 = vmatprep.subr.bf16.mxu0 %v3950_v8  ;;  %v936_v20 = vadd.f32 %v934_v12, %v922_v13  ;;  %v937_v31 = vadd.f32 %v935_v34, %v923_v21  ;;  %v1019_v10 = vmul.f32 %v2575_v2, %v3960_v40  ;;  %v2579_v54 = vunpack.c.h.bf16 %v3561_v28 }
  0x57   : > { %v1032_v19 = vmul.f32 %v2578_v50, %v3961_v15  ;;  %v2582_v27 = vunpack.c.l.bf16 %v3570_v4  ;;  %v2583_v37 = vunpack.c.h.bf16 %v3570_v4  ;;  %v2586_v49 = vunpack.c.l.bf16 %v3573_v60 }
  0x58   : > { %v950_v55 = vadd.f32 %v948_v42, %v936_v20  ;;  %v951_v45 = vadd.f32 %v949_v53, %v937_v31  ;;  %v1125_v30 = vmul.f32 %v2554_v24, %v3160_v5  ;;  %v1126_v12 = vmul.f32 %v2555_v56, %v3160_v5 }
  0x59   : > { %3012 = vmatpush3.bf16.msra.mxu0 %v3962_v11  ;;  %v1033_v34 = vmul.f32 %v2579_v54, %v3961_v15  ;;  %v1136_v28 = vmul.f32 %v2558_v39, %v3165_v6  ;;  %v1137_v13 = vmul.f32 %v2559_v18, %v3165_v6  ;;  %v1149_v21 = vmul.f32 %v2562_v26, %v3175_v14  ;;  %v3963_v18 = vld [vmem:[#allocation6_spill] sm:$0xff] }
  0x5a   : > { %3013 = vmatprep.subr.bf16.mxu0 %v3950_v8  ;;  %v964_v4 = vadd.f32 %v962_v62, %v950_v55  ;;  %v965_v40 = vadd.f32 %v963_v52, %v951_v45  ;;  %v1046_v42 = vmul.f32 %v2582_v27, %v3452_v7  ;;  %v1150_v11 = vmul.f32 %v2563_v41, %v3175_v14 }
  0x5b   : > { %v1138_v53 = vadd.f32 %v1136_v28, %v1125_v30  ;;  %v1139_v24 = vadd.f32 %v1137_v13, %v1126_v12  ;;  %v1162_v5 = vmul.f32 %v2566_v35, %v3181_v16  ;;  %v1163_v56 = vmul.f32 %v2567_v57, %v3181_v16  ;;  %v2882_v57 = vld [vmem:[%s3155_s28 + $0x178] sm:$0xff]   ;;  %v2884_v13 = vld [vmem:[%s3155_s28 + $0x1c8] sm:$0xff]  }
  0x5c   : > { %v978_v20 = vadd.f32 %v976_v44, %v964_v4  ;;  %v979_v31 = vadd.f32 %v977_v1, %v965_v40  ;;  %v1047_v39 = vmul.f32 %v2583_v37, %v3452_v7  ;;  %v2587_v6 = vunpack.c.h.bf16 %v3573_v60 }
  0x5d   : > { %3014 = vmatpush3.bf16.msra.mxu0 %v3963_v18  ;;  %v1151_v45 = vadd.f32 %v1149_v21, %v1138_v53  ;;  %v1152_v26 = vadd.f32 %v1150_v11, %v1139_v24  ;;  %v1175_v14 = vmul.f32 %v2570_v63, %v3199_v32  ;;  %v1176_v30 = vmul.f32 %v2571_v33, %v3199_v32  ;;  %v3964_v63 = vld [vmem:[#allocation7_spill] sm:$0xff]  ;;  %v2883_v33 = vld [vmem:[%s3155_s28 + $0x1a0] sm:$0xff]   ;;  %v3965_v24 = vld [vmem:[#allocation8_spill] sm:$0xff] }
  0x5e   : > { %3015 = vmatprep.subr.bf16.mxu0 %v3950_v8  ;;  %v992_v41 = vadd.f32 %v990_v0, %v978_v20  ;;  %v993_v16 = vadd.f32 %v991_v59, %v979_v31  ;;  %v1060_v55 = vmul.f32 %v2586_v49, %v3461_v43  ;;  %v1061_v62 = vmul.f32 %v2587_v6, %v3461_v43 }
  0x5f   : > { %v1164_v52 = vadd.f32 %v1162_v5, %v1151_v45  ;;  %v1165_v44 = vadd.f32 %v1163_v56, %v1152_v26  ;;  %v1188_v35 = vmul.f32 %v2574_v22, %v3211_v38  ;;  %v1189_v1 = vmul.f32 %v2575_v2, %v3211_v38 }
  0x60   : > { %v1006_v60 = vadd.f32 %v1004_v46, %v992_v41  ;;  %v1007_v40 = vadd.f32 %v1005_v3, %v993_v16  ;;  %v1201_v32 = vmul.f32 %v2578_v50, %v3221_v48  ;;  %v1202_v0 = vmul.f32 %v2579_v54, %v3221_v48  ;;  %v2885_v54 = vld [vmem:[%s3155_s28 + $0x1f0] sm:$0xff]  }
  0x61   : > { %3016 = vmatpush3.bf16.msra.mxu0 %v3964_v63  ;;  %v1177_v59 = vadd.f32 %v1175_v14, %v1164_v52  ;;  %v1178_v12 = vadd.f32 %v1176_v30, %v1165_v44  ;;  %v1214_v22 = vmul.f32 %v2582_v27, %v3237_v58  ;;  %v1215_v38 = vmul.f32 %v2583_v37, %v3237_v58  ;;  %v3966_v14 = vld [vmem:[#allocation9_spill] sm:$0xff]  ;;  %v2887_v30 = vld [vmem:[%s3155_s28 + $0x240] sm:$0xff]  }
  0x62   : > { %3017 = vmatprep.subr.bf16.mxu0 %v3950_v8  ;;  %v1020_v2 = vadd.f32 %v1018_v25, %v1006_v60  ;;  %v1021_v28 = vadd.f32 %v1019_v10, %v1007_v40  ;;  %v1227_v46 = vmul.f32 %v2586_v49, %v3247_v9  ;;  %v2631_v3 = vunpack.c.l.bf16 %v2882_v57 }
  0x63   : > { %v1190_v21 = vadd.f32 %v1188_v35, %v1177_v59  ;;  %v1191_v50 = vadd.f32 %v1189_v1, %v1178_v12  ;;  %v2632_v4 = vunpack.c.h.bf16 %v2882_v57  ;;  %v2635_v48 = vunpack.c.l.bf16 %v2883_v33  ;;  %v2888_v35 = vld [vmem:[%s3155_s28 + $0x268] sm:$0xff]  }
  0x64   : > { %v1034_v11 = vadd.f32 %v1032_v19, %v1020_v2  ;;  %v1035_v53 = vadd.f32 %v1033_v34, %v1021_v28  ;;  %v1228_v27 = vmul.f32 %v2587_v6, %v3247_v9  ;;  %v2636_v5 = vunpack.c.h.bf16 %v2883_v33  ;;  %v2886_v6 = vld [vmem:[%s3155_s28 + $0x218] sm:$0xff]  }
  0x65   : > { %3018 = vmatpush3.bf16.msra.mxu0 %v3965_v24  ;;  %v1203_v58 = vadd.f32 %v1201_v32, %v1190_v21  ;;  %v1204_v37 = vadd.f32 %v1202_v0, %v1191_v50  ;;  %v2639_v49 = vunpack.c.l.bf16 %v2884_v13  ;;  %v2640_v25 = vunpack.c.h.bf16 %v2884_v13  ;;  %v3967_v24 = vld [vmem:[#allocation11_spill] sm:$0xff] }
  0x66   : > { %3019 = vmatprep.subr.bf16.mxu0 %v3950_v8  ;;  %v1048_v10 = vadd.f32 %v1046_v42, %v1034_v11  ;;  %v1049_v56 = vadd.f32 %v1047_v39, %v1035_v53  ;;  %v1241_v20 = vmul.f32 %v2631_v3, %v3255_v17  ;;  %v2643_v31 = vunpack.c.l.bf16 %v2885_v54 }
  0x67   : > { %v1216_v19 = vadd.f32 %v1214_v22, %v1203_v58  ;;  %v1217_v34 = vadd.f32 %v1215_v38, %v1204_v37  ;;  %v1242_v18 = vmul.f32 %v2632_v4, %v3255_v17  ;;  %v1255_v9 = vmul.f32 %v2635_v48, %v3267_v23  ;;  %v2889_v17 = vld [vmem:[%s3155_s28 + $0x290] sm:$0xff]   ;;  %v3658_v58 = vld [vmem:[%s3155_s28 + $0x68] sm:$0xff]  }
  0x68   : > { %v1062_v45 = vadd.f32 %v1060_v55, %v1048_v10  ;;  %v1063_v26 = vadd.f32 %v1061_v62, %v1049_v56  ;;  %v1256_v42 = vmul.f32 %v2636_v5, %v3267_v23  ;;  %v2644_v39 = vunpack.c.h.bf16 %v2885_v54  ;;  %v2890_v62 = vld [vmem:[%s3155_s28 + $0x2b8] sm:$0xff]   ;;  %v3651_v54 = vld [vmem:[%s3155_s28 + $0x40] sm:$0xff]  }
  0x69   : > { %3020 = vmatpush3.bf16.msra.mxu0 %v3966_v14  ;;  %v1229_v41 = vadd.f32 %v1227_v46, %v1216_v19  ;;  %v1230_v16 = vadd.f32 %v1228_v27, %v1217_v34  ;;  %v1269_v52 = vmul.f32 %v2639_v49, %v3280_v36  ;;  %v1270_v44 = vmul.f32 %v2640_v25, %v3280_v36  ;;  %v3064_v36 = vld [vmem:[%s3889_s2 + $0x38] sm:$0xff]   ;;  %v3968_v25 = vld [vmem:[#allocation12_spill] sm:$0xff] }
  0x6a   : > { %v1064_v1 = vpack.c.bf16 %v1063_v26, %v1062_v45  ;;  %v1283_v57 = vmul.f32 %v2643_v31, %v3296_v47  ;;  %v2647_v55 = vunpack.c.l.bf16 %v2886_v6  ;;  %v2648_v60 = vunpack.c.h.bf16 %v2886_v6  ;;  %v3643_v46 = vld [vmem:[%s3155_s28 + $0x18] sm:$0xff]  }
  0x6b   : > { %v1243_v40 = vadd.f32 %v1241_v20, %v1229_v41  ;;  %v1244_v63 = vadd.f32 %v1242_v18, %v1230_v16  ;;  %v2651_v23 = vunpack.c.l.bf16 %v2887_v30  ;;  %v2652_v32 = vunpack.c.h.bf16 %v2887_v30  ;;  %v3969_v31 = vld [vmem:[#allocation13_spill] sm:$0xff]  ;;  %v3683_v16 = vld [vmem:[%s3155_s28 + $0xe0] sm:$0xff]  }
  0x6c   : > { %3002 = vmatmul.mubr.bf16.vlgmr.msra.gmra.mxu1 %v1064_v1  ;;  %v1284_v0 = vmul.f32 %v2644_v39, %v3296_v47  ;;  %v2655_v33 = vunpack.c.l.bf16 %v2888_v35  ;;  %v2656_v59 = vunpack.c.h.bf16 %v2888_v35  ;;  %v2659_v12 = vunpack.c.l.bf16 %v2889_v17  ;;  %v3676_v26 = vld [vmem:[%s3155_s28 + $0xb8] sm:$0xff]   ;;  %v3971_v1 = vld [vmem:[#allocation15_spill] sm:$0xff] }
  0x6d   : > { %3026 = vmatpush3.bf16.msra.mxu1 %v3064_v36  ;;  %3041 = vmatprep.mubr.msk.bf16.mxu1 %vm3081_vm0, %v3950_v8  ;;  %v1257_v22 = vadd.f32 %v1255_v9, %v1243_v40  ;;  %v1258_v38 = vadd.f32 %v1256_v42, %v1244_v63  ;;  %v2660_v2 = vunpack.c.h.bf16 %v2889_v17  ;;  %v2663_v28 = vunpack.c.l.bf16 %v2890_v62  ;;  %v3970_v42 = vld [vmem:[#allocation14_spill] sm:$0xff]  ;;  %v3972_v40 = vld [vmem:[#allocation16_spill] sm:$0xff] }
  0x6e   : > { %3027 = vmatprep.subr.bf16.mxu1 %v3950_v8  ;;  %v1297_v47 = vmul.f32 %v2647_v55, %v3301_v51  ;;  %v1298_v3 = vmul.f32 %v2648_v60, %v3301_v51  ;;  %v2664_v13 = vunpack.c.h.bf16 %v2890_v62  ;;  %v1311_v4 = vmul.f32 %v2651_v23, %v3311_v61  ;;  %v3065_v51 = vld [vmem:[%s3889_s2 + $0x30] sm:$0xff]   ;;  %v3693_v55 = vld [vmem:[%s3155_s28 + $0x108] sm:$0xff]  }
  0x6f   : > { %v1271_v21 = vadd.f32 %v1269_v52, %v1257_v22  ;;  %v1272_v50 = vadd.f32 %v1270_v44, %v1258_v38  ;;  %v1312_v48 = vmul.f32 %v2652_v32, %v3311_v61  ;;  %v1325_v11 = vmul.f32 %v2655_v33, %v3948_v29  ;;  %v3066_v52 = vld [vmem:[%s3889_s2 + $0x28] sm:$0xff]   ;;  %v3973_v22 = vld [vmem:[#allocation17_spill] sm:$0xff] }
  0x70   : > { %v1326_v53 = vmul.f32 %v2656_v59, %v3948_v29  ;;  %v1339_v27 = vmul.f32 %v2659_v12, %v3967_v24  ;;  %v2667_v5 = vunpack.c.l.bf16 %v3643_v46  ;;  %v1340_v49 = vmul.f32 %v2660_v2, %v3967_v24  ;;  %v3666_v29 = vld [vmem:[%s3155_s28 + $0x90] sm:$0xff]   ;;  %v2275_v12 = vld [vmem:[%s3888_s1] ss:$0 sm:$0xff] }
  0x71   : > { %3028 = vmatpush3.bf16.msra.mxu1 %v3065_v51  ;;  %v1285_v37 = vadd.f32 %v1283_v57, %v1271_v21  ;;  %v1286_v61 = vadd.f32 %v1284_v0, %v1272_v50  ;;  %v1353_v10 = vmul.f32 %v2663_v28, %v3968_v25  ;;  %v1354_v56 = vmul.f32 %v2664_v13, %v3968_v25  ;;  %v3974_v50 = vld [vmem:[#allocation18_spill] sm:$0xff] }
  0x72   : > { %3029 = vmatprep.subr.bf16.mxu1 %v3950_v8  ;;  %v2668_v20 = vunpack.c.h.bf16 %v3643_v46  ;;  %v1367_v19 = vmul.f32 %v2667_v5, %v3969_v31  ;;  %v2671_v34 = vunpack.c.l.bf16 %v3651_v54  ;;  %v2672_v6 = vunpack.c.h.bf16 %v3651_v54  ;;  %v3716_v46 = vld [vmem:[%s3155_s28 + $0x130] sm:$0xff]   ;;  %v2278_v54 = vld [vmem:[%s3888_s1 + $0x1] ss:$0 sm:$0xff]  ;;  %v2284_v25 = vld [vmem:[%s3888_s1 + $0x3] ss:$0 sm:$0xff] }
  0x73   : > { %v1299_v18 = vadd.f32 %v1297_v47, %v1285_v37  ;;  %v1300_v9 = vadd.f32 %v1298_v3, %v1286_v61  ;;  %v2675_v45 = vunpack.c.l.bf16 %v3658_v58  ;;  %v2676_v30 = vunpack.c.h.bf16 %v3658_v58  ;;  %v3067_v47 = vld [vmem:[%s3889_s2 + $0x20] sm:$0xff]  }
  0x74   : > { %v1368_v14 = vmul.f32 %v2668_v20, %v3969_v31  ;;  %v1381_v39 = vmul.f32 %v2671_v34, %v3970_v42  ;;  %v2679_v41 = vunpack.c.l.bf16 %v3666_v29  ;;  %v1382_v17 = vmul.f32 %v2672_v6, %v3970_v42  ;;  %v2281_v58 = vld [vmem:[%s3888_s1 + $0x2] ss:$0 sm:$0xff] }
  0x75   : > { %3030 = vmatpush3.bf16.msra.mxu1 %v3066_v52  ;;  %v1313_v44 = vadd.f32 %v1311_v4, %v1299_v18  ;;  %v1314_v35 = vadd.f32 %v1312_v48, %v1300_v9  ;;  %v3690_v57 = vmul.f32 %v2675_v45, %v3971_v1  ;;  %v1396_v60 = vmul.f32 %v2676_v30, %v3971_v1  ;;  %v3728_v48 = vld [vmem:[%s3155_s28 + $0x158] sm:$0xff]  }
  0x76   : > { %3031 = vmatprep.subr.bf16.mxu1 %v3950_v8  ;;  %v2680_v62 = vunpack.c.h.bf16 %v3666_v29  ;;  %v3699_v63 = vmul.f32 %v2679_v41, %v3972_v40  ;;  %v2683_v23 = vunpack.c.l.bf16 %v3676_v26  ;;  %v2684_v33 = vunpack.c.h.bf16 %v3676_v26 }
  0x77   : > { %v1327_v32 = vadd.f32 %v1325_v11, %v1313_v44  ;;  %v1328_v0 = vadd.f32 %v1326_v53, %v1314_v35  ;;  %v2687_v59 = vunpack.c.l.bf16 %v3683_v16  ;;  %v2688_v2 = vunpack.c.h.bf16 %v3683_v16  ;;  %v2287_v16 = vld [vmem:[%s3888_s1 + $0x4] ss:$0 sm:$0xff] }
  0x78   : > { %v3708_v36 = vmul.f32 %v2680_v62, %v3972_v40  ;;  %v3711_v38 = vmul.f32 %v2683_v23, %v3973_v22  ;;  %v2691_v28 = vunpack.c.l.bf16 %v3693_v55  ;;  %v3722_v21 = vmul.f32 %v2684_v33, %v3973_v22 }
  0x79   : > { %3032 = vmatpush3.bf16.msra.mxu1 %v3067_v47  ;;  %v1341_v3 = vadd.f32 %v1339_v27, %v1327_v32  ;;  %v1342_v13 = vadd.f32 %v1340_v49, %v1328_v0  ;;  %v3725_v4 = vmul.f32 %v2687_v59, %v3974_v50  ;;  %v3735_v11 = vmul.f32 %v2688_v2, %v3974_v50  ;;  %v2293_v0 = vld [vmem:[%s3888_s1 + $0x6] ss:$0 sm:$0xff] }
  0x7a   : > { %3033 = vmatprep.subr.bf16.mxu1 %v3950_v8  ;;  %v2692_v53 = vunpack.c.h.bf16 %v3693_v55  ;;  %v3741_v24 = vmul.f32 %v2691_v28, %v3961_v15  ;;  %v1544_v27 = vmul.f32 %v2667_v5, %v2275_v12  ;;  %v2695_v61 = vunpack.c.l.bf16 %v3716_v46  ;;  %v3068_v5 = vld [vmem:[%s3889_s2 + $0x18] sm:$0xff]  }
  0x7b   : > { %v1355_v51 = vadd.f32 %v1353_v10, %v1341_v3  ;;  %v1356_v37 = vadd.f32 %v1354_v56, %v1342_v13  ;;  %v2696_v49 = vunpack.c.h.bf16 %v3716_v46  ;;  %v2699_v29 = vunpack.c.l.bf16 %v3728_v48 }
  0x7c   : > { %v1545_v31 = vmul.f32 %v2668_v20, %v2275_v12  ;;  %v1555_v18 = vmul.f32 %v2671_v34, %v2278_v54  ;;  %v1556_v9 = vmul.f32 %v2672_v6, %v2278_v54  ;;  %v1568_v26 = vmul.f32 %v2675_v45, %v2281_v58  ;;  %v2299_v54 = vld [vmem:[%s3888_s1 + $0x8] ss:$0 sm:$0xff] }
  0x7d   : > { %3034 = vmatpush3.bf16.msra.mxu1 %v3068_v5  ;;  %v1369_v10 = vadd.f32 %v1367_v19, %v1355_v51  ;;  %v1370_v56 = vadd.f32 %v1368_v14, %v1356_v37  ;;  %v1569_v42 = vmul.f32 %v2676_v30, %v2281_v58  ;;  %v1581_v20 = vmul.f32 %v2679_v41, %v2284_v25  ;;  %v2290_v19 = vld [vmem:[%s3888_s1 + $0x5] ss:$0 sm:$0xff]  ;;  %v3069_v41 = vld [vmem:[%s3889_s2 + $0x10] sm:$0xff]  }
  0x7e   : > { %3035 = vmatprep.subr.bf16.mxu1 %v3950_v8  ;;  %v1557_v52 = vadd.f32 %v1555_v18, %v1544_v27  ;;  %v1558_v44 = vadd.f32 %v1556_v9, %v1545_v31  ;;  %v1582_v34 = vmul.f32 %v2680_v62, %v2284_v25  ;;  %v1452_v1 = vmul.f32 %v2692_v53, %v3961_v15  ;;  %v2302_v25 = vld [vmem:[%s3888_s1 + $0x9] ss:$0 sm:$0xff]  ;;  %v2912_v31 = vld [vmem:[%s3155_s28 + $0x1d0] sm:$0xff]  }
  0x7f   : > { %v1383_v6 = vadd.f32 %v1381_v39, %v1369_v10  ;;  %v1384_v35 = vadd.f32 %v1382_v17, %v1370_v56  ;;  %v3761_v40 = vmul.f32 %v2695_v61, %v3452_v7  ;;  %v1594_v30 = vmul.f32 %v2683_v23, %v2287_v16  ;;  %v2913_v56 = vld [vmem:[%s3155_s28 + $0x1f8] sm:$0xff]  }
  0x80   : > { %v1570_v45 = vadd.f32 %v1568_v26, %v1557_v52  ;;  %v1571_v14 = vadd.f32 %v1569_v42, %v1558_v44  ;;  %v1595_v32 = vmul.f32 %v2684_v33, %v2287_v16  ;;  %v1466_v17 = vmul.f32 %v2696_v49, %v3452_v7 }
  0x81   : > { %3036 = vmatpush3.bf16.msra.mxu1 %v3069_v41  ;;  %v1397_v39 = vadd.f32 %v3690_v57, %v1383_v6  ;;  %v1398_v15 = vadd.f32 %v1396_v60, %v1384_v35  ;;  %v2700_v62 = vunpack.c.h.bf16 %v3728_v48  ;;  %v1607_v12 = vmul.f32 %v2687_v59, %v2290_v19  ;;  %v2296_v57 = vld [vmem:[%s3888_s1 + $0x7] ss:$0 sm:$0xff]  ;;  %v2915_v41 = vld [vmem:[%s3155_s28 + $0x248] sm:$0xff]  }
  0x82   : > { %3037 = vmatprep.subr.bf16.mxu1 %v3950_v8  ;;  %v1583_v23 = vadd.f32 %v1581_v20, %v1570_v45  ;;  %v1584_v33 = vadd.f32 %v1582_v34, %v1571_v14  ;;  %v1608_v22 = vmul.f32 %v2688_v2, %v2290_v19  ;;  %v2910_v60 = vld [vmem:[%s3155_s28 + $0x180] sm:$0xff]   ;;  %v1479_v47 = vmul.f32 %v2699_v29, %v3461_v43  ;;  %v2308_v20 = vld [vmem:[%s3888_s1 + $0xb] ss:$0 sm:$0xff] }
  0x83   : > { %v1411_v7 = vadd.f32 %v3699_v63, %v1397_v39  ;;  %v1412_v46 = vadd.f32 %v3708_v36, %v1398_v15  ;;  %v1480_v3 = vmul.f32 %v2700_v62, %v3461_v43  ;;  %v1620_v59 = vmul.f32 %v2691_v28, %v2293_v0  ;;  %v2911_v63 = vld [vmem:[%s3155_s28 + $0x1a8] sm:$0xff]   ;;  %v2914_v34 = vld [vmem:[%s3155_s28 + $0x220] sm:$0xff]  }
  0x84   : > { %v1596_v13 = vadd.f32 %v1594_v30, %v1583_v23  ;;  %v1597_v50 = vadd.f32 %v1595_v32, %v1584_v33  ;;  %v1621_v2 = vmul.f32 %v2692_v53, %v2293_v0  ;;  %v3070_v36 = vld [vmem:[%s3889_s2 + $0x8] sm:$0xff]   ;;  %v1633_v58 = vmul.f32 %v2695_v61, %v2296_v57 }
  0x85   : > { %3038 = vmatpush3.bf16.msra.mxu1 %v3070_v36  ;;  %v1425_v27 = vadd.f32 %v3711_v38, %v1411_v7  ;;  %v1426_v43 = vadd.f32 %v3722_v21, %v1412_v46  ;;  %v2744_v51 = vunpack.c.l.bf16 %v2910_v60  ;;  %v1634_v53 = vmul.f32 %v2696_v49, %v2296_v57  ;;  %v2305_v49 = vld [vmem:[%s3888_s1 + $0xa] ss:$0 sm:$0xff]  ;;  %v2311_v32 = vld [vmem:[%s3888_s1 + $0xc] ss:$0 sm:$0xff] }
  0x86   : > { %3039 = vmatprep.subr.bf16.mxu1 %v3950_v8  ;;  %v1609_v55 = vadd.f32 %v1607_v12, %v1596_v13  ;;  %v1610_v28 = vadd.f32 %v1608_v22, %v1597_v50  ;;  %v2745_v37 = vunpack.c.h.bf16 %v2910_v60  ;;  %v1646_v21 = vmul.f32 %v2699_v29, %v2299_v54  ;;  %v2314_v12 = vld [vmem:[%s3888_s1 + $0xd] ss:$0 sm:$0xff]  ;;  %v2916_v22 = vld [vmem:[%s3155_s28 + $0x270] sm:$0xff]   ;;  %v2317_v50 = vld [vmem:[%s3888_s1 + $0xe] ss:$0 sm:$0xff] }
  0x87   : > { %v1439_v18 = vadd.f32 %v3725_v4, %v1425_v27  ;;  %v1440_v38 = vadd.f32 %v3735_v11, %v1426_v43  ;;  %v2748_v61 = vunpack.c.l.bf16 %v2911_v63  ;;  %v1647_v5 = vmul.f32 %v2700_v62, %v2299_v54  ;;  %v3071_v4 = vld [vmem:[%s3889_s2] sm:$0xff]  }
  0x88   : > { %v1622_v9 = vadd.f32 %v1620_v59, %v1609_v55  ;;  %v1623_v8 = vadd.f32 %v1621_v2, %v1610_v28  ;;  %v2749_v10 = vunpack.c.h.bf16 %v2911_v63  ;;  %v1660_v29 = vmul.f32 %v2744_v51, %v2302_v25  ;;  %v2917_v59 = vld [vmem:[%s3155_s28 + $0x298] sm:$0xff]   ;;  %v2918_v51 = vld [vmem:[%s3155_s28 + $0x2c0] sm:$0xff]  }
  0x89   : > { %3040 = vmatpush3.bf16.msra.mxu1 %v3071_v4  ;;  %v1453_v11 = vadd.f32 %v3741_v24, %v1439_v18  ;;  %v1454_v48 = vadd.f32 %v1452_v1, %v1440_v38  ;;  %v2752_v26 = vunpack.c.l.bf16 %v2912_v31  ;;  %v1661_v52 = vmul.f32 %v2745_v37, %v2302_v25  ;;  %v2323_v18 = vld [vmem:[%s3888_s1 + $0x10] ss:$0 sm:$0xff]  ;;  %v2919_v38 = vld [vmem:[%s3155_s28 + $0x20] sm:$0xff]   ;;  %v2326_v4 = vld [vmem:[%s3888_s1 + $0x11] ss:$0 sm:$0xff] }
  0x8a   : > { %v1635_v42 = vadd.f32 %v1633_v58, %v1622_v9  ;;  %v1636_v16 = vadd.f32 %v1634_v53, %v1623_v8  ;;  %v2753_v44 = vunpack.c.h.bf16 %v2912_v31  ;;  %v1674_v19 = vmul.f32 %v2748_v61, %v2305_v49  ;;  %v2320_v58 = vld [vmem:[%s3888_s1 + $0xf] ss:$0 sm:$0xff] }
  0x8b   : > { %v1467_v6 = vadd.f32 %v3761_v40, %v1453_v11  ;;  %v1468_v35 = vadd.f32 %v1466_v17, %v1454_v48  ;;  %v2756_v45 = vunpack.c.l.bf16 %v2913_v56  ;;  %v1675_v14 = vmul.f32 %v2749_v10, %v2305_v49  ;;  %v2920_v49 = vld [vmem:[%s3155_s28 + $0x48] sm:$0xff]  }
  0x8c   : > { %v1648_v24 = vadd.f32 %v1646_v21, %v1635_v42  ;;  %v1649_v1 = vadd.f32 %v1647_v5, %v1636_v16  ;;  %v2757_v30 = vunpack.c.h.bf16 %v2913_v56  ;;  %v1688_v62 = vmul.f32 %v2752_v26, %v2308_v20  ;;  %v2329_v16 = vld [vmem:[%s3888_s1 + $0x12] ss:$0 sm:$0xff] }
  0x8d   : > { %v1481_v39 = vadd.f32 %v1479_v47, %v1467_v6  ;;  %v1482_v15 = vadd.f32 %v1480_v3, %v1468_v35  ;;  %v2760_v0 = vunpack.c.l.bf16 %v2914_v34  ;;  %v1689_v17 = vmul.f32 %v2753_v44, %v2308_v20 }
  0x8e   : > { %v1662_v23 = vadd.f32 %v1660_v29, %v1648_v24  ;;  %v1663_v40 = vadd.f32 %v1661_v52, %v1649_v1  ;;  %v2761_v33 = vunpack.c.h.bf16 %v2914_v34  ;;  %v1702_v60 = vmul.f32 %v2756_v45, %v2311_v32  ;;  %v2921_v52 = vld [vmem:[%s3155_s28 + $0x70] sm:$0xff]  }
  0x8f   : > { %v1483_v57 = vpack.c.bf16 %v1482_v15, %v1481_v39  ;;  %v2764_v7 = vunpack.c.l.bf16 %v2915_v41  ;;  %v1703_v47 = vmul.f32 %v2757_v30, %v2311_v32  ;;  %v2765_v3 = vunpack.c.h.bf16 %v2915_v41  ;;  %v2332_v45 = vld [vmem:[%s3888_s1 + $0x13] ss:$0 sm:$0xff]  ;;  %v2335_v15 = vld [vmem:[%s3888_s1 + $0x14] ss:$0 sm:$0xff] }
  0x90   : > { %v1676_v46 = vadd.f32 %v1674_v19, %v1662_v23  ;;  %v1677_v13 = vadd.f32 %v1675_v14, %v1663_v40  ;;  %v1716_v2 = vmul.f32 %v2760_v0, %v2314_v12  ;;  %v2768_v54 = vunpack.c.l.bf16 %v2916_v22  ;;  %v2922_v14 = vld [vmem:[%s3155_s28 + $0x98] sm:$0xff]  }
  0x91   : > { %3022 = vmatmul.mubr.bf16.vlgmr.msra.gmra.mxu0 %v1483_v57  ;;  %v1717_v27 = vmul.f32 %v2761_v33, %v2314_v12  ;;  %v2769_v43 = vunpack.c.h.bf16 %v2916_v22  ;;  %v1730_v55 = vmul.f32 %v2764_v7, %v2317_v50  ;;  %v2772_v28 = vunpack.c.l.bf16 %v2917_v59  ;;  %v2924_v22 = vld [vmem:[%s3155_s28 + $0xe8] sm:$0xff]  }
  0x92   : > { %v1690_v63 = vadd.f32 %v1688_v62, %v1676_v46  ;;  %v1691_v36 = vadd.f32 %v1689_v17, %v1677_v13  ;;  %v1731_v25 = vmul.f32 %v2765_v3, %v2317_v50  ;;  %v2773_v31 = vunpack.c.h.bf16 %v2917_v59  ;;  %v2923_v62 = vld [vmem:[%s3155_s28 + $0xc0] sm:$0xff]   ;;  %v2341_v50 = vld [vmem:[%s3888_s1 + $0x16] ss:$0 sm:$0xff] }
  0x93   : > { %v1744_v21 = vmul.f32 %v2768_v54, %v2320_v58  ;;  %v2776_v61 = vunpack.c.l.bf16 %v2918_v51  ;;  %v1745_v5 = vmul.f32 %v2769_v43, %v2320_v58  ;;  %v2777_v10 = vunpack.c.h.bf16 %v2918_v51  ;;  %v2925_v59 = vld [vmem:[%s3155_s28 + $0x110] sm:$0xff]  }
  0x94   : > { %v1704_v53 = vadd.f32 %v1702_v60, %v1690_v63  ;;  %v1705_v37 = vadd.f32 %v1703_v47, %v1691_v36  ;;  %v1758_v56 = vmul.f32 %v2772_v28, %v2323_v18  ;;  %v2780_v11 = vunpack.c.l.bf16 %v2919_v38  ;;  %v2338_v60 = vld [vmem:[%s3888_s1 + $0x15] ss:$0 sm:$0xff]  ;;  %v2344_v58 = vld [vmem:[%s3888_s1 + $0x17] ss:$0 sm:$0xff]  ;;  %v2926_v28 = vld [vmem:[%s3155_s28 + $0x138] sm:$0xff]  }
  0x95   : > { %v1759_v26 = vmul.f32 %v2773_v31, %v2323_v18  ;;  %v2781_v42 = vunpack.c.h.bf16 %v2919_v38  ;;  %v2784_v44 = vunpack.c.l.bf16 %v2920_v49  ;;  %v2785_v20 = vunpack.c.h.bf16 %v2920_v49  ;;  %v2347_v18 = vld [vmem:[%s3888_s1 + $0x18] ss:$0 sm:$0xff]  ;;  %v2927_v38 = vld [vmem:[%s3155_s28 + $0x160] sm:$0xff]  }
  0x96   : > { %v1718_v9 = vadd.f32 %v1716_v2, %v1704_v53  ;;  %v1719_v8 = vadd.f32 %v1717_v27, %v1705_v37  ;;  %v1772_v35 = vmul.f32 %v2776_v61, %v2326_v4  ;;  %v1773_v19 = vmul.f32 %v2777_v10, %v2326_v4 }
  0x97   : > { %v1786_v24 = vmul.f32 %v2780_v11, %v2329_v16  ;;  %v2788_v1 = vunpack.c.l.bf16 %v2921_v52  ;;  %v1787_v41 = vmul.f32 %v2781_v42, %v2329_v16  ;;  %v2789_v39 = vunpack.c.h.bf16 %v2921_v52  ;;  %v2353_v42 = vld [vmem:[%s3888_s1 + $0x1a] ss:$0 sm:$0xff] }
  0x98   : > { %v1732_v48 = vadd.f32 %v1730_v55, %v1718_v9  ;;  %v1733_v29 = vadd.f32 %v1731_v25, %v1719_v8  ;;  %v1800_v0 = vmul.f32 %v2784_v44, %v2332_v45  ;;  %v1801_v23 = vmul.f32 %v2785_v20, %v2332_v45 }
  0x99   : > { %v2792_v33 = vunpack.c.l.bf16 %v2922_v14  ;;  %v2793_v12 = vunpack.c.h.bf16 %v2922_v14  ;;  %v1814_v57 = vmul.f32 %v2788_v1, %v2335_v15  ;;  %v2796_v7 = vunpack.c.l.bf16 %v2923_v62 }
  0x9a   : > { %v1746_v34 = vadd.f32 %v1744_v21, %v1732_v48  ;;  %v1747_v6 = vadd.f32 %v1745_v5, %v1733_v29  ;;  %v1815_v47 = vmul.f32 %v2789_v39, %v2335_v15  ;;  %v2797_v3 = vunpack.c.h.bf16 %v2923_v62 }
  0x9b   : > { %v2800_v2 = vunpack.c.l.bf16 %v2924_v22  ;;  %v2801_v54 = vunpack.c.h.bf16 %v2924_v22  ;;  %v1828_v27 = vmul.f32 %v2792_v33, %v2338_v60  ;;  %v1829_v43 = vmul.f32 %v2793_v12, %v2338_v60 }
  0x9c   : > { %v1760_v30 = vadd.f32 %v1758_v56, %v1746_v34  ;;  %v1761_v32 = vadd.f32 %v1759_v26, %v1747_v6  ;;  %v1842_v51 = vmul.f32 %v2796_v7, %v2341_v50  ;;  %v2804_v55 = vunpack.c.l.bf16 %v2925_v59  ;;  %v2350_v56 = vld [vmem:[%s3888_s1 + $0x19] ss:$0 sm:$0xff] }
  0x9d   : > { %v1843_v25 = vmul.f32 %v2797_v3, %v2341_v50  ;;  %v2805_v31 = vunpack.c.h.bf16 %v2925_v59  ;;  %v1856_v21 = vmul.f32 %v2800_v2, %v2344_v58  ;;  %v1857_v61 = vmul.f32 %v2801_v54, %v2344_v58 }
  0x9e   : > { %v1774_v40 = vadd.f32 %v1772_v35, %v1760_v30  ;;  %v1775_v17 = vadd.f32 %v1773_v19, %v1761_v32  ;;  %v2808_v5 = vunpack.c.l.bf16 %v2926_v28  ;;  %v2809_v10 = vunpack.c.h.bf16 %v2926_v28 }
  0x9f   : > { %v1870_v49 = vmul.f32 %v2804_v55, %v2347_v18  ;;  %v2812_v4 = vunpack.c.l.bf16 %v2927_v38  ;;  %v1871_v29 = vmul.f32 %v2805_v31, %v2347_v18  ;;  %v2813_v26 = vunpack.c.h.bf16 %v2927_v38 }
  0xa0   : > { %v1788_v46 = vadd.f32 %v1786_v24, %v1774_v40  ;;  %v1789_v13 = vadd.f32 %v1787_v41, %v1775_v17  ;;  %v1884_v44 = vmul.f32 %v2808_v5, %v2350_v56  ;;  %v1885_v20 = vmul.f32 %v2809_v10, %v2350_v56  ;;  %v2096_v41 = vld [vmem:[%s3890_s3] ss:$0 sm:$0xff] }
  0xa1   : > { %v1898_v35 = vmul.f32 %v2812_v4, %v2353_v42  ;;  %v1899_v19 = vmul.f32 %v2813_v26, %v2353_v42 }
  0xa2   : > { %v1802_v63 = vadd.f32 %v1800_v0, %v1788_v46  ;;  %v1803_v36 = vadd.f32 %v1801_v23, %v1789_v13 }
  0xa4   : > { %v1816_v53 = vadd.f32 %v1814_v57, %v1802_v63  ;;  %v1817_v37 = vadd.f32 %v1815_v47, %v1803_v36 }
  0xa6   : > { %v1830_v9 = vadd.f32 %v1828_v27, %v1816_v53  ;;  %v1831_v8 = vadd.f32 %v1829_v43, %v1817_v37 }
  0xa8   : > { %v1844_v11 = vadd.f32 %v1842_v51, %v1830_v9  ;;  %v1845_v48 = vadd.f32 %v1843_v25, %v1831_v8 }
  0xaa   : > { %v1858_v16 = vadd.f32 %v1856_v21, %v1844_v11  ;;  %v1859_v52 = vadd.f32 %v1857_v61, %v1845_v48 }
  0xac   : > { %v1872_v34 = vadd.f32 %v1870_v49, %v1858_v16  ;;  %v1873_v6 = vadd.f32 %v1871_v29, %v1859_v52 }
  0xae   : > { %v1886_v45 = vadd.f32 %v1884_v44, %v1872_v34  ;;  %v1887_v24 = vadd.f32 %v1885_v20, %v1873_v6 }
  0xb0   : > { %v1900_v1 = vadd.f32 %v1898_v35, %v1886_v45  ;;  %v1901_v14 = vadd.f32 %v1899_v19, %v1887_v24 }
  0xb2   : > { %v1902_v30 = vpack.c.bf16 %v1901_v14, %v1900_v1 }
  0xb4   : > { %3042 = vmatmul.mubr.bf16.vlgmr.msra.gmra.mxu1 %v1902_v30 }
 0x10c   : > { %v680_v32 = vpop.f32.mrf.mxu0 }
 0x10d   : > { %v681_v62 = vadd.f32 %v2096_v41, %v680_v32 }
 0x10e   : > { %v2983_v39 = vpop.f32.mrf.mxu0 }
 0x110   : > { %v683_v15 = vpop.f32.mrf.mxu0 }
 0x111   : > { %v684_v0 = vadd.f32 %v2096_v41, %v683_v15 }
 0x112   : > { %v2984_v23 = vpop.f32.mrf.mxu0 }
 0x113   : > { %v2478_v40 = vpack.c.bf16 %v684_v0, %v681_v62 }
 0x115   : > { %2479 = vst [vmem:[%s197_s26] sm:$0xff] %v2478_v40  }
 0x12c   : > { %v1099_v17 = vpop.f32.mrf.mxu1 }
 0x12d   : > { %v1100_v22 = vadd.f32 %v2096_v41, %v1099_v17 }
 0x12e   : > { %v3003_v33 = vpop.f32.mrf.mxu1 }
 0x130   : > { %v1102_v12 = vpop.f32.mrf.mxu1 }
 0x131   : > { %v1103_v57 = vadd.f32 %v2096_v41, %v1102_v12 }
 0x132   : > { %v3004_v60 = vpop.f32.mrf.mxu1 }
 0x133   : > { %v2591_v7 = vpack.c.bf16 %v1103_v57, %v1100_v22 }
 0x135   : > { %2872 = vst [vmem:[%s197_s26 + $0x8] sm:$0xff] %v2591_v7  }
 0x151   : > { %v1518_v46 = vpop.f32.mrf.mxu0 }
 0x152   : > { %v1519_v3 = vadd.f32 %v2096_v41, %v1518_v46 }
 0x153   : > { %v3023_v13 = vpop.f32.mrf.mxu0 }
 0x155   : > { %v1521_v47 = vpop.f32.mrf.mxu0 }
 0x156   : > { %v1522_v50 = vadd.f32 %v2096_v41, %v1521_v47 }
 0x157   : > { %v3024_v59 = vpop.f32.mrf.mxu0 }
 0x158   : > { %v2704_v2 = vpack.c.bf16 %v1522_v50, %v1519_v3 }
 0x15a   : > { %2900 = vst [vmem:[%s197_s26 + $0x10] sm:$0xff] %v2704_v2  }
 0x174   : > { %v1937_v54 = vpop.f32.mrf.mxu1 }
 0x175   : > { %v1938_v27 = vadd.f32 %v2096_v41, %v1937_v54 }
 0x176   : > { %v3043_v63 = vpop.f32.mrf.mxu1 }
 0x178   : > { %v1940_v36 = vpop.f32.mrf.mxu1 }
 0x179   : > { %v1941_v43 = vadd.f32 %v2096_v41, %v1940_v36 }
 0x17a   : > { %v3044_v58 = vpop.f32.mrf.mxu1 }
 0x17b   : > { %v2817_v51 = vpack.c.bf16 %v1941_v43, %v1938_v27 }
 0x17d   : > { %2928 = vst [vmem:[%s197_s26 + $0x18] sm:$0xff] %v2817_v51  }
 0x17e PF: > { %s14_s15 = sadd.s32 1, %s3078_s15  }
 0x17f   : > { %p11_p4 = scmp.ge.s32.totalorder %s14_s15, 4  }
 0x181   :  { %13 = sbr.rel (!%p11_p4) target bundleno = 1 (0x1), region = 146 }

</bundles_post_ra>
